<compile_context>
chip_gen: v7x
topology: tpu7x:2x2x1
jax: 0.10.0
libtpu: 0.0.40
codegen_flags: <defaults>
</compile_context>

<pallas_src>
import jax
import jax.numpy as jnp
from jax import lax
from jax.experimental import pallas as pl
from jax.experimental.pallas import tpu as pltpu


def _round_up(x, m):
    return ((x + m - 1) // m) * m


def _vq_kernel(feat_ref, mhi_ref, mlo_ref, b_ref, o1_ref, o2_ref):
    """feat_ref: (TILE_T, F) f32 logits.
    mhi/mlo_ref: (2K, Kp) bf16 hi/lo split of [W1 @ CB1^T ; W2 @ CB2^T] (cols padded).
    b_ref: (2K, 1) f32 bias.  o1/o2_ref: (K, TILE_T) f32 (already in (K, T) layout)."""
    feats = feat_ref[...]                                       # (rows, F) f32
    rows, F = feats.shape
    Kp = mhi_ref.shape[1]
    K = o1_ref.shape[0]

    # torch.argmax semantics: max + first-occurrence tie break over the logit axis.
    mx = jnp.max(feats, axis=-1, keepdims=True)                 # (rows, 1)
    iota_f = lax.broadcasted_iota(jnp.int32, (rows, F), 1)
    idx = jnp.min(jnp.where(feats == mx, iota_f, F),
                  axis=-1, keepdims=True)                       # (rows, 1)

    # One-hot over the (contraction-padded) codeword axis, exact {0,1}.
    iota_k = lax.broadcasted_iota(jnp.int32, (rows, Kp), 1)
    onehot = (iota_k == idx).astype(jnp.float32)                # (rows, Kp)
    onehot_t = onehot.T.astype(jnp.bfloat16)                    # (Kp, rows), cheap XLU transpose

    # Fused codebook lookup + 1x1 conv for BOTH branches, emitted pre-transposed:
    #   out[j, r] = (CB @ W^T)[idx[r], j] + b[j]
    # bf16 hi/lo split reconstructs the f32 gather to ~2^-17 relative accuracy.
    out = (jnp.dot(mhi_ref[...], onehot_t, preferred_element_type=jnp.float32)
           + jnp.dot(mlo_ref[...], onehot_t, preferred_element_type=jnp.float32)
           + b_ref[...])                                        # (2K, rows) f32
    o1_ref[...] = out[:K, :]
    o2_ref[...] = out[K:, :]


@jax.jit
def vq_feature_extractor_pallas(features, cb1, cb2, w1, b1, w2, b2):
    """features: (B, T, F) codeword logits (stand-in for wav2vec output).

    Returns (pred1, pred2), each (B, K, T), matching PyTorch Conv1d NCL output.
    """
    B, T, F = features.shape
    K, _ = cb1.shape
    # One-hot gather assumes the logit dim equals the codebook size (true for
    # the module defaults: num_codewords == 320 == feature dim).
    assert F == K, "one-hot gather requires logit dim == num_codewords"

    Kp = _round_up(K, 128)                                      # contraction axis only: 320 -> 384

    # Fuse lookup + 1x1 conv in the wrapper, already transposed for the kernel:
    #   mT[j, k] = sum_d W[j, d] * CB[k, d]   ->   out[j, t] = mT[j, idx[t]] + b[j]
    hp = lax.Precision.HIGHEST
    mt = jnp.concatenate([jnp.dot(w1, cb1.T, precision=hp),
                          jnp.dot(w2, cb2.T, precision=hp)], axis=0)       # (2K, K) f32
    mt = jnp.pad(mt, ((0, 0), (0, Kp - K)))                                # (2K, Kp)
    mt_hi = mt.astype(jnp.bfloat16)                                        # exact hi/lo split
    mt_lo = (mt - mt_hi.astype(jnp.float32)).astype(jnp.bfloat16)
    b_cat = jnp.concatenate([b1, b2]).astype(jnp.float32)[:, None]         # (2K, 1)

    feats = features.astype(jnp.float32)

    # Tile along T: large tiles for HBM bandwidth; make sure the parallel grid
    # has >= 2 steps when possible (v7x has two TensorCores sharing the grid).
    if T > 512:
        tile_t = 512                                   # multiple of 128 -> partial last block OK
    elif B == 1 and T >= 256:
        tile_t = _round_up((T + 1) // 2, 128)          # split T so grid has >= 2 steps
    else:
        tile_t = T                                     # full-dim block (no lane constraint)
    n_t = pl.cdiv(T, tile_t)

    inv = dict(pipeline_mode=pl.Buffered(1))           # invariant operands: fetched once
    out_spec = pl.BlockSpec((None, K, tile_t), lambda b, t: (b, 0, t))

    pred1, pred2 = pl.pallas_call(
        _vq_kernel,
        out_shape=(jax.ShapeDtypeStruct((B, K, T), jnp.float32),
                   jax.ShapeDtypeStruct((B, K, T), jnp.float32)),
        grid_spec=pltpu.PrefetchScalarGridSpec(
            num_scalar_prefetch=0,
            grid=(B, n_t),
            in_specs=[
                pl.BlockSpec((None, tile_t, F), lambda b, t: (b, t, 0)),   # logits tile
                pl.BlockSpec((2 * K, Kp), lambda b, t: (0, 0), **inv),     # M hi (bf16)
                pl.BlockSpec((2 * K, Kp), lambda b, t: (0, 0), **inv),     # M lo (bf16)
                pl.BlockSpec((2 * K, 1), lambda b, t: (0, 0), **inv),      # bias
            ],
            out_specs=[out_spec, out_spec],
        ),
        compiler_params=pltpu.CompilerParams(
            dimension_semantics=("parallel", "parallel")),
    )(feats, mt_hi, mt_lo, b_cat)
    return pred1, pred2


def _reference(features, cb1, cb2, w1, b1, w2, b2):
    hp = lax.Precision.HIGHEST
    idx = jnp.argmax(features, axis=-1)                       # (B, T)
    cw1 = cb1[idx]                                            # (B, T, D)
    cw2 = cb2[idx]
    p1 = jnp.einsum("btd,kd->bkt", cw1, w1, precision=hp) + b1[None, :, None]
    p2 = jnp.einsum("btd,kd->bkt", cw2, w2, precision=hp) + b2[None, :, None]
    return p1, p2


if __name__ == "__main__":
    # Small, module-consistent shapes.
    B = 2                 # batch
    T = 16                # time steps after feature extraction
    HOP = 32              # samples per frame in the wav2vec stand-in
    NUM_CODEWORDS = 320   # module default (also the feature / logit dim)
    CODEBOOK_DIM = 256    # module default

    key = jax.random.PRNGKey(0)
    k_speech, k_proj, k_cb1, k_cb2, k_w1, k_b1, k_w2, k_b2 = jax.random.split(key, 8)

    # Raw speech input (B, L) and deterministic wav2vec stand-in (plain JAX glue).
    speech_input = jax.random.normal(k_speech, (B, T * HOP), dtype=jnp.float32)
    proj = jax.random.normal(k_proj, (HOP, NUM_CODEWORDS), dtype=jnp.float32) * 0.1
    frames = speech_input.reshape(B, T, HOP)
    features = frames @ proj                                   # (B, T, NUM_CODEWORDS)

    # Deterministic parameters (shapes per module __init__).
    cb1 = jax.random.normal(k_cb1, (NUM_CODEWORDS, CODEBOOK_DIM), dtype=jnp.float32)
    cb2 = jax.random.normal(k_cb2, (NUM_CODEWORDS, CODEBOOK_DIM), dtype=jnp.float32)
    # Conv1d(codebook_dim, num_codewords, 1) weight is (out, in, 1) -> squeeze to (K, D).
    w1 = jax.random.normal(k_w1, (NUM_CODEWORDS, CODEBOOK_DIM), dtype=jnp.float32) * 0.05
    b1 = jax.random.normal(k_b1, (NUM_CODEWORDS,), dtype=jnp.float32) * 0.05
    w2 = jax.random.normal(k_w2, (NUM_CODEWORDS, CODEBOOK_DIM), dtype=jnp.float32) * 0.05
    b2 = jax.random.normal(k_b2, (NUM_CODEWORDS,), dtype=jnp.float32) * 0.05

    pred1, pred2 = vq_feature_extractor_pallas(features, cb1, cb2, w1, b1, w2, b2)
    jax.block_until_ready((pred1, pred2))

    ref1, ref2 = _reference(features, cb1, cb2, w1, b1, w2, b2)
    assert pred1.shape == (B, NUM_CODEWORDS, T) and pred2.shape == (B, NUM_CODEWORDS, T)
    assert jnp.allclose(pred1, ref1, atol=1e-4, rtol=1e-4)
    assert jnp.allclose(pred2, ref2, atol=1e-4, rtol=1e-4)

    print("KERNEL_OK")
</pallas_src>

<mosaic_0001>
module attributes {stable_mosaic.version = 11 : i64} {
  func.func @_vq_kernel(%arg0: i32, %arg1: i32, %arg2: memref<1x16x320xf32, #tpu.memory_space<vmem>>, %arg3: memref<640x384xbf16, #tpu.memory_space<vmem>>, %arg4: memref<640x384xbf16, #tpu.memory_space<vmem>>, %arg5: memref<640x1xf32, #tpu.memory_space<vmem>>, %arg6: memref<1x320x16xf32, #tpu.memory_space<vmem>>, %arg7: memref<1x320x16xf32, #tpu.memory_space<vmem>>) attributes {dimension_semantics = [#tpu.dimension_semantics<parallel>, #tpu.dimension_semantics<parallel>], iteration_bounds = array<i64: 2, 1>, scalar_prefetch = 0 : i64, scratch_operands = 0 : i64, tpu.core_type = #tpu.core_type<tc>, window_params = [{transform_indices = @transform_0, window_bounds = array<i64: 1, 16, 320>}, {pipeline_mode = #tpu.pipeline_mode<synchronous>, transform_indices = @transform_1, window_bounds = array<i64: 640, 384>}, {pipeline_mode = #tpu.pipeline_mode<synchronous>, transform_indices = @transform_2, window_bounds = array<i64: 640, 384>}, {pipeline_mode = #tpu.pipeline_mode<synchronous>, transform_indices = @transform_3, window_bounds = array<i64: 640, 1>}, {transform_indices = @transform_4, window_bounds = array<i64: 1, 320, 16>}, {transform_indices = @transform_5, window_bounds = array<i64: 1, 320, 16>}]} {
    %c0 = arith.constant 0 : index
    %c0_0 = arith.constant 0 : index
    %c0_1 = arith.constant 0 : index
    %0 = vector.load %arg2[%c0, %c0_0, %c0_1] : memref<1x16x320xf32, #tpu.memory_space<vmem>>, vector<1x16x320xf32>
    %1 = vector.shape_cast %0 : vector<1x16x320xf32> to vector<16x320xf32>
    %cst = arith.constant dense<0xFF800000> : vector<16xf32>
    %2 = vector.multi_reduction <maximumf>, %1, %cst [1] : vector<16x320xf32> to vector<16xf32>
    %3 = vector.shape_cast %2 : vector<16xf32> to vector<16x1xf32>
    %4 = tpu.iota {dimensions = array<i32: 1>} : vector<16x320xi32>
    %5 = vector.broadcast %3 : vector<16x1xf32> to vector<16x320xf32>
    %6 = arith.cmpf oeq, %1, %5 : vector<16x320xf32>
    %c320_i32 = arith.constant 320 : i32
    %7 = vector.broadcast %c320_i32 : i32 to vector<16x320xi32>
    %8 = arith.select %6, %4, %7 : vector<16x320xi1>, vector<16x320xi32>
    %cst_2 = arith.constant dense<2147483647> : vector<16xi32>
    %9 = vector.multi_reduction <minsi>, %8, %cst_2 [1] : vector<16x320xi32> to vector<16xi32>
    %10 = vector.shape_cast %9 : vector<16xi32> to vector<16x1xi32>
    %11 = tpu.iota {dimensions = array<i32: 1>} : vector<16x384xi32>
    %12 = vector.broadcast %10 : vector<16x1xi32> to vector<16x384xi32>
    %13 = arith.cmpi eq, %11, %12 : vector<16x384xi32>
    %14 = arith.extui %13 : vector<16x384xi1> to vector<16x384xi32>
    %15 = arith.sitofp %14 : vector<16x384xi32> to vector<16x384xf32>
    %16 = tpu.transpose %15, [1, 0] : vector<16x384xf32> -> vector<384x16xf32>
    %17 = arith.truncf %16 : vector<384x16xf32> to vector<384x16xbf16>
    %c0_3 = arith.constant 0 : index
    %c0_4 = arith.constant 0 : index
    %18 = vector.load %arg3[%c0_3, %c0_4] : memref<640x384xbf16, #tpu.memory_space<vmem>>, vector<640x384xbf16>
    %cst_5 = arith.constant dense<0.000000e+00> : vector<640x16xf32>
    %19 = tpu.matmul %18, %17, %cst_5 {dimension_numbers = #tpu.dot_dimension_numbers<[1], [0], [0], [1], [0, 0, 1, 1], [], []>} : vector<640x384xbf16>, vector<384x16xbf16>, vector<640x16xf32> -> vector<640x16xf32>
    %c0_6 = arith.constant 0 : index
    %c0_7 = arith.constant 0 : index
    %20 = vector.load %arg4[%c0_6, %c0_7] : memref<640x384xbf16, #tpu.memory_space<vmem>>, vector<640x384xbf16>
    %cst_8 = arith.constant dense<0.000000e+00> : vector<640x16xf32>
    %21 = tpu.matmul %20, %17, %cst_8 {dimension_numbers = #tpu.dot_dimension_numbers<[1], [0], [0], [1], [0, 0, 1, 1], [], []>} : vector<640x384xbf16>, vector<384x16xbf16>, vector<640x16xf32> -> vector<640x16xf32>
    %22 = arith.addf %19, %21 : vector<640x16xf32>
    %c0_9 = arith.constant 0 : index
    %c0_10 = arith.constant 0 : index
    %23 = vector.load %arg5[%c0_9, %c0_10] : memref<640x1xf32, #tpu.memory_space<vmem>>, vector<640x1xf32>
    %24 = vector.broadcast %23 : vector<640x1xf32> to vector<640x16xf32>
    %25 = arith.addf %22, %24 : vector<640x16xf32>
    %26 = vector.extract_strided_slice %25 {offsets = [0, 0], sizes = [320, 16], strides = [1, 1]} : vector<640x16xf32> to vector<320x16xf32>
    %c0_11 = arith.constant 0 : index
    %c0_12 = arith.constant 0 : index
    %c0_13 = arith.constant 0 : index
    %27 = vector.load %arg6[%c0_11, %c0_12, %c0_13] : memref<1x320x16xf32, #tpu.memory_space<vmem>>, vector<1x320x16xf32>
    %28 = vector.shape_cast %27 : vector<1x320x16xf32> to vector<320x16xf32>
    %29 = vector.shape_cast %26 : vector<320x16xf32> to vector<1x320x16xf32>
    tpu.vector_store %arg6[%c0_11, %c0_12, %c0_13], %29 {strides = array<i32>} : memref<1x320x16xf32, #tpu.memory_space<vmem>>, vector<1x320x16xf32>,
    %30 = vector.extract_strided_slice %25 {offsets = [320, 0], sizes = [320, 16], strides = [1, 1]} : vector<640x16xf32> to vector<320x16xf32>
    %c0_14 = arith.constant 0 : index
    %c0_15 = arith.constant 0 : index
    %c0_16 = arith.constant 0 : index
    %31 = vector.load %arg7[%c0_14, %c0_15, %c0_16] : memref<1x320x16xf32, #tpu.memory_space<vmem>>, vector<1x320x16xf32>
    %32 = vector.shape_cast %31 : vector<1x320x16xf32> to vector<320x16xf32>
    %33 = vector.shape_cast %30 : vector<320x16xf32> to vector<1x320x16xf32>
    tpu.vector_store %arg7[%c0_14, %c0_15, %c0_16], %33 {strides = array<i32>} : memref<1x320x16xf32, #tpu.memory_space<vmem>>, vector<1x320x16xf32>,
    return
  }
  func.func @transform_0(%arg0: i32, %arg1: i32) -> (i32, i32, i32) {
    %c0_i32 = arith.constant 0 : i32
    %c0_i32_0 = arith.constant 0 : i32
    return %arg0, %arg1, %c0_i32 : i32, i32, i32
  }
  func.func @transform_1(%arg0: i32, %arg1: i32) -> (i32, i32) {
    %c0_i32 = arith.constant 0 : i32
    %c0_i32_0 = arith.constant 0 : i32
    %c0_i32_1 = arith.constant 0 : i32
    return %c0_i32, %c0_i32_0 : i32, i32
  }
  func.func @transform_2(%arg0: i32, %arg1: i32) -> (i32, i32) {
    %c0_i32 = arith.constant 0 : i32
    %c0_i32_0 = arith.constant 0 : i32
    %c0_i32_1 = arith.constant 0 : i32
    return %c0_i32, %c0_i32_0 : i32, i32
  }
  func.func @transform_3(%arg0: i32, %arg1: i32) -> (i32, i32) {
    %c0_i32 = arith.constant 0 : i32
    %c0_i32_0 = arith.constant 0 : i32
    %c0_i32_1 = arith.constant 0 : i32
    return %c0_i32, %c0_i32_0 : i32, i32
  }
  func.func @transform_4(%arg0: i32, %arg1: i32) -> (i32, i32, i32) {
    %c0_i32 = arith.constant 0 : i32
    %c0_i32_0 = arith.constant 0 : i32
    return %arg0, %c0_i32, %arg1 : i32, i32, i32
  }
  func.func @transform_5(%arg0: i32, %arg1: i32) -> (i32, i32, i32) {
    %c0_i32 = arith.constant 0 : i32
    %c0_i32_0 = arith.constant 0 : i32
    return %arg0, %c0_i32, %arg1 : i32, i32, i32
  }
}

</mosaic_0001>

<bundles_post_ra>
// kernel: vq_feature_extractor_pallas.1
= control target key start
LH: loop header
LB: loop body
LE: loop exit
PB: predicated region body
PF: predicated region fallthrough
CT: control target
= control target key end

     0   :  { %s5331_s18 = smov 0   ;;  %s5333_s19 = smov 0   ;;  %s7639_s0 = inlined_call_operand.vmem [shape: f32[2,16,320], index: 0, kind: input, shape index: {}]   ;;  %s7640_s1 = inlined_call_operand.vmem [shape: bf16[640,384], index: 1, kind: input, shape index: {}]   ;;  %s7641_s2 = inlined_call_operand.vmem [shape: bf16[640,384], index: 2, kind: input, shape index: {}]   ;;  %s7642_s3 = inlined_call_operand.vmem [shape: f32[640,1], index: 3, kind: input, shape index: {}]   ;;  %s7643_s4 = inlined_call_operand.vmem [shape: f32[2,320,16], index: 4, kind: output, shape index: {0}]   ;;  %s7644_s5 = inlined_call_operand.vmem [shape: f32[2,320,16], index: 5, kind: output, shape index: {1}]  }
   0x1   :  { %s5335_s20 = smov 0  }
   0x2 LB: > { %s28_s21 = sadd.s32 1, %s5293_s19  ;;  %p4285_p0 = scmp.ge.s32.totalorder %s5297_s20, 1  ;;  %s5297_s20 = sphi %s5335_s20, %s16_s20   ;;  %s5293_s19 = sphi %s5333_s19, %s7854_s19   ;;  %s5289_s18 = sphi %s5331_s18, %s7853_s18  }
   0x3   : > { %p30_p1 = scmp.ge.s32.totalorder %s28_s21, 2  ;;  %p214_p2 = scmp.lt.s32.totalorder %s5297_s20, 3 }
   0x5   : > { %s7856_s21 = smov (%p30_p1, %s28_s21), 0  ;;  %p215_p3 = pnand %p4285_p0, %p214_p2 }
   0x7   : > { %218 = sbr.rel (%p215_p3) target bundleno = 1378 (0x562), region = 36 }
   0xe   : > { %p259_p4 = scmp.lt.s32.totalorder %s5289_s18, 1  ;;  %vm292_vm0 = vcmask 523264   ;;  %v303_v12 = vlaneseq  ;;  %v5299_v51 = vmov 0.0   ;;  %v5300_v61 = vmov 0   ;;  %v4955_v62 = vld [vmem:[%s7641_s2 + $0x8] ss:$12 sps:$4 sm:$0xff]  }
   0xf   : > { %1455 = vmatprep.subr.bf16.mxu0 %v5300_v61  ;;  %4649 = vmatprep.mubr.bf16.mxu1 %v4955_v62  ;;  %v4965_v63 = vld [vmem:[%s7641_s2 + $0x4] ss:$12 sps:$4 sm:$0xff]  }
  0x10   : > { %s7858_s18 = smov (!%p259_p4, %s5289_s18), 1  ;;  %v5357_v13 = vand.u32 127, %v303_v12  ;;  %1487 = vmatprep.mubr.bf16.mxu0 %v4965_v63 }
  0x11   : > { %s4841_s22 = smul.u32 48, %s7858_s18 }
  0x12   : > { %v5360_v14 = vadd.s32 256, %v5357_v13  ;;  %v5363_v16 = vadd.s32 128, %v5357_v13  ;;  %s4842_s11 = smul.u32 320, %s7858_s18 }
  0x13   : > { %s267_s25 = scalar_lea.vmem %s7639_s0, %s4841_s22 }
  0x14   : > { %v286_v0 = vld [vmem:[%s267_s25] sm:$0xff]  ;;  %v287_v1 = vld [vmem:[%s267_s25 + $0x8] sm:$0xff]  ;;  %v288_v2 = vld [vmem:[%s267_s25 + $0x10] sm:$0xff]  ;;  %s7163_s14 = scalar_lea.vmem %s7643_s4, %s4842_s11  ;;  %s7430_s17 = scalar_lea.vmem %s7644_s5, %s4842_s11 }
  0x15   : > { %v293_v3 = vsel %vm292_vm0, %v288_v2, -inf  ;;  %v289_v4 = vld [vmem:[%s267_s25 + $0x18] sm:$0xff]  ;;  %v290_v5 = vld [vmem:[%s267_s25 + $0x20] sm:$0xff]  ;;  %v291_v6 = vld [vmem:[%s267_s25 + $0x28] sm:$0xff] }
  0x16   : > { %v294_v7 = vmax.f32 %v286_v0, %v293_v3  ;;  %v298_v8 = vsel %vm292_vm0, %v291_v6, -inf }
  0x17   : > { %v299_v9 = vmax.f32 %v289_v4, %v298_v8 }
  0x18   : > { %v295_v10 = vmax.f32 %v294_v7, %v287_v1 }
  0x19   : > { %v300_v11 = vmax.f32 %v299_v9, %v290_v5 }
  0x1a   : > { %296 = vmax.xlane.f32.xlu0 %v295_v10 }
  0x1e   : > { %301 = vmax.xlane.f32.xlu0 %v300_v11 }
  0xa7   : > { %v297_v15 = vpop.xlane.xlu0 %296 }
  0xa8   : > { %vm307_vm1 = vcmp.eq.f32.partialorder %v286_v0, %v297_v15  ;;  %vm309_vm2 = vcmp.eq.f32.partialorder %v288_v2, %v297_v15  ;;  %vm308_vm3 = vcmp.eq.f32.partialorder %v287_v1, %v297_v15 }
  0xa9   : > { %v313_v17 = vsel %vm307_vm1, %v5357_v13, 320  ;;  %v315_v18 = vsel %vm309_vm2, %v5360_v14, 320  ;;  %v314_v21 = vsel %vm308_vm3, %v5363_v16, 320  ;;  %vm4067_vm3 = vcmask 130048  }
  0xaa   : > { %v319_v19 = vsel %vm292_vm0, %v315_v18, 2147483647 }
  0xab   : > { %v302_v20 = vpop.xlane.xlu0 %301  ;;  %vm320_vm4 = vcmp.lt.s32.totalorder %v313_v17, %v319_v19 }
  0xac   : > { %vm310_vm5 = vcmp.eq.f32.partialorder %v289_v4, %v302_v20  ;;  %vm312_vm6 = vcmp.eq.f32.partialorder %v291_v6, %v302_v20  ;;  %v321_v22 = vsel %vm320_vm4, %v313_v17, %v319_v19  ;;  %vm311_vm7 = vcmp.eq.f32.partialorder %v290_v5, %v302_v20 }
  0xad   : > { %v316_v23 = vsel %vm310_vm5, %v5357_v13, 320  ;;  %v318_v24 = vsel %vm312_vm6, %v5360_v14, 320  ;;  %vm322_vm8 = vcmp.lt.s32.totalorder %v321_v22, %v314_v21  ;;  %v317_v28 = vsel %vm311_vm7, %v5363_v16, 320 }
  0xae   : > { %v323_v25 = vsel %vm322_vm8, %v321_v22, %v314_v21  ;;  %v338_v26 = vsel %vm292_vm0, %v318_v24, 2147483647 }
  0xaf   : > { %v325_v27 = vshra.s32 %v323_v25, 16  ;;  %vm339_vm9 = vcmp.lt.s32.totalorder %v316_v23, %v338_v26  ;;  %v324_v34 = vand.u32 65535, %v323_v25 }
  0xb0   : > { %v340_v29 = vsel %vm339_vm9, %v316_v23, %v338_v26 }
  0xb1   : > { %v327_v30 = vcvt.s32.f32 %v325_v27  ;;  %vm341_vm10 = vcmp.lt.s32.totalorder %v340_v29, %v317_v28  ;;  %v326_v36 = vcvt.s32.f32 %v324_v34 }
  0xb2   : > { %v342_v31 = vsel %vm341_vm10, %v340_v29, %v317_v28 }
  0xb3   : > { %328 = vmin.xlane.f32.xlu1 %v327_v30  ;;  %v344_v32 = vshra.s32 %v342_v31, 16  ;;  %v343_v37 = vand.u32 65535, %v342_v31 }
  0xb5   : > { %v346_v33 = vcvt.s32.f32 %v344_v32  ;;  %v345_v40 = vcvt.s32.f32 %v343_v37 }
  0xb7   : > { %347 = vmin.xlane.f32.xlu1 %v346_v33 }
 0x140   : > { %v329_v35 = vpop.xlane.xlu1 %328 }
 0x141   : > { %vm330_vm11 = vcmp.eq.f32.partialorder %v327_v30, %v329_v35  ;;  %v335_v42 = vcvt.f32.s32 %v329_v35 }
 0x142   : > { %v331_v38 = vsel %vm330_vm11, %v326_v36, inf }
 0x143   : > { %332 = vmin.xlane.f32.xlu0 %v331_v38  ;;  %v336_v45 = vshll.u32 %v335_v42, 16 }
 0x144   : > { %v348_v39 = vpop.xlane.xlu1 %347 }
 0x145   : > { %vm349_vm12 = vcmp.eq.f32.partialorder %v346_v33, %v348_v39  ;;  %v354_v43 = vcvt.f32.s32 %v348_v39 }
 0x146   : > { %v350_v41 = vsel %vm349_vm12, %v345_v40, inf }
 0x147   : > { %351 = vmin.xlane.f32.xlu1 %v350_v41  ;;  %v355_v48 = vshll.u32 %v354_v43, 16 }
 0x1d0   : > { %v333_v44 = vpop.xlane.xlu0 %332 }
 0x1d1   : > { %v334_v46 = vcvt.f32.s32 %v333_v44 }
 0x1d3   : > { %v337_v47 = vadd.s32 %v336_v45, %v334_v46 }
 0x1d4   : > { %v352_v49 = vpop.xlane.xlu1 %351 }
 0x1d5   : > { %v353_v50 = vcvt.f32.s32 %v352_v49  ;;  %vm358_vm13 = vcmp.eq.s32.totalorder %v5363_v16, %v337_v47  ;;  %vm357_vm14 = vcmp.eq.s32.totalorder %v5357_v13, %v337_v47  ;;  %vm359_vm15 = vcmp.eq.s32.totalorder %v5360_v14, %v337_v47 }
 0x1d6   : > { %v4290_v52 = vsel %vm358_vm13, 1.0, %v5299_v51  ;;  %v4289_v53 = vsel %vm357_vm14, 1.0, %v5299_v51  ;;  %v4291_v54 = vsel %vm359_vm15, 1.0, %v5299_v51 }
 0x1d7   : > { %v356_v55 = vadd.s32 %v355_v48, %v353_v50  ;;  %407 = vxpose.xlu1.b32.start [1/2] (short) %v4290_v52, 128  ;;  %v4869_v56 = vpack.i.bf16 %v4289_v53, %v4291_v54 }
 0x1d9   : > { %4870 = vxpose.xlu0.b32.start [1/2] (short) %v4869_v56, 128  ;;  %vm361_vm0 = vcmp.eq.s32.totalorder %v5363_v16, %v356_v55  ;;  %vm360_vm1 = vcmp.eq.s32.totalorder %v5357_v13, %v356_v55  ;;  %vm362_vm2 = vcmp.eq.s32.totalorder %v5360_v14, %v356_v55 }
 0x1da   : > { %v4293_v57 = vsel %vm361_vm0, 1.0, %v5299_v51  ;;  %v4292_v58 = vsel %vm360_vm1, 1.0, %v5299_v51  ;;  %v4294_v59 = vsel %vm362_vm2, 1.0, %v5299_v51 }
 0x1db   : > { %408 = vxpose.xlu1.b32.end [2/2] (short) %v4293_v57, 128  ;;  %v4871_v60 = vpack.i.bf16 %v4292_v58, %v4294_v59 }
 0x1dd   : > { %4872 = vxpose.xlu0.b32.end [2/2] (short) %v4871_v60, 128 }
 0x1f9   : > { %4954 = vset.pattern.permute.xlu1 %v5300_v61 }
 0x206   : > { %4953 = vset.pattern.permute.xlu0 %v5300_v61 }
 0x257   : > { %v5388_v1 = vpop.trf.xlu1 }
 0x259   : > { %v4873_v0 = vpop.trf.xlu0 }
 0x25a   : > { %v4874_v2 = vunpack.i.l.bf16 %v4873_v0  ;;  %v4877_v4 = vunpack.i.h.bf16 %v4873_v0 }
 0x25b   : > { %v5394_v10 = vpop.trf.xlu1 }
 0x25d   : > { %v4878_v3 = vpop.trf.xlu0 }
 0x25e   : > { %v4879_v5 = vunpack.i.l.bf16 %v4878_v3  ;;  %v4882_v6 = vunpack.i.h.bf16 %v4878_v3 }
 0x25f   : > { %v5400_v16 = vpop.trf.xlu1 }
 0x260   : > { %v5390_v7 = vpack.c.bf16 %v4879_v5, %v4874_v2  ;;  %v5392_v8 = vpack.c.bf16 %v4882_v6, %v4877_v4 }
 0x261   : > { %v4883_v9 = vpop.trf.xlu0 }
 0x262   : > { %1456 = vmatpush1.bf16.msra.mxu0 %v5392_v8  ;;  %4633 = vmatprep.subr.bf16.mxu1 %v5390_v7  ;;  %v4884_v11 = vunpack.i.l.bf16 %v4883_v9  ;;  %v4887_v13 = vunpack.i.h.bf16 %v4883_v9 }
 0x263   : > { %4634 = vmatpush3.bf16.msra.mxu1 %v5390_v7  ;;  %1457 = vmatprep.subr.bf16.mxu0 %v5300_v61  ;;  %v5410_v23 = vpop.trf.xlu1 }
 0x265   : > { %v4888_v12 = vpop.trf.xlu0 }
 0x266   : > { %v4889_v14 = vunpack.i.l.bf16 %v4888_v12  ;;  %v4892_v15 = vunpack.i.h.bf16 %v4888_v12 }
 0x267   : > { %v5420_v29 = vpop.trf.xlu1 }
 0x268   : > { %v5402_v17 = vpack.c.bf16 %v4889_v14, %v4884_v11  ;;  %v5404_v18 = vpack.c.bf16 %v4892_v15, %v4887_v13 }
 0x269   : > { %v4893_v19 = vpop.trf.xlu0 }
 0x26a   : > { %1458 = vmatpush1.bf16.msra.mxu0 %v5404_v18  ;;  %4635 = vmatprep.subr.bf16.mxu1 %v5402_v17  ;;  %v4894_v20 = vunpack.i.l.bf16 %v4893_v19  ;;  %v4897_v22 = vunpack.i.h.bf16 %v4893_v19  ;;  %v4956_v19 = vld [vmem:[%s7641_s2 + $0x20] ss:$12 sps:$4 sm:$0xff]  }
 0x26b   : > { %4636 = vmatpush3.bf16.msra.mxu1 %v5402_v17  ;;  %1459 = vmatprep.subr.bf16.mxu0 %v5300_v61  ;;  %v5426_v38 = vpop.trf.xlu1 }
 0x26d   : > { %v4898_v21 = vpop.trf.xlu0 }
 0x26e   : > { %v4899_v24 = vunpack.i.l.bf16 %v4898_v21  ;;  %v4902_v25 = vunpack.i.h.bf16 %v4898_v21  ;;  %v4957_v21 = vld [vmem:[%s7641_s2 + $0x38] ss:$12 sps:$4 sm:$0xff]  }
 0x26f   : > { %v5432_v44 = vpop.trf.xlu1 }
 0x270   : > { %v5412_v26 = vpack.c.bf16 %v4899_v24, %v4894_v20  ;;  %v5414_v27 = vpack.c.bf16 %v4902_v25, %v4897_v22  ;;  %v5471_v20 = vpack.c.bf16 %v5394_v10, %v5388_v1  ;;  %v5482_v24 = vpack.c.bf16 %v5410_v23, %v5400_v16  ;;  %v4958_v1 = vld [vmem:[%s7641_s2 + $0x50] ss:$12 sps:$4 sm:$0xff]   ;;  %v4959_v16 = vld [vmem:[%s7641_s2 + $0x68] ss:$12 sps:$4 sm:$0xff]   ;;  %v4960_v25 = vld [vmem:[%s7641_s2 + $0x80] ss:$12 sps:$4 sm:$0xff]  }
 0x271   : > { %v4903_v28 = vpop.trf.xlu0  ;;  %v5493_v10 = vpack.c.bf16 %v5426_v38, %v5420_v29  ;;  %v4967_v38 = vld [vmem:[%s7641_s2 + $0xe0] ss:$12 sps:$4 sm:$0xff]  }
 0x272   : > { %1460 = vmatpush1.bf16.msra.mxu0 %v5414_v27  ;;  %4637 = vmatprep.subr.bf16.mxu1 %v5412_v26  ;;  %v4907_v30 = vunpack.i.h.bf16 %v4903_v28  ;;  %v4904_v31 = vunpack.i.l.bf16 %v4903_v28  ;;  %v4961_v28 = vld [vmem:[%s7641_s2 + $0x98] ss:$12 sps:$4 sm:$0xff]  }
 0x273   : > { %4638 = vmatpush3.bf16.msra.mxu1 %v5412_v26  ;;  %1461 = vmatprep.subr.bf16.mxu0 %v5300_v61  ;;  %v430_v51 = vpop.trf.xlu1 }
 0x275   : > { %v4908_v32 = vpop.trf.xlu0 }
 0x276   : > { %v4912_v33 = vunpack.i.h.bf16 %v4908_v32  ;;  %v4909_v34 = vunpack.i.l.bf16 %v4908_v32 }
 0x277   : > { %v431_v57 = vpop.trf.xlu1 }
 0x278   : > { %v5422_v35 = vpack.c.bf16 %v4909_v34, %v4904_v31  ;;  %v5424_v36 = vpack.c.bf16 %v4912_v33, %v4907_v30  ;;  %v4962_v31 = vld [vmem:[%s7641_s2 + $0xb0] ss:$12 sps:$4 sm:$0xff]   ;;  %v4966_v33 = vld [vmem:[%s7641_s2 + $0xc8] ss:$12 sps:$4 sm:$0xff]  }
 0x279   : > { %v4913_v37 = vpop.trf.xlu0 }
 0x27a   : > { %1462 = vmatpush1.bf16.msra.mxu0 %v5424_v36  ;;  %4639 = vmatprep.subr.bf16.mxu1 %v5422_v35  ;;  %v4917_v39 = vunpack.i.h.bf16 %v4913_v37  ;;  %v4914_v40 = vunpack.i.l.bf16 %v4913_v37  ;;  %v4963_v37 = vld [vmem:[%s7641_s2] ss:$12 sps:$4 sm:$0xff]  }
 0x27b   : > { %4640 = vmatpush3.bf16.msra.mxu1 %v5422_v35  ;;  %1463 = vmatprep.subr.bf16.mxu0 %v5300_v61  ;;  %v432_v4 = vpop.trf.xlu1 }
 0x27d   : > { %v4918_v41 = vpop.trf.xlu0 }
 0x27e   : > { %v4922_v42 = vunpack.i.h.bf16 %v4918_v41  ;;  %v4919_v43 = vunpack.i.l.bf16 %v4918_v41  ;;  %v4970_v41 = vld [vmem:[%s7641_s2 + $0x18] ss:$12 sps:$4 sm:$0xff]  }
 0x27f   : > { %v433_v13 = vpop.trf.xlu1 }
 0x280   : > { %v5434_v45 = vpack.c.bf16 %v4919_v43, %v4914_v40  ;;  %v5436_v46 = vpack.c.bf16 %v4922_v42, %v4917_v39  ;;  %v4968_v39 = vld [vmem:[%s7641_s2 + $0x1c] ss:$12 sps:$4 sm:$0xff]   ;;  %v4971_v40 = vld [vmem:[%s7641_s2 + $0xf8] ss:$12 sps:$4 sm:$0xff]   ;;  %v4973_v43 = vld [vmem:[%s7641_s2 + $0x34] ss:$12 sps:$4 sm:$0xff]  }
 0x281   : > { %v4923_v47 = vpop.trf.xlu0  ;;  %v4972_v42 = vld [vmem:[%s7641_s2 + $0x110] ss:$12 sps:$4 sm:$0xff]  }
 0x282   : > { %1464 = vmatpush1.bf16.msra.mxu0 %v5436_v46  ;;  %4641 = vmatprep.subr.bf16.mxu1 %v5434_v45  ;;  %v4927_v48 = vunpack.i.h.bf16 %v4923_v47  ;;  %v4924_v49 = vunpack.i.l.bf16 %v4923_v47  ;;  %v4977_v47 = vld [vmem:[%s7641_s2 + $0x140] ss:$12 sps:$4 sm:$0xff]  }
 0x283   : > { %4642 = vmatpush3.bf16.msra.mxu1 %v5434_v45  ;;  %1465 = vmatprep.subr.bf16.mxu0 %v5300_v61  ;;  %v434_v22 = vpop.trf.xlu1 }
 0x284   : > { %v5521_v30 = vpack.c.bf16 %v434_v22, %v433_v13  ;;  %v5007_v13 = vld [vmem:[%s7641_s2 + $0x260] ss:$12 sps:$4 sm:$0xff]  }
 0x285   : > { %v4928_v50 = vpop.trf.xlu0  ;;  %v5013_v22 = vld [vmem:[%s7641_s2 + $0xf4] ss:$12 sps:$4 sm:$0xff]  }
 0x286   : > { %v4932_v52 = vunpack.i.h.bf16 %v4928_v50  ;;  %v4929_v53 = vunpack.i.l.bf16 %v4928_v50  ;;  %v4980_v50 = vld [vmem:[%s7641_s2 + $0x48] ss:$12 sps:$4 sm:$0xff]  }
 0x288   : > { %v5442_v54 = vpack.c.bf16 %v4929_v53, %v4924_v49  ;;  %v5444_v55 = vpack.c.bf16 %v4932_v52, %v4927_v48  ;;  %v4978_v48 = vld [vmem:[%s7641_s2 + $0x4c] ss:$12 sps:$4 sm:$0xff]   ;;  %v4983_v52 = vld [vmem:[%s7641_s2 + $0x64] ss:$12 sps:$4 sm:$0xff]   ;;  %v4986_v53 = vld [vmem:[%s7641_s2 + $0x188] ss:$12 sps:$4 sm:$0xff]  }
 0x289   : > { %v4933_v56 = vpop.trf.xlu0  ;;  %v4981_v49 = vld [vmem:[%s7641_s2 + $0x158] ss:$12 sps:$4 sm:$0xff]  }
 0x28a   : > { %1466 = vmatpush1.bf16.msra.mxu0 %v5444_v55  ;;  %4643 = vmatprep.subr.bf16.mxu1 %v5442_v54  ;;  %v4937_v58 = vunpack.i.h.bf16 %v4933_v56  ;;  %v4934_v59 = vunpack.i.l.bf16 %v4933_v56  ;;  %v4987_v56 = vld [vmem:[%s7641_s2 + $0x1a0] ss:$12 sps:$4 sm:$0xff]  }
 0x28b   : > { %4644 = vmatpush3.bf16.msra.mxu1 %v5442_v54  ;;  %1467 = vmatprep.subr.bf16.mxu0 %v5300_v61 }
 0x28d   : > { %v4938_v60 = vpop.trf.xlu0 }
 0x28e   : > { %v4942_v62 = vunpack.i.h.bf16 %v4938_v60  ;;  %v4939_v63 = vunpack.i.l.bf16 %v4938_v60  ;;  %v4993_v60 = vld [vmem:[%s7641_s2 + $0x94] ss:$12 sps:$4 sm:$0xff]  }
 0x290   : > { %v5450_v0 = vpack.c.bf16 %v4939_v63, %v4934_v59  ;;  %v5452_v2 = vpack.c.bf16 %v4942_v62, %v4937_v58  ;;  %v4990_v58 = vld [vmem:[%s7641_s2 + $0x78] ss:$12 sps:$4 sm:$0xff]   ;;  %v4992_v59 = vld [vmem:[%s7641_s2 + $0x1d0] ss:$12 sps:$4 sm:$0xff]   ;;  %v4996_v62 = vld [vmem:[%s7641_s2 + $0x1e8] ss:$12 sps:$4 sm:$0xff]  }
 0x291   : > { %v4943_v3 = vpop.trf.xlu0  ;;  %v4995_v63 = vld [vmem:[%s7641_s2 + $0x90] ss:$12 sps:$4 sm:$0xff]  }
 0x292   : > { %1468 = vmatpush1.bf16.msra.mxu0 %v5452_v2  ;;  %4645 = vmatprep.subr.bf16.mxu1 %v5450_v0  ;;  %v4947_v5 = vunpack.i.h.bf16 %v4943_v3  ;;  %v4944_v6 = vunpack.i.l.bf16 %v4943_v3  ;;  %v4998_v3 = vld [vmem:[%s7641_s2 + $0xac] ss:$12 sps:$4 sm:$0xff]  }
 0x293   : > { %4646 = vmatpush3.bf16.msra.mxu1 %v5450_v0  ;;  %1469 = vmatprep.subr.bf16.mxu0 %v5300_v61 }
 0x295   : > { %v4948_v9 = vpop.trf.xlu0 }
 0x296   : > { %v4952_v11 = vunpack.i.h.bf16 %v4948_v9  ;;  %v4949_v12 = vunpack.i.l.bf16 %v4948_v9  ;;  %v5003_v9 = vld [vmem:[%s7641_s2 + $0xc4] ss:$12 sps:$4 sm:$0xff]  }
 0x298   : > { %v5458_v14 = vpack.c.bf16 %v4949_v12, %v4944_v6  ;;  %v5460_v15 = vpack.c.bf16 %v4952_v11, %v4947_v5  ;;  %v5000_v5 = vld [vmem:[%s7641_s2 + $0xa8] ss:$12 sps:$4 sm:$0xff]   ;;  %v5002_v6 = vld [vmem:[%s7641_s2 + $0x230] ss:$12 sps:$4 sm:$0xff]   ;;  %v5005_v12 = vld [vmem:[%s7641_s2 + $0xc0] ss:$12 sps:$4 sm:$0xff]  }
 0x299   : > { %v5006_v11 = vld [vmem:[%s7641_s2 + $0x248] ss:$12 sps:$4 sm:$0xff]  }
 0x29a   : > { %1470 = vmatpush1.bf16.msra.mxu0 %v5460_v15  ;;  %4647 = vmatprep.subr.bf16.mxu1 %v5458_v14 }
 0x29b   : > { %4648 = vmatpush3.bf16.msra.mxu1 %v5458_v14  ;;  %1471 = vmatprep.subr.bf16.mxu0 %v5300_v61 }
 0x29c   : > { %2801 = vmatprep.subr.bf16.mxu1 %v5300_v61 }
 0x29e   : > { %1472 = vmatpush1.bf16.msra.mxu0 %v5471_v20  ;;  %4650 = vmatmul.mubr.bf16.vlgmr.msra.gmra.mrb[0].mxu1 %v4956_v19  ;;  %v5011_v19 = vld [vmem:[%s7641_s2 + $0x278] ss:$12 sps:$4 sm:$0xff]  }
 0x29f   : > { %2802 = vmatpush1.bf16.msra.mxu1 %v5392_v8  ;;  %1473 = vmatprep.subr.bf16.mxu0 %v5300_v61  ;;  %v435_v8 = vpop.trf.xlu1 }
 0x2a0   : > { %2803 = vmatprep.subr.bf16.mxu1 %v5300_v61  ;;  %4653 = vmatprep.mubr.bf16.mxu1 %v4957_v21  ;;  %v5012_v21 = vld [vmem:[%s7641_s2 + $0x290] ss:$12 sps:$4 sm:$0xff]  }
 0x2a2   : > { %1474 = vmatpush1.bf16.msra.mxu0 %v5482_v24 }
 0x2a3   : > { %2804 = vmatpush1.bf16.msra.mxu1 %v5404_v18  ;;  %1475 = vmatprep.subr.bf16.mxu0 %v5300_v61  ;;  %v5503_v18 = vpack.c.bf16 %v430_v51, %v5432_v44  ;;  %v436_v23 = vpop.trf.xlu1  ;;  %v4976_v44 = vld [vmem:[%s7641_s2 + $0x128] ss:$12 sps:$4 sm:$0xff]   ;;  %v4982_v51 = vld [vmem:[%s7641_s2 + $0x170] ss:$12 sps:$4 sm:$0xff]  }
 0x2a4   : > { %2805 = vmatprep.subr.bf16.mxu1 %v5300_v61  ;;  %v5530_v32 = vpack.c.bf16 %v436_v23, %v435_v8  ;;  %v5017_v8 = vld [vmem:[%s7641_s2 + $0x2c0] ss:$12 sps:$4 sm:$0xff]   ;;  %v5022_v23 = vld [vmem:[%s7641_s2 + $0x2f0] ss:$12 sps:$4 sm:$0xff]  }
 0x2a6   : > { %1476 = vmatpush1.bf16.msra.mxu0 %v5493_v10  ;;  %4654 = vmatmul.mubr.bf16.gmra.mrb[4].mxu1 %v4958_v1  ;;  %v5015_v1 = vld [vmem:[%s7641_s2 + $0xf0] ss:$12 sps:$4 sm:$0xff]  }
 0x2a7   : > { %2806 = vmatpush1.bf16.msra.mxu1 %v5414_v27  ;;  %1477 = vmatprep.subr.bf16.mxu0 %v5300_v61  ;;  %v5512_v27 = vpack.c.bf16 %v432_v4, %v431_v57  ;;  %v437_v29 = vpop.trf.xlu1  ;;  %v4988_v57 = vld [vmem:[%s7641_s2 + $0x7c] ss:$12 sps:$4 sm:$0xff]   ;;  %v5001_v4 = vld [vmem:[%s7641_s2 + $0x218] ss:$12 sps:$4 sm:$0xff]  }
 0x2a8   : > { %2807 = vmatprep.subr.bf16.mxu1 %v5300_v61  ;;  %4657 = vmatprep.mubr.bf16.mxu1 %v4959_v16  ;;  %v5021_v16 = vld [vmem:[%s7641_s2 + $0x2d8] ss:$12 sps:$4 sm:$0xff]  }
 0x2aa   : > { %1478 = vmatpush1.bf16.msra.mxu0 %v5503_v18 }
 0x2ab   : > { %2808 = vmatpush1.bf16.msra.mxu1 %v5424_v36  ;;  %1479 = vmatprep.subr.bf16.mxu0 %v5300_v61  ;;  %v438_v34 = vpop.trf.xlu1 }
 0x2ac   : > { %2809 = vmatprep.subr.bf16.mxu1 %v5300_v61  ;;  %v5539_v36 = vpack.c.bf16 %v438_v34, %v437_v29  ;;  %v5027_v29 = vld [vmem:[%s7641_s2 + $0x320] ss:$12 sps:$4 sm:$0xff]   ;;  %v5032_v34 = vld [vmem:[%s7641_s2 + $0x350] ss:$12 sps:$4 sm:$0xff]  }
 0x2ae   : > { %1480 = vmatpush1.bf16.msra.mxu0 %v5512_v27  ;;  %4658 = vmatmul.mubr.bf16.gmra.mrb[8].mxu1 %v4960_v25  ;;  %v5023_v25 = vld [vmem:[%s7641_s2 + $0x124] ss:$12 sps:$4 sm:$0xff]  }
 0x2af   : > { %2810 = vmatpush1.bf16.msra.mxu1 %v5436_v46  ;;  %1481 = vmatprep.subr.bf16.mxu0 %v5300_v61  ;;  %v4975_v46 = vld [vmem:[%s7641_s2 + $0x30] ss:$12 sps:$4 sm:$0xff]  }
 0x2b0   : > { %2811 = vmatprep.subr.bf16.mxu1 %v5300_v61  ;;  %4661 = vmatprep.mubr.bf16.mxu1 %v4961_v28  ;;  %v5025_v28 = vld [vmem:[%s7641_s2 + $0x120] ss:$12 sps:$4 sm:$0xff]  }
 0x2b2   : > { %1482 = vmatpush1.bf16.msra.mxu0 %v5521_v30 }
 0x2b3   : > { %2812 = vmatpush1.bf16.msra.mxu1 %v5444_v55  ;;  %1483 = vmatprep.subr.bf16.mxu0 %v5300_v61  ;;  %v4985_v55 = vld [vmem:[%s7641_s2 + $0x60] ss:$12 sps:$4 sm:$0xff]  }
 0x2b4   : > { %2813 = vmatprep.subr.bf16.mxu1 %v5300_v61 }
 0x2b6   : > { %1484 = vmatpush1.bf16.msra.mxu0 %v5530_v32  ;;  %4662 = vmatmul.mubr.bf16.gmra.mrb[12].mxu1 %v4962_v31  ;;  %v5031_v31 = vld [vmem:[%s7641_s2 + $0x338] ss:$12 sps:$4 sm:$0xff]  }
 0x2b7   : > { %2814 = vmatpush1.bf16.msra.mxu1 %v5452_v2  ;;  %1485 = vmatprep.subr.bf16.mxu0 %v5300_v61  ;;  %v4997_v2 = vld [vmem:[%s7641_s2 + $0x200] ss:$12 sps:$4 sm:$0xff]  }
 0x2b8   : > { %2815 = vmatprep.subr.bf16.mxu1 %v5300_v61  ;;  %4665 = vmatprep.mubr.bf16.mxu1 %v4966_v33  ;;  %v5030_v33 = vld [vmem:[%s7641_s2 + $0x138] ss:$12 sps:$4 sm:$0xff]  }
 0x2ba   : > { %1486 = vmatpush1.bf16.msra.mxu0 %v5539_v36 }
 0x2bb   : > { %2816 = vmatpush1.bf16.msra.mxu1 %v5460_v15  ;;  %4729 = vmatprep.subr.bf16.mxu0 %v5390_v7  ;;  %v5008_v15 = vld [vmem:[%s7641_s2 + $0xdc] ss:$12 sps:$4 sm:$0xff]  }
 0x2bc   : > { %2817 = vmatprep.subr.bf16.mxu1 %v5300_v61 }
 0x2bd   : > { %1488 = vmatmul.mubr.bf16.vlgmr.msra.gmra.mrb[0].mxu0 %v4963_v37  ;;  %v5036_v37 = vld [vmem:[%s7641_s2 + $0x368] ss:$12 sps:$4 sm:$0xff]  }
 0x2be   : > { %4666 = vmatmul.mubr.bf16.gmra.mrb[16].mxu1 %v4967_v38  ;;  %4730 = vmatpush3.bf16.msra.mxu0 %v5390_v7  ;;  %v3509_v38 = vld [vmem:[%s7642_s3 + $0x10] sm:$0xff] }
 0x2bf   : > { %2818 = vmatpush1.bf16.msra.mxu1 %v5471_v20  ;;  %4731 = vmatprep.subr.bf16.mxu0 %v5402_v17  ;;  %v5010_v20 = vld [vmem:[%s7641_s2 + $0xd8] ss:$12 sps:$4 sm:$0xff]  }
 0x2c0   : > { %2819 = vmatprep.subr.bf16.mxu1 %v5300_v61  ;;  %1495 = vmatprep.mubr.bf16.mxu0 %v4968_v39  ;;  %v3510_v39 = vld [vmem:[%s7642_s3 + $0x18] sm:$0xff] }
 0x2c1   : > { %4669 = vmatprep.mubr.bf16.mxu1 %v4971_v40  ;;  %v5035_v40 = vld [vmem:[%s7641_s2 + $0x150] ss:$12 sps:$4 sm:$0xff]  }
 0x2c2   : > { %4732 = vmatpush3.bf16.msra.mxu0 %v5402_v17 }
 0x2c3   : > { %2820 = vmatpush1.bf16.msra.mxu1 %v5482_v24  ;;  %4733 = vmatprep.subr.bf16.mxu0 %v5412_v26  ;;  %v5016_v24 = vld [vmem:[%s7641_s2 + $0x2a8] ss:$12 sps:$4 sm:$0xff]  }
 0x2c4   : > { %2821 = vmatprep.subr.bf16.mxu1 %v5300_v61 }
 0x2c5   : > { %1496 = vmatmul.mubr.bf16.gmra.mrb[4].mxu0 %v4970_v41  ;;  %v5037_v41 = vld [vmem:[%s7641_s2 + $0x380] ss:$12 sps:$4 sm:$0xff]  }
 0x2c6   : > { %4670 = vmatmul.mubr.bf16.gmra.mrb[20].mxu1 %v4972_v42  ;;  %4734 = vmatpush3.bf16.msra.mxu0 %v5412_v26  ;;  %v5038_v42 = vld [vmem:[%s7641_s2 + $0x16c] ss:$12 sps:$4 sm:$0xff]  }
 0x2c7   : > { %2822 = vmatpush1.bf16.msra.mxu1 %v5493_v10  ;;  %4735 = vmatprep.subr.bf16.mxu0 %v5422_v35  ;;  %v5018_v10 = vld [vmem:[%s7641_s2 + $0x10c] ss:$12 sps:$4 sm:$0xff]  }
 0x2c8   : > { %2823 = vmatprep.subr.bf16.mxu1 %v5300_v61  ;;  %1503 = vmatprep.mubr.bf16.mxu0 %v4973_v43  ;;  %v5041_v43 = vld [vmem:[%s7641_s2 + $0x398] ss:$12 sps:$4 sm:$0xff]  }
 0x2c9   : > { %4673 = vmatprep.mubr.bf16.mxu1 %v4976_v44  ;;  %v3512_v44 = vld [vmem:[%s7642_s3 + $0x28] sm:$0xff] }
 0x2ca   : > { %4736 = vmatpush3.bf16.msra.mxu0 %v5422_v35 }
 0x2cb   : > { %2824 = vmatpush1.bf16.msra.mxu1 %v5503_v18  ;;  %4737 = vmatprep.subr.bf16.mxu0 %v5434_v45  ;;  %v5020_v18 = vld [vmem:[%s7641_s2 + $0x108] ss:$12 sps:$4 sm:$0xff]  }
 0x2cc   : > { %2825 = vmatprep.subr.bf16.mxu1 %v5300_v61 }
 0x2cd   : > { %1504 = vmatmul.mubr.bf16.gmra.mrb[8].mxu0 %v4975_v46  ;;  %v3514_v46 = vld [vmem:[%s7642_s3 + $0x38] sm:$0xff] }
 0x2ce   : > { %4674 = vmatmul.mubr.bf16.gmra.mrb[24].mxu1 %v4977_v47  ;;  %4738 = vmatpush3.bf16.msra.mxu0 %v5434_v45  ;;  %v3507_v47 = vld [vmem:[%s7642_s3] sm:$0xff] }
 0x2cf   : > { %2826 = vmatpush1.bf16.msra.mxu1 %v5512_v27  ;;  %4739 = vmatprep.subr.bf16.mxu0 %v5442_v54  ;;  %v5026_v27 = vld [vmem:[%s7641_s2 + $0x308] ss:$12 sps:$4 sm:$0xff]  }
 0x2d0   : > { %2827 = vmatprep.subr.bf16.mxu1 %v5300_v61  ;;  %1511 = vmatprep.mubr.bf16.mxu0 %v4978_v48  ;;  %v5040_v48 = vld [vmem:[%s7641_s2 + $0x168] ss:$12 sps:$4 sm:$0xff]  }
 0x2d1   : > { %4677 = vmatprep.mubr.bf16.mxu1 %v4981_v49  ;;  %3589 = vperm.xlu0 %4953, %v3507_v47   ;;  %v5042_v49 = vld [vmem:[%s7641_s2 + $0x3b0] ss:$12 sps:$4 sm:$0xff]  }
 0x2d2   : > { %4740 = vmatpush3.bf16.msra.mxu0 %v5442_v54  ;;  %v3541_v47 = vld [vmem:[%s7642_s3 + $0x110] sm:$0xff] }
 0x2d3   : > { %2828 = vmatpush1.bf16.msra.mxu1 %v5521_v30  ;;  %4741 = vmatprep.subr.bf16.mxu0 %v5450_v0  ;;  %v5028_v30 = vld [vmem:[%s7641_s2 + $0x13c] ss:$12 sps:$4 sm:$0xff]  }
 0x2d4   : > { %2829 = vmatprep.subr.bf16.mxu1 %v5300_v61 }
 0x2d5   : > { %1512 = vmatmul.mubr.bf16.gmra.mrb[12].mxu0 %v4980_v50  ;;  %v5043_v50 = vld [vmem:[%s7641_s2 + $0x184] ss:$12 sps:$4 sm:$0xff]  }
 0x2d6   : > { %4678 = vmatmul.mubr.bf16.gmra.mrb[28].mxu1 %v4982_v51  ;;  %4742 = vmatpush3.bf16.msra.mxu0 %v5450_v0  ;;  %v5048_v51 = vld [vmem:[%s7640_s1 + $0x4] ss:$12 sps:$4 sm:$0xff]  }
 0x2d7   : > { %2830 = vmatpush1.bf16.msra.mxu1 %v5530_v32  ;;  %4743 = vmatprep.subr.bf16.mxu0 %v5458_v14  ;;  %v3508_v32 = vld [vmem:[%s7642_s3 + $0x8] sm:$0xff] }
 0x2d8   : > { %2831 = vmatprep.subr.bf16.mxu1 %v5300_v61  ;;  %1519 = vmatprep.mubr.bf16.mxu0 %v4983_v52  ;;  %v4991_v61 = vld [vmem:[%s7641_s2 + $0x1b8] ss:$12 sps:$4 sm:$0xff]   ;;  %v3516_v52 = vld [vmem:[%s7642_s3 + $0x48] sm:$0xff] }
 0x2d9   : > { %4681 = vmatprep.mubr.bf16.mxu1 %v4986_v53  ;;  %3594 = vperm.xlu1 %4954, %v3508_v32   ;;  %v3511_v53 = vld [vmem:[%s7642_s3 + $0x20] sm:$0xff] }
 0x2da   : > { %4744 = vmatpush3.bf16.msra.mxu0 %v5458_v14  ;;  %3609 = vperm.xlu0 %4953, %v3511_v53   ;;  %v5079_v32 = vld [vmem:[%s7641_s2 + $0x214] ss:$12 sps:$4 sm:$0xff]  }
 0x2db   : > { %2832 = vmatpush1.bf16.msra.mxu1 %v5539_v36  ;;  %v5033_v36 = vld [vmem:[%s7641_s2 + $0x154] ss:$12 sps:$4 sm:$0xff]  }
 0x2dc   : > { %4825 = vmatprep.subr.bf16.mxu1 %v5390_v7 }
 0x2dd   : > { %1520 = vmatmul.mubr.bf16.gmra.mrb[16].mxu0 %v4985_v55  ;;  %3599 = vperm.xlu1 %4954, %v3509_v38   ;;  %v3518_v55 = vld [vmem:[%s7642_s3 + $0x58] sm:$0xff]  ;;  %v3537_v38 = vld [vmem:[%s7642_s3 + $0xf0] sm:$0xff] }
 0x2de   : > { %4682 = vmatmul.mubr.bf16.gmra.mrb[32].mxu1 %v4987_v56  ;;  %1527 = vmatprep.mubr.bf16.mxu0 %v4988_v57  ;;  %v3513_v56 = vld [vmem:[%s7642_s3 + $0x30] sm:$0xff]  ;;  %v5045_v57 = vld [vmem:[%s7641_s2 + $0x180] ss:$12 sps:$4 sm:$0xff]  }
 0x2df   : > { %4685 = vmatprep.mubr.bf16.mxu1 %v4991_v61  ;;  %3619 = vperm.xlu0 %4953, %v3513_v56   ;;  %v5046_v61 = vld [vmem:[%s7640_s1] ss:$12 sps:$4 sm:$0xff]  }
 0x2e0   : > { %v3548_v56 = vld [vmem:[%s7642_s3 + $0x148] sm:$0xff] }
 0x2e1   : > { %3604 = vperm.xlu1 %4954, %v3510_v39   ;;  %v5081_v39 = vld [vmem:[%s7641_s2 + $0x210] ss:$12 sps:$4 sm:$0xff]  }
 0x2e5   : > { %1528 = vmatmul.mubr.bf16.gmra.mrb[20].mxu0 %v4990_v58  ;;  %3614 = vperm.xlu1 %4954, %v3512_v44   ;;  %v5049_v58 = vld [vmem:[%s7641_s2 + $0x19c] ss:$12 sps:$4 sm:$0xff]   ;;  %v3539_v44 = vld [vmem:[%s7642_s3 + $0x100] sm:$0xff] }
 0x2e6   : > { %4686 = vmatmul.mubr.bf16.gmra.mrb[36].mxu1 %v4992_v59  ;;  %1535 = vmatprep.mubr.bf16.mxu0 %v4993_v60  ;;  %v5052_v59 = vld [vmem:[%s7640_s1 + $0x1c] ss:$12 sps:$4 sm:$0xff]  }
 0x2e7   : > { %4689 = vmatprep.mubr.bf16.mxu1 %v4996_v62  ;;  %v3520_v60 = vld [vmem:[%s7642_s3 + $0x68] sm:$0xff]  ;;  %v3515_v62 = vld [vmem:[%s7642_s3 + $0x40] sm:$0xff] }
 0x2e8   : > { %3629 = vperm.xlu0 %4953, %v3515_v62   ;;  %v5093_v62 = vld [vmem:[%s7641_s2 + $0x240] ss:$12 sps:$4 sm:$0xff]  }
 0x2e9   : > { %3624 = vperm.xlu1 %4954, %v3514_v46   ;;  %v3546_v46 = vld [vmem:[%s7642_s3 + $0x138] sm:$0xff] }
 0x2ed   : > { %1536 = vmatmul.mubr.bf16.gmra.mrb[24].mxu0 %v4995_v63  ;;  %3634 = vperm.xlu1 %4954, %v3516_v52   ;;  %v3522_v63 = vld [vmem:[%s7642_s3 + $0x78] sm:$0xff]  ;;  %v5091_v52 = vld [vmem:[%s7641_s2 + $0x244] ss:$12 sps:$4 sm:$0xff]  }
 0x2ee   : > { %4690 = vmatmul.mubr.bf16.gmra.mrb[40].mxu1 %v4997_v2  ;;  %1543 = vmatprep.mubr.bf16.mxu0 %v4998_v3  ;;  %v3517_v2 = vld [vmem:[%s7642_s3 + $0x50] sm:$0xff]  ;;  %v5051_v3 = vld [vmem:[%s7641_s2 + $0x198] ss:$12 sps:$4 sm:$0xff]  }
 0x2ef   : > { %4693 = vmatprep.mubr.bf16.mxu1 %v5001_v4  ;;  %3639 = vperm.xlu0 %4953, %v3517_v2   ;;  %v5054_v4 = vld [vmem:[%s7640_s1 + $0x18] ss:$12 sps:$4 sm:$0xff]   ;;  %v5096_v2 = vld [vmem:[%s7640_s1 + $0xc0] ss:$12 sps:$4 sm:$0xff]  }
 0x2f1   : > { %3644 = vperm.xlu1 %4954, %v3518_v55   ;;  %v5094_v55 = vld [vmem:[%s7640_s1 + $0xc4] ss:$12 sps:$4 sm:$0xff]  }
 0x2f5   : > { %1544 = vmatmul.mubr.bf16.gmra.mrb[28].mxu0 %v5000_v5  ;;  %3654 = vperm.xlu1 %4954, %v3520_v60   ;;  %v5055_v5 = vld [vmem:[%s7641_s2 + $0x1b4] ss:$12 sps:$4 sm:$0xff]  }
 0x2f6   : > { %4694 = vmatmul.mubr.bf16.gmra.mrb[44].mxu1 %v5002_v6  ;;  %1551 = vmatprep.mubr.bf16.mxu0 %v5003_v9  ;;  %v3524_v6 = vld [vmem:[%s7642_s3 + $0x88] sm:$0xff]  ;;  %v3519_v9 = vld [vmem:[%s7642_s3 + $0x60] sm:$0xff] }
 0x2f7   : > { %4697 = vmatprep.mubr.bf16.mxu1 %v5006_v11  ;;  %3649 = vperm.xlu0 %4953, %v3519_v9   ;;  %v3521_v11 = vld [vmem:[%s7642_s3 + $0x70] sm:$0xff] }
 0x2f9   : > { %3664 = vperm.xlu1 %4954, %v3522_v63  }
 0x2fb   : > { %3659 = vperm.xlu0 %4953, %v3521_v11   ;;  %v3549_v11 = vld [vmem:[%s7642_s3 + $0x150] sm:$0xff] }
 0x2fd   : > { %1552 = vmatmul.mubr.bf16.gmra.mrb[32].mxu0 %v5005_v12  ;;  %3674 = vperm.xlu1 %4954, %v3524_v6   ;;  %v5057_v12 = vld [vmem:[%s7641_s2 + $0x1b0] ss:$12 sps:$4 sm:$0xff]   ;;  %v3547_v6 = vld [vmem:[%s7642_s3 + $0x140] sm:$0xff] }
 0x2fe   : > { %4698 = vmatmul.mubr.bf16.gmra.mrb[48].mxu1 %v5007_v13  ;;  %1559 = vmatprep.mubr.bf16.mxu0 %v5008_v15  ;;  %v5060_v13 = vld [vmem:[%s7640_s1 + $0x30] ss:$12 sps:$4 sm:$0xff]   ;;  %v5061_v15 = vld [vmem:[%s7641_s2 + $0x1cc] ss:$12 sps:$4 sm:$0xff]  }
 0x2ff   : > { %4701 = vmatprep.mubr.bf16.mxu1 %v5011_v19  ;;  %v3528_v19 = vld [vmem:[%s7642_s3 + $0xa8] sm:$0xff] }
 0x305   : > { %1560 = vmatmul.mubr.bf16.gmra.mrb[36].mxu0 %v5010_v20  ;;  %v3523_v20 = vld [vmem:[%s7642_s3 + $0x80] sm:$0xff] }
 0x306   : > { %4702 = vmatmul.mubr.bf16.gmra.mrb[52].mxu1 %v5012_v21  ;;  %1567 = vmatprep.mubr.bf16.mxu0 %v5013_v22  ;;  %v3525_v21 = vld [vmem:[%s7642_s3 + $0x90] sm:$0xff] }
 0x307   : > { %4705 = vmatprep.mubr.bf16.mxu1 %v5016_v24  ;;  %3669 = vperm.xlu0 %4953, %v3523_v20   ;;  %v5063_v22 = vld [vmem:[%s7641_s2 + $0x1c8] ss:$12 sps:$4 sm:$0xff]  }
 0x308   : > { %v5066_v24 = vld [vmem:[%s7640_s1 + $0x48] ss:$12 sps:$4 sm:$0xff]  }
 0x30b   : > { %3679 = vperm.xlu0 %4953, %v3525_v21   ;;  %v3556_v21 = vld [vmem:[%s7642_s3 + $0x188] sm:$0xff] }
 0x30d   : > { %1568 = vmatmul.mubr.bf16.gmra.mrb[40].mxu0 %v5015_v1  ;;  %v5067_v1 = vld [vmem:[%s7641_s2 + $0x1e4] ss:$12 sps:$4 sm:$0xff]  }
 0x30e   : > { %4706 = vmatmul.mubr.bf16.gmra.mrb[56].mxu1 %v5017_v8  ;;  %1575 = vmatprep.mubr.bf16.mxu0 %v5018_v10  ;;  %v3532_v8 = vld [vmem:[%s7642_s3 + $0xc8] sm:$0xff]  ;;  %v3527_v10 = vld [vmem:[%s7642_s3 + $0xa0] sm:$0xff] }
 0x30f   : > { %4709 = vmatprep.mubr.bf16.mxu1 %v5021_v16  ;;  %3689 = vperm.xlu0 %4953, %v3527_v10   ;;  %v3529_v16 = vld [vmem:[%s7642_s3 + $0xb0] sm:$0xff] }
 0x310   : > { %v5105_v10 = vld [vmem:[%s7641_s2 + $0x270] ss:$12 sps:$4 sm:$0xff]  }
 0x313   : > { %3699 = vperm.xlu0 %4953, %v3529_v16   ;;  %v5108_v16 = vld [vmem:[%s7640_s1 + $0xf0] ss:$12 sps:$4 sm:$0xff]  }
 0x315   : > { %1576 = vmatmul.mubr.bf16.gmra.mrb[44].mxu0 %v5020_v18  ;;  %v5069_v18 = vld [vmem:[%s7641_s2 + $0x1e0] ss:$12 sps:$4 sm:$0xff]  }
 0x316   : > { %4710 = vmatmul.mubr.bf16.gmra.mrb[60].mxu1 %v5022_v23  ;;  %1583 = vmatprep.mubr.bf16.mxu0 %v5023_v25  ;;  %v5072_v23 = vld [vmem:[%s7640_s1 + $0x60] ss:$12 sps:$4 sm:$0xff]   ;;  %v5073_v25 = vld [vmem:[%s7641_s2 + $0x1fc] ss:$12 sps:$4 sm:$0xff]  }
 0x317   : > { %4713 = vmatprep.mubr.bf16.mxu1 %v5026_v27  ;;  %v3536_v27 = vld [vmem:[%s7642_s3 + $0xe8] sm:$0xff] }
 0x31d   : > { %1584 = vmatmul.mubr.bf16.gmra.mrb[48].mxu0 %v5025_v28  ;;  %v3531_v28 = vld [vmem:[%s7642_s3 + $0xc0] sm:$0xff] }
 0x31e   : > { %4714 = vmatmul.mubr.bf16.gmra.mrb[64].mxu1 %v5027_v29  ;;  %1591 = vmatprep.mubr.bf16.mxu0 %v5028_v30  ;;  %v3533_v29 = vld [vmem:[%s7642_s3 + $0xd0] sm:$0xff]  ;;  %v5075_v30 = vld [vmem:[%s7641_s2 + $0x1f8] ss:$12 sps:$4 sm:$0xff]  }
 0x31f   : > { %4717 = vmatprep.mubr.bf16.mxu1 %v5031_v31  ;;  %3709 = vperm.xlu0 %4953, %v3531_v28   ;;  %v5078_v31 = vld [vmem:[%s7640_s1 + $0x78] ss:$12 sps:$4 sm:$0xff]  }
 0x323   : > { %3719 = vperm.xlu0 %4953, %v3533_v29   ;;  %v3557_v29 = vld [vmem:[%s7642_s3 + $0x190] sm:$0xff] }
 0x325   : > { %1592 = vmatmul.mubr.bf16.gmra.mrb[52].mxu0 %v5030_v33  ;;  %v5082_v33 = vld [vmem:[%s7640_s1 + $0x94] ss:$12 sps:$4 sm:$0xff]  }
 0x326   : > { %4718 = vmatmul.mubr.bf16.gmra.mrb[68].mxu1 %v5032_v34  ;;  %1599 = vmatprep.mubr.bf16.mxu0 %v5033_v36  ;;  %v3540_v34 = vld [vmem:[%s7642_s3 + $0x108] sm:$0xff]  ;;  %v3535_v36 = vld [vmem:[%s7642_s3 + $0xe0] sm:$0xff] }
 0x327   : > { %4721 = vmatprep.mubr.bf16.mxu1 %v5036_v37  ;;  %3729 = vperm.xlu0 %4953, %v3535_v36   ;;  %v3542_v37 = vld [vmem:[%s7642_s3 + $0x118] sm:$0xff] }
 0x32b   : > { %3739 = vperm.xlu0 %4953, %v3537_v38   ;;  %v5114_v38 = vld [vmem:[%s7640_s1 + $0x108] ss:$12 sps:$4 sm:$0xff]  }
 0x32d   : > { %1600 = vmatmul.mubr.bf16.gmra.mrb[56].mxu0 %v5035_v40  ;;  %v5084_v40 = vld [vmem:[%s7640_s1 + $0x90] ss:$12 sps:$4 sm:$0xff]  }
 0x32e   : > { %4722 = vmatmul.mubr.bf16.gmra.mrb[72].mxu1 %v5037_v41  ;;  %1607 = vmatprep.mubr.bf16.mxu0 %v5038_v42  ;;  %v5085_v41 = vld [vmem:[%s7641_s2 + $0x22c] ss:$12 sps:$4 sm:$0xff]  }
 0x32f   : > { %4725 = vmatprep.mubr.bf16.mxu1 %v5041_v43  ;;  %v5088_v42 = vld [vmem:[%s7640_s1 + $0xac] ss:$12 sps:$4 sm:$0xff]   ;;  %3749 = vperm.xlu0 %4953, %v3539_v44  }
 0x330   : > { %v3544_v43 = vld [vmem:[%s7642_s3 + $0x128] sm:$0xff] }
 0x331   : > { %v3564_v44 = vld [vmem:[%s7642_s3 + $0x1c8] sm:$0xff] }
 0x333   : > { %3759 = vperm.xlu0 %4953, %v3541_v47  }
 0x335   : > { %1608 = vmatmul.mubr.bf16.gmra.mrb[60].mxu0 %v5040_v48 }
 0x336   : > { %4726 = vmatmul.mubr.bf16.gmra.mrb[76].mxu1 %v5042_v49  ;;  %1615 = vmatprep.mubr.bf16.mxu0 %v5043_v50  ;;  %v5087_v49 = vld [vmem:[%s7641_s2 + $0x228] ss:$12 sps:$4 sm:$0xff]  }
 0x337   : > { %2833 = vmatprep.mubr.bf16.mxu1 %v5048_v51  ;;  %v5090_v51 = vld [vmem:[%s7640_s1 + $0xa8] ss:$12 sps:$4 sm:$0xff]  }
 0x33d   : > { %1616 = vmatmul.mubr.bf16.gmra.mrb[64].mxu0 %v5045_v57  ;;  %v3543_v57 = vld [vmem:[%s7642_s3 + $0x120] sm:$0xff] }
 0x33e   : > { %2834 = vmatmul.mubr.bf16.vlgmr.msra.gmra.mrb[80].mxu1 %v5046_v61  ;;  %1623 = vmatprep.mubr.bf16.mxu0 %v5049_v58  ;;  %v3550_v58 = vld [vmem:[%s7642_s3 + $0x158] sm:$0xff] }
 0x33f   : > { %4833 = vmatpush3.bf16.msra.mxu1 %v5390_v7  ;;  %2841 = vmatprep.mubr.bf16.mxu1 %v5052_v59  ;;  %v5058_v7 = vld [vmem:[%s7640_s1 + $0x34] ss:$12 sps:$4 sm:$0xff]  }
 0x340   : > { %4826 = vmatprep.subr.bf16.mxu1 %v5402_v17  ;;  %3769 = vperm.xlu0 %4953, %v3543_v57   ;;  %v3545_v59 = vld [vmem:[%s7642_s3 + $0x130] sm:$0xff]  ;;  %v5117_v57 = vld [vmem:[%s7641_s2 + $0x2a0] ss:$12 sps:$4 sm:$0xff]  }
 0x343   : > { %4834 = vmatpush3.bf16.msra.mxu1 %v5402_v17  ;;  %v3526_v17 = vld [vmem:[%s7642_s3 + $0x98] sm:$0xff] }
 0x344   : > { %4827 = vmatprep.subr.bf16.mxu1 %v5412_v26  ;;  %3684 = vperm.xlu1 %4954, %v3526_v17   ;;  %v3554_v17 = vld [vmem:[%s7642_s3 + $0x178] sm:$0xff] }
 0x345   : > { %1624 = vmatmul.mubr.bf16.gmra.mrb[68].mxu0 %v5051_v3  ;;  %3779 = vperm.xlu0 %4953, %v3545_v59   ;;  %v5097_v3 = vld [vmem:[%s7641_s2 + $0x25c] ss:$12 sps:$4 sm:$0xff]   ;;  %v5120_v59 = vld [vmem:[%s7640_s1 + $0x120] ss:$12 sps:$4 sm:$0xff]  }
 0x346   : > { %2842 = vmatmul.mubr.bf16.gmra.mrb[84].mxu1 %v5054_v4  ;;  %1631 = vmatprep.mubr.bf16.mxu0 %v5055_v5  ;;  %v5100_v5 = vld [vmem:[%s7640_s1 + $0xdc] ss:$12 sps:$4 sm:$0xff]  }
 0x347   : > { %4835 = vmatpush3.bf16.msra.mxu1 %v5412_v26  ;;  %2849 = vmatprep.mubr.bf16.mxu1 %v5058_v7  ;;  %v5064_v26 = vld [vmem:[%s7640_s1 + $0x4c] ss:$12 sps:$4 sm:$0xff]  }
 0x348   : > { %4828 = vmatprep.subr.bf16.mxu1 %v5422_v35  ;;  %3694 = vperm.xlu1 %4954, %v3528_v19   ;;  %v3552_v7 = vld [vmem:[%s7642_s3 + $0x168] sm:$0xff]  ;;  %v5103_v19 = vld [vmem:[%s7641_s2 + $0x274] ss:$12 sps:$4 sm:$0xff]  }
 0x349   : > { %3789 = vperm.xlu0 %4953, %v3547_v6   ;;  %v3563_v6 = vld [vmem:[%s7642_s3 + $0x1c0] sm:$0xff] }
 0x34b   : > { %4836 = vmatpush3.bf16.msra.mxu1 %v5422_v35  ;;  %v3530_v35 = vld [vmem:[%s7642_s3 + $0xb8] sm:$0xff] }
 0x34c   : > { %4829 = vmatprep.subr.bf16.mxu1 %v5434_v45  ;;  %3704 = vperm.xlu1 %4954, %v3530_v35   ;;  %v5106_v35 = vld [vmem:[%s7640_s1 + $0xf4] ss:$12 sps:$4 sm:$0xff]  }
 0x34d   : > { %1632 = vmatmul.mubr.bf16.gmra.mrb[72].mxu0 %v5057_v12  ;;  %3799 = vperm.xlu0 %4953, %v3549_v11   ;;  %v3565_v11 = vld [vmem:[%s7642_s3 + $0x1d0] sm:$0xff] }
 0x34e   : > { %2850 = vmatmul.mubr.bf16.gmra.mrb[88].mxu1 %v5060_v13  ;;  %1639 = vmatprep.mubr.bf16.mxu0 %v5061_v15  ;;  %v5099_v13 = vld [vmem:[%s7641_s2 + $0x258] ss:$12 sps:$4 sm:$0xff]  }
 0x34f   : > { %4837 = vmatpush3.bf16.msra.mxu1 %v5434_v45  ;;  %2857 = vmatprep.mubr.bf16.mxu1 %v5064_v26  ;;  %v5070_v45 = vld [vmem:[%s7640_s1 + $0x64] ss:$12 sps:$4 sm:$0xff]  }
 0x350   : > { %4830 = vmatprep.subr.bf16.mxu1 %v5442_v54  ;;  %3714 = vperm.xlu1 %4954, %v3532_v8   ;;  %v5102_v26 = vld [vmem:[%s7640_s1 + $0xd8] ss:$12 sps:$4 sm:$0xff]  }
 0x353   : > { %4838 = vmatpush3.bf16.msra.mxu1 %v5442_v54  ;;  %v3534_v54 = vld [vmem:[%s7642_s3 + $0xd8] sm:$0xff] }
 0x354   : > { %4831 = vmatprep.subr.bf16.mxu1 %v5450_v0  ;;  %3724 = vperm.xlu1 %4954, %v3534_v54  }
 0x355   : > { %1640 = vmatmul.mubr.bf16.gmra.mrb[76].mxu0 %v5063_v22  ;;  %v3551_v22 = vld [vmem:[%s7642_s3 + $0x160] sm:$0xff] }
 0x356   : > { %2858 = vmatmul.mubr.bf16.gmra.mrb[92].mxu1 %v5066_v24  ;;  %1647 = vmatprep.mubr.bf16.mxu0 %v5067_v1  ;;  %v3558_v1 = vld [vmem:[%s7642_s3 + $0x198] sm:$0xff] }
 0x357   : > { %4839 = vmatpush3.bf16.msra.mxu1 %v5450_v0  ;;  %2865 = vmatprep.mubr.bf16.mxu1 %v5070_v45  ;;  %v5076_v0 = vld [vmem:[%s7640_s1 + $0x7c] ss:$12 sps:$4 sm:$0xff]   ;;  %v3553_v45 = vld [vmem:[%s7642_s3 + $0x170] sm:$0xff] }
 0x358   : > { %4832 = vmatprep.subr.bf16.mxu1 %v5458_v14  ;;  %3734 = vperm.xlu1 %4954, %v3536_v27   ;;  %v3555_v27 = vld [vmem:[%s7642_s3 + $0x180] sm:$0xff] }
 0x359   : > { %3809 = vperm.xlu0 %4953, %v3551_v22  }
 0x35b   : > { %4840 = vmatpush3.bf16.msra.mxu1 %v5458_v14  ;;  %v3538_v14 = vld [vmem:[%s7642_s3 + $0xf8] sm:$0xff] }
 0x35c   : > { %3744 = vperm.xlu1 %4954, %v3538_v14   ;;  %v3562_v14 = vld [vmem:[%s7642_s3 + $0x1b8] sm:$0xff] }
 0x35d   : > { %1648 = vmatmul.mubr.bf16.gmra.mrb[80].mxu0 %v5069_v18  ;;  %3819 = vperm.xlu0 %4953, %v3553_v45   ;;  %v5109_v18 = vld [vmem:[%s7641_s2 + $0x28c] ss:$12 sps:$4 sm:$0xff]  }
 0x35e   : > { %2866 = vmatmul.mubr.bf16.gmra.mrb[96].mxu1 %v5072_v23  ;;  %1655 = vmatprep.mubr.bf16.mxu0 %v5073_v25  ;;  %v5112_v25 = vld [vmem:[%s7640_s1 + $0x10c] ss:$12 sps:$4 sm:$0xff]  }
 0x35f   : > { %2873 = vmatprep.mubr.bf16.mxu1 %v5076_v0  ;;  %v3560_v0 = vld [vmem:[%s7642_s3 + $0x1a8] sm:$0xff]  ;;  %v5126_v45 = vld [vmem:[%s7640_s1 + $0x138] ss:$12 sps:$4 sm:$0xff]  }
 0x360   : > { %3754 = vperm.xlu1 %4954, %v3540_v34   ;;  %v5111_v34 = vld [vmem:[%s7641_s2 + $0x288] ss:$12 sps:$4 sm:$0xff]  }
 0x361   : > { %3829 = vperm.xlu0 %4953, %v3555_v27   ;;  %v3567_v27 = vld [vmem:[%s7642_s3 + $0x1e0] sm:$0xff] }
 0x364   : > { %3764 = vperm.xlu1 %4954, %v3542_v37  }
 0x365   : > { %1656 = vmatmul.mubr.bf16.gmra.mrb[84].mxu0 %v5075_v30  ;;  %3839 = vperm.xlu0 %4953, %v3557_v29   ;;  %v3569_v29 = vld [vmem:[%s7642_s3 + $0x1f0] sm:$0xff] }
 0x366   : > { %2874 = vmatmul.mubr.bf16.gmra.mrb[100].mxu1 %v5078_v31  ;;  %1663 = vmatprep.mubr.bf16.mxu0 %v5079_v32 }
 0x367   : > { %2881 = vmatprep.mubr.bf16.mxu1 %v5082_v33 }
 0x368   : > { %3774 = vperm.xlu1 %4954, %v3544_v43   ;;  %v5118_v43 = vld [vmem:[%s7640_s1 + $0x124] ss:$12 sps:$4 sm:$0xff]  }
 0x36c   : > { %3784 = vperm.xlu1 %4954, %v3546_v46   ;;  %v3559_v46 = vld [vmem:[%s7642_s3 + $0x1a0] sm:$0xff] }
 0x36d   : > { %1664 = vmatmul.mubr.bf16.gmra.mrb[88].mxu0 %v5081_v39  ;;  %v5115_v39 = vld [vmem:[%s7641_s2 + $0x2a4] ss:$12 sps:$4 sm:$0xff]   ;;  %3849 = vperm.xlu0 %4953, %v3559_v46  }
 0x36e   : > { %2882 = vmatmul.mubr.bf16.gmra.mrb[104].mxu1 %v5084_v40  ;;  %1671 = vmatprep.mubr.bf16.mxu0 %v5085_v41 }
 0x36f   : > { %2889 = vmatprep.mubr.bf16.mxu1 %v5088_v42 }
 0x370   : > { %3794 = vperm.xlu1 %4954, %v3548_v56  }
 0x371   : > { %v5982_v48 = vpop.f32.mrb[0].mxu1 }
 0x372   : > { %v5987_v50 = vpop.f32.mrb[1].mxu1 }
 0x373   : > { %v5995_v53 = vpop.f32.mrb[2].mxu1 }
 0x374   : > { %v6006_v61 = vpop.f32.mrb[3].mxu1  ;;  %3804 = vperm.xlu1 %4954, %v3550_v58  }
 0x375   : > { %1672 = vmatmul.mubr.bf16.gmra.mrb[92].mxu0 %v5087_v49  ;;  %v3566_v49 = vld [vmem:[%s7642_s3 + $0x1d8] sm:$0xff] }
 0x376   : > { %2890 = vmatmul.mubr.bf16.gmra.mrb[108].mxu1 %v5090_v51  ;;  %1679 = vmatprep.mubr.bf16.mxu0 %v5091_v52 }
 0x377   : > { %2897 = vmatprep.mubr.bf16.mxu1 %v5094_v55 }
 0x378   : > { %3814 = vperm.xlu1 %4954, %v3552_v7   ;;  %v3568_v7 = vld [vmem:[%s7642_s3 + $0x1e8] sm:$0xff] }
 0x379   : > { %v6014_v60 = vpop.f32.mrb[4].mxu1 }
 0x37a   : > { %v6019_v63 = vpop.f32.mrb[5].mxu1 }
 0x37b   : > { %v6027_v4 = vpop.f32.mrb[6].mxu1 }
 0x37c   : > { %v6038_v9 = vpop.f32.mrb[7].mxu1  ;;  %3824 = vperm.xlu1 %4954, %v3554_v17  }
 0x37d   : > { %1680 = vmatmul.mubr.bf16.gmra.mrb[96].mxu0 %v5093_v62 }
 0x37e   : > { %2898 = vmatmul.mubr.bf16.gmra.mrb[112].mxu1 %v5096_v2  ;;  %1687 = vmatprep.mubr.bf16.mxu0 %v5097_v3 }
 0x37f   : > { %2905 = vmatprep.mubr.bf16.mxu1 %v5100_v5  ;;  %v5124_v5 = vld [vmem:[%s7640_s1 + $0x13c] ss:$12 sps:$4 sm:$0xff]  }
 0x380   : > { %3834 = vperm.xlu1 %4954, %v3556_v21   ;;  %v5123_v21 = vld [vmem:[%s7641_s2 + $0x2b8] ss:$12 sps:$4 sm:$0xff]  }
 0x381   : > { %v6046_v12 = vpop.f32.mrb[8].mxu1 }
 0x382   : > { %v6051_v15 = vpop.f32.mrb[9].mxu1 }
 0x383   : > { %v6059_v20 = vpop.f32.mrb[10].mxu1 }
 0x384   : > { %v6070_v24 = vpop.f32.mrb[11].mxu1  ;;  %3844 = vperm.xlu1 %4954, %v3558_v1  }
 0x385   : > { %1688 = vmatmul.mubr.bf16.gmra.mrb[100].mxu0 %v5099_v13 }
 0x386   : > { %2906 = vmatmul.mubr.bf16.gmra.mrb[116].mxu1 %v5102_v26  ;;  %1695 = vmatprep.mubr.bf16.mxu0 %v5103_v19 }
 0x387   : > { %2913 = vmatprep.mubr.bf16.mxu1 %v5106_v35 }
 0x388   : > { %3854 = vperm.xlu1 %4954, %v3560_v0   ;;  %v3572_v0 = vld [vmem:[%s7642_s3 + $0x208] sm:$0xff] }
 0x389   : > { %v6078_v8 = vpop.f32.mrb[12].mxu1 }
 0x38a   : > { %v6083_v54 = vpop.f32.mrb[13].mxu1 }
 0x38b   : > { %v6091_v23 = vpop.f32.mrb[14].mxu1 }
 0x38c   : > { %v6102_v28 = vpop.f32.mrb[15].mxu1  ;;  %3864 = vperm.xlu1 %4954, %v3562_v14  }
 0x38d   : > { %1696 = vmatmul.mubr.bf16.gmra.mrb[104].mxu0 %v5105_v10 }
 0x38e   : > { %2914 = vmatmul.mubr.bf16.gmra.mrb[120].mxu1 %v5108_v16  ;;  %1703 = vmatprep.mubr.bf16.mxu0 %v5109_v18 }
 0x38f   : > { %2921 = vmatprep.mubr.bf16.mxu1 %v5112_v25  ;;  %v5130_v25 = vld [vmem:[%s7640_s1 + $0x154] ss:$12 sps:$4 sm:$0xff]  }
 0x390   : > { %v1489_v30 = vpop.f32.mrb[0].mxu0  ;;  %3874 = vperm.xlu1 %4954, %v3564_v44  }
 0x391   : > { %v6111_v31 = vadd.f32 %v5987_v50, %v1489_v30  ;;  %v1491_v32 = vpop.f32.mrb[1].mxu0  ;;  %v6113_v33 = vpop.f32.mrb[16].mxu1  ;;  %v3561_v50 = vld [vmem:[%s7642_s3 + $0x1b0] sm:$0xff] }
 0x392   : > { %v1492_v36 = vpop.f32.mrb[2].mxu0  ;;  %v6118_v37 = vpop.f32.mrb[17].mxu1  ;;  %3859 = vperm.xlu0 %4953, %v3561_v50   ;;  %v5136_v50 = vld [vmem:[%s7640_s1 + $0x16c] ss:$12 sps:$4 sm:$0xff]  }
 0x393   : > { %v6127_v40 = vadd.f32 %v6006_v61, %v1492_v36  ;;  %v1494_v41 = vpop.f32.mrb[3].mxu0  ;;  %v6129_v42 = vpop.f32.mrb[18].mxu1 }
 0x394   : > { %v6140_v47 = vpop.f32.mrb[19].mxu1  ;;  %3884 = vperm.xlu1 %4954, %v3566_v49  }
 0x395   : > { %1704 = vmatmul.mubr.bf16.gmra.mrb[108].mxu0 %v5111_v34 }
 0x396   : > { %2922 = vmatmul.mubr.bf16.gmra.mrb[124].mxu1 %v5114_v38  ;;  %1711 = vmatprep.mubr.bf16.mxu0 %v5115_v39  ;;  %v5129_v38 = vld [vmem:[%s7641_s2 + $0x2d0] ss:$12 sps:$4 sm:$0xff]  }
 0x397   : > { %2929 = vmatprep.mubr.bf16.mxu1 %v5118_v43  ;;  %3869 = vperm.xlu0 %4953, %v3563_v6   ;;  %v5132_v43 = vld [vmem:[%s7640_s1 + $0x150] ss:$12 sps:$4 sm:$0xff]  }
 0x398   : > { %v1497_v51 = vpop.f32.mrb[4].mxu0  ;;  %3894 = vperm.xlu1 %4954, %v3568_v7   ;;  %v5135_v7 = vld [vmem:[%s7641_s2 + $0x2e8] ss:$12 sps:$4 sm:$0xff]  }
 0x399   : > { %v6149_v52 = vadd.f32 %v5982_v48, %v1497_v51  ;;  %v1499_v55 = vpop.f32.mrb[5].mxu0  ;;  %v6151_v56 = vpop.f32.mrb[20].mxu1  ;;  %v5121_v48 = vld [vmem:[%s7641_s2 + $0x2bc] ss:$12 sps:$4 sm:$0xff]  }
 0x39a   : > { %v1500_v61 = vpop.f32.mrb[6].mxu0  ;;  %v6156_v58 = vpop.f32.mrb[21].mxu1  ;;  %v3576_v51 = vld [vmem:[%s7642_s3 + $0x228] sm:$0xff]  ;;  %v3571_v55 = vld [vmem:[%s7642_s3 + $0x200] sm:$0xff] }
 0x39b   : > { %v6165_v62 = vadd.f32 %v5995_v53, %v1500_v61  ;;  %v1502_v2 = vpop.f32.mrb[7].mxu0  ;;  %v6167_v3 = vpop.f32.mrb[22].mxu1  ;;  %v3570_v53 = vld [vmem:[%s7642_s3 + $0x1f8] sm:$0xff]  ;;  %3879 = vperm.xlu0 %4953, %v3565_v11   ;;  %v3573_v61 = vld [vmem:[%s7642_s3 + $0x210] sm:$0xff] }
 0x39c   : > { %v6178_v17 = vpop.f32.mrb[23].mxu1  ;;  %3904 = vperm.xlu1 %4954, %v3570_v53   ;;  %v5138_v11 = vld [vmem:[%s7640_s1 + $0x168] ss:$12 sps:$4 sm:$0xff]  }
 0x39d   : > { %1712 = vmatmul.mubr.bf16.gmra.mrb[112].mxu0 %v5117_v57 }
 0x39e   : > { %2930 = vmatmul.mubr.bf16.gmra.mrb[128].mxu1 %v5120_v59  ;;  %1719 = vmatprep.mubr.bf16.mxu0 %v5121_v48 }
 0x39f   : > { %2937 = vmatprep.mubr.bf16.mxu1 %v5124_v5  ;;  %3889 = vperm.xlu0 %4953, %v3567_v27  }
 0x3a0   : > { %v1505_v13 = vpop.f32.mrb[8].mxu0  ;;  %3914 = vperm.xlu1 %4954, %v3572_v0  }
 0x3a1   : > { %v6187_v26 = vadd.f32 %v6019_v63, %v1505_v13  ;;  %v1507_v19 = vpop.f32.mrb[9].mxu0  ;;  %v6189_v35 = vpop.f32.mrb[24].mxu1  ;;  %v5127_v63 = vld [vmem:[%s7641_s2 + $0x2d4] ss:$12 sps:$4 sm:$0xff]  }
 0x3a2   : > { %v1508_v22 = vpop.f32.mrb[10].mxu0  ;;  %v6194_v1 = vpop.f32.mrb[25].mxu1 }
 0x3a3   : > { %v6203_v10 = vadd.f32 %v6038_v9, %v1508_v22  ;;  %v1510_v16 = vpop.f32.mrb[11].mxu0  ;;  %v6205_v18 = vpop.f32.mrb[26].mxu1  ;;  %v3574_v9 = vld [vmem:[%s7642_s3 + $0x218] sm:$0xff]  ;;  %3899 = vperm.xlu0 %4953, %v3569_v29   ;;  %v5142_v22 = vld [vmem:[%s7640_s1 + $0x184] ss:$12 sps:$4 sm:$0xff]  }
 0x3a4   : > { %v6216_v14 = vpop.f32.mrb[27].mxu1  ;;  %3924 = vperm.xlu1 %4954, %v3574_v9  }
 0x3a5   : > { %1720 = vmatmul.mubr.bf16.gmra.mrb[116].mxu0 %v5123_v21 }
 0x3a6   : > { %2938 = vmatmul.mubr.bf16.gmra.mrb[132].mxu1 %v5126_v45  ;;  %1727 = vmatprep.mubr.bf16.mxu0 %v5127_v63  ;;  %v3580_v45 = vld [vmem:[%s7642_s3 + $0x248] sm:$0xff]  ;;  %v3575_v63 = vld [vmem:[%s7642_s3 + $0x220] sm:$0xff] }
 0x3a7   : > { %2945 = vmatprep.mubr.bf16.mxu1 %v5130_v25  ;;  %3909 = vperm.xlu0 %4953, %v3571_v55   ;;  %v3577_v25 = vld [vmem:[%s7642_s3 + $0x230] sm:$0xff]  ;;  %v3579_v55 = vld [vmem:[%s7642_s3 + $0x240] sm:$0xff] }
 0x3a8   : > { %v1513_v30 = vpop.f32.mrb[12].mxu0  ;;  %3934 = vperm.xlu1 %4954, %v3576_v51   ;;  %v3584_v51 = vld [vmem:[%s7642_s3 + $0x268] sm:$0xff] }
 0x3a9   : > { %v6225_v32 = vadd.f32 %v6014_v60, %v1513_v30  ;;  %v1515_v34 = vpop.f32.mrb[13].mxu0  ;;  %v6227_v36 = vpop.f32.mrb[28].mxu1  ;;  %v5133_v60 = vld [vmem:[%s7641_s2 + $0x2ec] ss:$12 sps:$4 sm:$0xff]  }
 0x3aa   : > { %v1516_v39 = vpop.f32.mrb[14].mxu0  ;;  %v6232_v41 = vpop.f32.mrb[29].mxu1  ;;  %v5141_v30 = vld [vmem:[%s7641_s2 + $0x300] ss:$12 sps:$4 sm:$0xff]  }
 0x3ab   : > { %v6241_v44 = vadd.f32 %v6027_v4, %v1516_v39  ;;  %v1518_v46 = vpop.f32.mrb[15].mxu0  ;;  %v6243_v49 = vpop.f32.mrb[30].mxu1  ;;  %v3578_v4 = vld [vmem:[%s7642_s3 + $0x238] sm:$0xff]  ;;  %3919 = vperm.xlu0 %4953, %v3573_v61   ;;  %v5144_v39 = vld [vmem:[%s7640_s1 + $0x180] ss:$12 sps:$4 sm:$0xff]   ;;  %v3581_v61 = vld [vmem:[%s7642_s3 + $0x250] sm:$0xff] }
 0x3ac   : > { %v6254_v57 = vpop.f32.mrb[31].mxu1  ;;  %3944 = vperm.xlu1 %4954, %v3578_v4  }
 0x3ad   : > { %1728 = vmatmul.mubr.bf16.gmra.mrb[120].mxu0 %v5129_v38 }
 0x3ae   : > { %2946 = vmatmul.mubr.bf16.gmra.mrb[136].mxu1 %v5132_v43  ;;  %1735 = vmatprep.mubr.bf16.mxu0 %v5133_v60 }
 0x3af   : > { %2953 = vmatprep.mubr.bf16.mxu1 %v5136_v50  ;;  %3929 = vperm.xlu0 %4953, %v3575_v63   ;;  %v5148_v50 = vld [vmem:[%s7640_s1 + $0x19c] ss:$12 sps:$4 sm:$0xff]  }
 0x3b0   : > { %v1521_v59 = vpop.f32.mrb[16].mxu0  ;;  %3954 = vperm.xlu1 %4954, %v3580_v45  }
 0x3b1   : > { %v6263_v48 = vadd.f32 %v6051_v15, %v1521_v59  ;;  %v1523_v2 = vpop.f32.mrb[17].mxu0  ;;  %v6265_v5 = vpop.f32.mrb[32].mxu1  ;;  %v5139_v15 = vld [vmem:[%s7641_s2 + $0x304] ss:$12 sps:$4 sm:$0xff]  }
 0x3b2   : > { %v1524_v6 = vpop.f32.mrb[18].mxu0  ;;  %v6270_v53 = vpop.f32.mrb[33].mxu1 }
 0x3b3   : > { %v6279_v13 = vadd.f32 %v6070_v24, %v1524_v6  ;;  %v1526_v19 = vpop.f32.mrb[19].mxu0  ;;  %v6281_v21 = vpop.f32.mrb[34].mxu1  ;;  %v3582_v24 = vld [vmem:[%s7642_s3 + $0x258] sm:$0xff]  ;;  %3939 = vperm.xlu0 %4953, %v3577_v25   ;;  %v5154_v25 = vld [vmem:[%s7640_s1 + $0x1b4] ss:$12 sps:$4 sm:$0xff]  }
 0x3b4   : > { %v6292_v16 = vpop.f32.mrb[35].mxu1  ;;  %3964 = vperm.xlu1 %4954, %v3582_v24  }
 0x3b5   : > { %1736 = vmatmul.mubr.bf16.gmra.mrb[124].mxu0 %v5135_v7 }
 0x3b6   : > { %2954 = vmatmul.mubr.bf16.gmra.mrb[140].mxu1 %v5138_v11  ;;  %1743 = vmatprep.mubr.bf16.mxu0 %v5139_v15  ;;  %v5147_v11 = vld [vmem:[%s7641_s2 + $0x318] ss:$12 sps:$4 sm:$0xff]  }
 0x3b7   : > { %2961 = vmatprep.mubr.bf16.mxu1 %v5142_v22  ;;  %3949 = vperm.xlu0 %4953, %v3579_v55   ;;  %v5150_v22 = vld [vmem:[%s7640_s1 + $0x198] ss:$12 sps:$4 sm:$0xff]   ;;  %v5156_v55 = vld [vmem:[%s7640_s1 + $0x1b0] ss:$12 sps:$4 sm:$0xff]  }
 0x3b8   : > { %v1529_v0 = vpop.f32.mrb[20].mxu0  ;;  %3974 = vperm.xlu1 %4954, %v3584_v51  }
 0x3b9   : > { %v6301_v27 = vadd.f32 %v6046_v12, %v1529_v0  ;;  %v1531_v9 = vpop.f32.mrb[21].mxu0  ;;  %v6303_v29 = vpop.f32.mrb[36].mxu1  ;;  %v5145_v12 = vld [vmem:[%s7641_s2 + $0x31c] ss:$12 sps:$4 sm:$0xff]   ;;  %v3583_v0 = vld [vmem:[%s7642_s3 + $0x260] sm:$0xff] }
 0x3ba   : > { %v1532_v34 = vpop.f32.mrb[22].mxu0  ;;  %v6308_v38 = vpop.f32.mrb[37].mxu1 }
 0x3bb   : > { %v6317_v43 = vadd.f32 %v6059_v20, %v1532_v34  ;;  %v1534_v60 = vpop.f32.mrb[23].mxu0  ;;  %v6319_v46 = vpop.f32.mrb[38].mxu1  ;;  %v3586_v20 = vld [vmem:[%s7642_s3 + $0x278] sm:$0xff]  ;;  %3959 = vperm.xlu0 %4953, %v3581_v61  }
 0x3bc   : > { %v6330_v4 = vpop.f32.mrb[39].mxu1  ;;  %3984 = vperm.xlu1 %4954, %v3586_v20   ;;  %v5153_v60 = vld [vmem:[%s7641_s2 + $0x330] ss:$12 sps:$4 sm:$0xff]  }
 0x3bd   : > { %1744 = vmatmul.mubr.bf16.gmra.mrb[128].mxu0 %v5141_v30 }
 0x3be   : > { %2962 = vmatmul.mubr.bf16.gmra.mrb[144].mxu1 %v5144_v39  ;;  %1751 = vmatprep.mubr.bf16.mxu0 %v5145_v12 }
 0x3bf   : > { %2969 = vmatprep.mubr.bf16.mxu1 %v5148_v50  ;;  %3969 = vperm.xlu0 %4953, %v3583_v0  }
 0x3c0   : > { %v1537_v59 = vpop.f32.mrb[24].mxu0 }
 0x3c1   : > { %v6339_v2 = vadd.f32 %v6083_v54, %v1537_v59  ;;  %v1539_v7 = vpop.f32.mrb[25].mxu0  ;;  %v6341_v6 = vpop.f32.mrb[40].mxu1  ;;  %v5151_v54 = vld [vmem:[%s7641_s2 + $0x334] ss:$12 sps:$4 sm:$0xff]  }
 0x3c2   : > { %v1540_v15 = vpop.f32.mrb[26].mxu0  ;;  %v6346_v19 = vpop.f32.mrb[41].mxu1  ;;  %v5160_v7 = vld [vmem:[%s7640_s1 + $0x1cc] ss:$12 sps:$4 sm:$0xff]  }
 0x3c3   : > { %v6355_v45 = vadd.f32 %v6102_v28, %v1540_v15  ;;  %v1542_v63 = vpop.f32.mrb[27].mxu0  ;;  %v6357_v24 = vpop.f32.mrb[42].mxu1  ;;  %v3585_v28 = vld [vmem:[%s7642_s3 + $0x270] sm:$0xff] }
 0x3c4   : > { %v6365_v9 = vpop.f32.mrb[43].mxu1  ;;  %3979 = vperm.xlu0 %4953, %v3585_v28   ;;  %v5159_v63 = vld [vmem:[%s7641_s2 + $0x348] ss:$12 sps:$4 sm:$0xff]  }
 0x3c5   : > { %1752 = vmatmul.mubr.bf16.gmra.mrb[132].mxu0 %v5147_v11  ;;  %v5162_v28 = vld [vmem:[%s7640_s1 + $0x1c8] ss:$12 sps:$4 sm:$0xff]  }
 0x3c6   : > { %2970 = vmatmul.mubr.bf16.gmra.mrb[148].mxu1 %v5150_v22  ;;  %1759 = vmatprep.mubr.bf16.mxu0 %v5151_v54 }
 0x3c7   : > { %2977 = vmatprep.mubr.bf16.mxu1 %v5154_v25 }
 0x3c8   : > { %v1545_v30 = vpop.f32.mrb[28].mxu0 }
 0x3c9   : > { %v6371_v34 = vadd.f32 %v6078_v8, %v1545_v30  ;;  %v1547_v39 = vpop.f32.mrb[29].mxu0  ;;  %v6373_v12 = vpop.f32.mrb[44].mxu1  ;;  %v5157_v8 = vld [vmem:[%s7641_s2 + $0x34c] ss:$12 sps:$4 sm:$0xff]   ;;  %v5163_v30 = vld [vmem:[%s7641_s2 + $0x364] ss:$12 sps:$4 sm:$0xff]  }
 0x3ca   : > { %v1548_v50 = vpop.f32.mrb[30].mxu0  ;;  %v6378_v51 = vpop.f32.mrb[45].mxu1 }
 0x3cb   : > { %v6387_v20 = vadd.f32 %v6091_v23, %v1548_v50  ;;  %v1550_v61 = vpop.f32.mrb[31].mxu0  ;;  %v6389_v59 = vpop.f32.mrb[46].mxu1  ;;  %v5166_v50 = vld [vmem:[%s7640_s1 + $0x1e4] ss:$12 sps:$4 sm:$0xff]  }
 0x3cc   : > { %v6394_v11 = vpop.f32.mrb[47].mxu1 }
 0x3cd   : > { %1760 = vmatmul.mubr.bf16.gmra.mrb[136].mxu0 %v5153_v60 }
 0x3ce   : > { %2978 = vmatmul.mubr.bf16.gmra.mrb[152].mxu1 %v5156_v55  ;;  %1767 = vmatprep.mubr.bf16.mxu0 %v5157_v8 }
 0x3cf   : > { %2985 = vmatprep.mubr.bf16.mxu1 %v5160_v7 }
 0x3d0   : > { %v1553_v15 = vpop.f32.mrb[32].mxu0 }
 0x3d1   : > { %v6397_v22 = vadd.f32 %v6118_v37, %v1553_v15  ;;  %v1555_v54 = vpop.f32.mrb[33].mxu0  ;;  %v6399_v23 = vpop.f32.mrb[48].mxu1  ;;  %v5165_v15 = vld [vmem:[%s7641_s2 + $0x360] ss:$12 sps:$4 sm:$0xff]  }
 0x3d2   : > { %v1556_v25 = vpop.f32.mrb[34].mxu0  ;;  %v6404_v0 = vpop.f32.mrb[49].mxu1 }
 0x3d3   : > { %v6413_v37 = vadd.f32 %v6140_v47, %v1556_v25  ;;  %v1558_v39 = vpop.f32.mrb[35].mxu0  ;;  %v6415_v60 = vpop.f32.mrb[50].mxu1 }
 0x3d4   : > { %v6420_v55 = vpop.f32.mrb[51].mxu1 }
 0x3d5   : > { %1768 = vmatmul.mubr.bf16.gmra.mrb[140].mxu0 %v5159_v63  ;;  %v5168_v63 = vld [vmem:[%s7640_s1 + $0x1e0] ss:$12 sps:$4 sm:$0xff]  }
 0x3d6   : > { %2986 = vmatmul.mubr.bf16.gmra.mrb[156].mxu1 %v5162_v28  ;;  %1775 = vmatprep.mubr.bf16.mxu0 %v5163_v30  ;;  %v5169_v28 = vld [vmem:[%s7641_s2 + $0x37c] ss:$12 sps:$4 sm:$0xff]  }
 0x3d7   : > { %2993 = vmatprep.mubr.bf16.mxu1 %v5166_v50  ;;  %v5172_v50 = vld [vmem:[%s7640_s1 + $0x1fc] ss:$12 sps:$4 sm:$0xff]  }
 0x3d8   : > { %v1561_v8 = vpop.f32.mrb[36].mxu0 }
 0x3d9   : > { %v6423_v61 = vadd.f32 %v6113_v33, %v1561_v8  ;;  %v1563_v7 = vpop.f32.mrb[37].mxu0  ;;  %v6425_v47 = vpop.f32.mrb[52].mxu1 }
 0x3da   : > { %7645 = vst [vmem:[#allocation2_spill] sm:$0xff] %v6425_v47  ;;  %v1564_v54 = vpop.f32.mrb[38].mxu0  ;;  %v6430_v25 = vpop.f32.mrb[53].mxu1 }
 0x3db   : > { %7646 = vst [vmem:[#allocation3_spill] sm:$0xff] %v6430_v25  ;;  %v6439_v33 = vadd.f32 %v6129_v42, %v1564_v54  ;;  %v1566_v30 = vpop.f32.mrb[39].mxu0  ;;  %v6441_v39 = vpop.f32.mrb[54].mxu1  ;;  %v5171_v54 = vld [vmem:[%s7641_s2 + $0x378] ss:$12 sps:$4 sm:$0xff]  }
 0x3dc   : > { %7647 = vst [vmem:[#allocation4_spill] sm:$0xff] %v6441_v39  ;;  %v6446_v8 = vpop.f32.mrb[55].mxu1 }
 0x3dd   : > { %7648 = vst [vmem:[#allocation5_spill] sm:$0xff] %v6446_v8  ;;  %1776 = vmatmul.mubr.bf16.gmra.mrb[144].mxu0 %v5165_v15  ;;  %v5174_v15 = vld [vmem:[%s7640_s1 + $0x1f8] ss:$12 sps:$4 sm:$0xff]  }
 0x3de   : > { %2994 = vmatmul.mubr.bf16.gmra.mrb[160].mxu1 %v5168_v63  ;;  %1783 = vmatprep.mubr.bf16.mxu0 %v5169_v28  ;;  %v5175_v63 = vld [vmem:[%s7641_s2 + $0x394] ss:$12 sps:$4 sm:$0xff]  }
 0x3df   : > { %3001 = vmatprep.mubr.bf16.mxu1 %v5172_v50  ;;  %v5178_v50 = vld [vmem:[%s7640_s1 + $0x214] ss:$12 sps:$4 sm:$0xff]  }
 0x3e0   : > { %v1569_v7 = vpop.f32.mrb[40].mxu0 }
 0x3e1   : > { %v6449_v47 = vadd.f32 %v6156_v58, %v1569_v7  ;;  %v1571_v25 = vpop.f32.mrb[41].mxu0  ;;  %v6451_v42 = vpop.f32.mrb[56].mxu1 }
 0x3e2   : > { %7649 = vst [vmem:[#allocation6_spill] sm:$0xff] %v6451_v42  ;;  %v1572_v30 = vpop.f32.mrb[42].mxu0  ;;  %v6456_v39 = vpop.f32.mrb[57].mxu1 }
 0x3e3   : > { %7650 = vst [vmem:[#allocation7_spill] sm:$0xff] %v6456_v39  ;;  %v6465_v58 = vadd.f32 %v6178_v17, %v1572_v30  ;;  %v1574_v25 = vpop.f32.mrb[43].mxu0  ;;  %v6467_v28 = vpop.f32.mrb[58].mxu1  ;;  %v5177_v30 = vld [vmem:[%s7641_s2 + $0x390] ss:$12 sps:$4 sm:$0xff]  }
 0x3e4   : > { %7651 = vst [vmem:[#allocation8_spill] sm:$0xff] %v6467_v28  ;;  %v6472_v7 = vpop.f32.mrb[59].mxu1 }
 0x3e5   : > { %7652 = vst [vmem:[#allocation9_spill] sm:$0xff] %v6472_v7  ;;  %1784 = vmatmul.mubr.bf16.gmra.mrb[148].mxu0 %v5171_v54  ;;  %v5180_v54 = vld [vmem:[%s7640_s1 + $0x210] ss:$12 sps:$4 sm:$0xff]  }
 0x3e6   : > { %3002 = vmatmul.mubr.bf16.gmra.mrb[164].mxu1 %v5174_v15  ;;  %1791 = vmatprep.mubr.bf16.mxu0 %v5175_v63  ;;  %v5181_v15 = vld [vmem:[%s7641_s2 + $0x3ac] ss:$12 sps:$4 sm:$0xff]  }
 0x3e7   : > { %3009 = vmatprep.mubr.bf16.mxu1 %v5178_v50  ;;  %v5184_v63 = vld [vmem:[%s7640_s1 + $0x22c] ss:$12 sps:$4 sm:$0xff]  }
 0x3e8   : > { %v1577_v42 = vpop.f32.mrb[44].mxu0 }
 0x3e9   : > { %v6475_v39 = vadd.f32 %v6151_v56, %v1577_v42  ;;  %v1579_v8 = vpop.f32.mrb[45].mxu0  ;;  %v6477_v17 = vpop.f32.mrb[60].mxu1 }
 0x3ea   : > { %7653 = vst [vmem:[#allocation10_spill] sm:$0xff] %v6477_v17  ;;  %v1580_v25 = vpop.f32.mrb[46].mxu0  ;;  %v6482_v28 = vpop.f32.mrb[61].mxu1 }
 0x3eb   : > { %7654 = vst [vmem:[#allocation11_spill] sm:$0xff] %v6482_v28  ;;  %v6491_v56 = vadd.f32 %v6167_v3, %v1580_v25  ;;  %v1582_v8 = vpop.f32.mrb[47].mxu0  ;;  %v6493_v42 = vpop.f32.mrb[62].mxu1  ;;  %v5183_v25 = vld [vmem:[%s7641_s2 + $0x3a8] ss:$12 sps:$4 sm:$0xff]  }
 0x3ec   : > { %7655 = vst [vmem:[#allocation12_spill] sm:$0xff] %v6493_v42  ;;  %v6498_v50 = vpop.f32.mrb[63].mxu1 }
 0x3ed   : > { %7656 = vst [vmem:[#allocation13_spill] sm:$0xff] %v6498_v50  ;;  %1792 = vmatmul.mubr.bf16.gmra.mrb[152].mxu0 %v5177_v30  ;;  %v5186_v30 = vld [vmem:[%s7640_s1 + $0x228] ss:$12 sps:$4 sm:$0xff]  }
 0x3ee   : > { %3010 = vmatmul.mubr.bf16.gmra.mrb[168].mxu1 %v5180_v54  ;;  %1799 = vmatprep.mubr.bf16.mxu0 %v5181_v15  ;;  %v5187_v54 = vld [vmem:[%s7640_s1 + $0x8] ss:$12 sps:$4 sm:$0xff]   ;;  %v5188_v15 = vld [vmem:[%s7640_s1 + $0x244] ss:$12 sps:$4 sm:$0xff]  }
 0x3ef   : > { %3017 = vmatprep.mubr.bf16.mxu1 %v5184_v63 }
 0x3f0   : > { %v1585_v17 = vpop.f32.mrb[48].mxu0 }
 0x3f1   : > { %v6501_v28 = vadd.f32 %v6194_v1, %v1585_v17  ;;  %v1587_v7 = vpop.f32.mrb[49].mxu0  ;;  %v6503_v3 = vpop.f32.mrb[64].mxu1 }
 0x3f2   : > { %7657 = vst [vmem:[#allocation14_spill] sm:$0xff] %v6503_v3  ;;  %v1588_v8 = vpop.f32.mrb[50].mxu0  ;;  %v6508_v42 = vpop.f32.mrb[65].mxu1 }
 0x3f3   : > { %7658 = vst [vmem:[#allocation15_spill] sm:$0xff] %v6508_v42  ;;  %v6517_v1 = vadd.f32 %v6216_v14, %v1588_v8  ;;  %v1590_v7 = vpop.f32.mrb[51].mxu0  ;;  %v6519_v17 = vpop.f32.mrb[66].mxu1  ;;  %v5190_v8 = vld [vmem:[%s7640_s1 + $0x20] ss:$12 sps:$4 sm:$0xff]  }
 0x3f4   : > { %7659 = vst [vmem:[#allocation16_spill] sm:$0xff] %v6519_v17  ;;  %v6524_v63 = vpop.f32.mrb[67].mxu1 }
 0x3f5   : > { %7660 = vst [vmem:[#allocation17_spill] sm:$0xff] %v6524_v63  ;;  %1800 = vmatmul.mubr.bf16.gmra.mrb[156].mxu0 %v5183_v25  ;;  %v5191_v25 = vld [vmem:[%s7640_s1 + $0x240] ss:$12 sps:$4 sm:$0xff]  }
 0x3f6   : > { %3018 = vmatmul.mubr.bf16.gmra.mrb[172].mxu1 %v5186_v30  ;;  %4745 = vmatprep.mubr.bf16.mxu0 %v5187_v54  ;;  %v5192_v30 = vld [vmem:[%s7640_s1 + $0x38] ss:$12 sps:$4 sm:$0xff]   ;;  %v5193_v54 = vld [vmem:[%s7640_s1 + $0x25c] ss:$12 sps:$4 sm:$0xff]  }
 0x3f7   : > { %3025 = vmatprep.mubr.bf16.mxu1 %v5188_v15 }
 0x3f8   : > { %v1593_v3 = vpop.f32.mrb[52].mxu0 }
 0x3f9   : > { %v6527_v42 = vadd.f32 %v6189_v35, %v1593_v3  ;;  %v1595_v50 = vpop.f32.mrb[53].mxu0  ;;  %v6529_v14 = vpop.f32.mrb[68].mxu1 }
 0x3fa   : > { %7661 = vst [vmem:[#allocation18_spill] sm:$0xff] %v6529_v14  ;;  %v1596_v7 = vpop.f32.mrb[54].mxu0  ;;  %v6534_v17 = vpop.f32.mrb[69].mxu1 }
 0x3fb   : > { %7662 = vst [vmem:[#allocation19_spill] sm:$0xff] %v6534_v17  ;;  %v6543_v35 = vadd.f32 %v6205_v18, %v1596_v7  ;;  %v1598_v50 = vpop.f32.mrb[55].mxu0  ;;  %v6545_v3 = vpop.f32.mrb[70].mxu1  ;;  %v5195_v7 = vld [vmem:[%s7640_s1 + $0x50] ss:$12 sps:$4 sm:$0xff]  }
 0x3fc   : > { %7663 = vst [vmem:[#allocation20_spill] sm:$0xff] %v6545_v3  ;;  %v6550_v15 = vpop.f32.mrb[71].mxu1 }
 0x3fd   : > { %7664 = vst [vmem:[#allocation21_spill] sm:$0xff] %v6550_v15  ;;  %4746 = vmatmul.mubr.bf16.vlgmr.msra.gmra.mrb[160].mxu0 %v5190_v8  ;;  %v5196_v8 = vld [vmem:[%s7640_s1 + $0x258] ss:$12 sps:$4 sm:$0xff]  }
 0x3fe   : > { %3026 = vmatmul.mubr.bf16.gmra.mrb[176].mxu1 %v5191_v25  ;;  %4749 = vmatprep.mubr.bf16.mxu0 %v5192_v30  ;;  %v5197_v25 = vld [vmem:[%s7640_s1 + $0x68] ss:$12 sps:$4 sm:$0xff]  }
 0x3ff   : > { %3033 = vmatprep.mubr.bf16.mxu1 %v5193_v54  ;;  %v5198_v30 = vld [vmem:[%s7640_s1 + $0x274] ss:$12 sps:$4 sm:$0xff]  }
 0x400   : > { %v1601_v14 = vpop.f32.mrb[56].mxu0 }
 0x401   : > { %v6553_v17 = vadd.f32 %v6232_v41, %v1601_v14  ;;  %v1603_v63 = vpop.f32.mrb[57].mxu0  ;;  %v6555_v18 = vpop.f32.mrb[72].mxu1 }
 0x402   : > { %7665 = vst [vmem:[#allocation22_spill] sm:$0xff] %v6555_v18  ;;  %v1604_v50 = vpop.f32.mrb[58].mxu0  ;;  %v6560_v3 = vpop.f32.mrb[73].mxu1 }
 0x403   : > { %7666 = vst [vmem:[#allocation23_spill] sm:$0xff] %v6560_v3  ;;  %v6569_v41 = vadd.f32 %v6254_v57, %v1604_v50  ;;  %v1606_v63 = vpop.f32.mrb[59].mxu0  ;;  %v6571_v14 = vpop.f32.mrb[74].mxu1  ;;  %v5200_v50 = vld [vmem:[%s7640_s1 + $0x80] ss:$12 sps:$4 sm:$0xff]  }
 0x404   : > { %7667 = vst [vmem:[#allocation24_spill] sm:$0xff] %v6571_v14  ;;  %v6576_v54 = vpop.f32.mrb[75].mxu1 }
 0x405   : > { %7668 = vst [vmem:[#allocation25_spill] sm:$0xff] %v6576_v54  ;;  %4750 = vmatmul.mubr.bf16.gmra.mrb[164].mxu0 %v5195_v7  ;;  %v5201_v7 = vld [vmem:[%s7640_s1 + $0x270] ss:$12 sps:$4 sm:$0xff]  }
 0x406   : > { %3034 = vmatmul.mubr.bf16.gmra.mrb[180].mxu1 %v5196_v8  ;;  %4753 = vmatprep.mubr.bf16.mxu0 %v5197_v25  ;;  %v5202_v8 = vld [vmem:[%s7640_s1 + $0x98] ss:$12 sps:$4 sm:$0xff]  }
 0x407   : > { %3041 = vmatprep.mubr.bf16.mxu1 %v5198_v30  ;;  %v5203_v25 = vld [vmem:[%s7640_s1 + $0x28c] ss:$12 sps:$4 sm:$0xff]  }
 0x408   : > { %v1609_v18 = vpop.f32.mrb[60].mxu0 }
 0x409   : > { %v6579_v3 = vadd.f32 %v6227_v36, %v1609_v18  ;;  %v1611_v15 = vpop.f32.mrb[61].mxu0  ;;  %v6581_v57 = vpop.f32.mrb[76].mxu1 }
 0x40a   : > { %7669 = vst [vmem:[#allocation26_spill] sm:$0xff] %v6581_v57  ;;  %v1612_v63 = vpop.f32.mrb[62].mxu0  ;;  %v6586_v14 = vpop.f32.mrb[77].mxu1 }
 0x40b   : > { %7670 = vst [vmem:[#allocation27_spill] sm:$0xff] %v6586_v14  ;;  %v6595_v36 = vadd.f32 %v6243_v49, %v1612_v63  ;;  %v1614_v15 = vpop.f32.mrb[63].mxu0  ;;  %v6597_v18 = vpop.f32.mrb[78].mxu1  ;;  %v5205_v63 = vld [vmem:[%s7640_s1 + $0xb0] ss:$12 sps:$4 sm:$0xff]  }
 0x40c   : > { %7672 = vst [vmem:[#allocation29_spill] sm:$0xff] %v6597_v18  ;;  %v6602_v30 = vpop.f32.mrb[79].mxu1 }
 0x40d   : > { %7671 = vst [vmem:[#allocation28_spill] sm:$0xff] %v6595_v36  ;;  %4754 = vmatmul.mubr.bf16.gmra.mrb[168].mxu0 %v5200_v50  ;;  %v5206_v50 = vld [vmem:[%s7640_s1 + $0x288] ss:$12 sps:$4 sm:$0xff]  }
 0x40e   : > { %3042 = vmatmul.mubr.bf16.gmra.mrb[184].mxu1 %v5201_v7  ;;  %4757 = vmatprep.mubr.bf16.mxu0 %v5202_v8 }
 0x40f   : > { %3049 = vmatprep.mubr.bf16.mxu1 %v5203_v25 }
 0x410   : > { %v1617_v57 = vpop.f32.mrb[64].mxu0 }
 0x411   : > { %v6605_v14 = vadd.f32 %v6270_v53, %v1617_v57  ;;  %v1619_v54 = vpop.f32.mrb[65].mxu0  ;;  %v2835_v49 = vpop.f32.mrb[80].mxu1  ;;  %v5207_v53 = vld [vmem:[%s7640_s1 + $0xc8] ss:$12 sps:$4 sm:$0xff]  }
 0x412   : > { %v6611_v15 = vadd.f32 %v2835_v49, %v6111_v31  ;;  %v1620_v18 = vpop.f32.mrb[66].mxu0  ;;  %v2837_v36 = vpop.f32.mrb[81].mxu1  ;;  %v5208_v31 = vld [vmem:[%s7640_s1 + $0x2a4] ss:$12 sps:$4 sm:$0xff]  }
 0x413   : > { %v6620_v54 = vadd.f32 %v6292_v16, %v1620_v18  ;;  %v1622_v57 = vpop.f32.mrb[67].mxu0  ;;  %v2838_v7 = vpop.f32.mrb[82].mxu1 }
 0x414   : > { %7673 = vst [vmem:[#allocation30_spill] sm:$0xff] %v6611_v15  ;;  %v6626_v8 = vadd.f32 %v2838_v7, %v6127_v40  ;;  %v2840_v36 = vpop.f32.mrb[83].mxu1  ;;  %v5210_v57 = vld [vmem:[%s7640_s1 + $0xe0] ss:$12 sps:$4 sm:$0xff]  }
 0x415   : > { %4758 = vmatmul.mubr.bf16.gmra.mrb[172].mxu0 %v5205_v63  ;;  %v5211_v63 = vld [vmem:[%s7640_s1 + $0x2a0] ss:$12 sps:$4 sm:$0xff]  }
 0x416   : > { %3050 = vmatmul.mubr.bf16.gmra.mrb[188].mxu1 %v5206_v50  ;;  %4761 = vmatprep.mubr.bf16.mxu0 %v5207_v53 }
 0x417   : > { %3057 = vmatprep.mubr.bf16.mxu1 %v5208_v31 }
 0x418   : > { %v1625_v25 = vpop.f32.mrb[68].mxu0 }
 0x419   : > { %v6629_v49 = vadd.f32 %v6265_v5, %v1625_v25  ;;  %v1627_v16 = vpop.f32.mrb[69].mxu0  ;;  %v2843_v18 = vpop.f32.mrb[84].mxu1  ;;  %v5212_v5 = vld [vmem:[%s7640_s1 + $0xf8] ss:$12 sps:$4 sm:$0xff]  }
 0x41a   : > { %v6635_v15 = vadd.f32 %v2843_v18, %v6149_v52  ;;  %v1628_v40 = vpop.f32.mrb[70].mxu0  ;;  %v2845_v7 = vpop.f32.mrb[85].mxu1  ;;  %v5213_v52 = vld [vmem:[%s7640_s1 + $0x2bc] ss:$12 sps:$4 sm:$0xff]  }
 0x41b   : > { %v6644_v50 = vadd.f32 %v6281_v21, %v1628_v40  ;;  %v1630_v53 = vpop.f32.mrb[71].mxu0  ;;  %v2846_v31 = vpop.f32.mrb[86].mxu1 }
 0x41c   : > { %v6650_v36 = vadd.f32 %v2846_v31, %v6165_v62  ;;  %v2848_v25 = vpop.f32.mrb[87].mxu1  ;;  %v6652_v16 = vpop.permute.xlu1 %3594  ;;  %v5215_v53 = vld [vmem:[%s7640_s1 + $0x110] ss:$12 sps:$4 sm:$0xff]  }
 0x41d   : > { %4762 = vmatmul.mubr.bf16.gmra.mrb[176].mxu0 %v5210_v57 }
 0x41e   : > { %3058 = vmatmul.mubr.bf16.gmra.mrb[192].mxu1 %v5211_v63  ;;  %4765 = vmatprep.mubr.bf16.mxu0 %v5212_v5  ;;  %v5216_v63 = vld [vmem:[%s7640_s1 + $0x2b8] ss:$12 sps:$4 sm:$0xff]  }
 0x41f   : > { %3065 = vmatprep.mubr.bf16.mxu1 %v5213_v52 }
 0x420   : > { %v1633_v18 = vpop.f32.mrb[72].mxu0 }
 0x421   : > { %v6655_v21 = vadd.f32 %v6308_v38, %v1633_v18  ;;  %v1635_v40 = vpop.f32.mrb[73].mxu0  ;;  %v2851_v7 = vpop.f32.mrb[88].mxu1  ;;  %v5217_v38 = vld [vmem:[%s7640_s1 + $0x128] ss:$12 sps:$4 sm:$0xff]  }
 0x422   : > { %v6661_v62 = vadd.f32 %v2851_v7, %v6187_v26  ;;  %v1636_v31 = vpop.f32.mrb[74].mxu0  ;;  %v2853_v57 = vpop.f32.mrb[89].mxu1  ;;  %v5218_v26 = vld [vmem:[%s7640_s1 + $0x2d4] ss:$12 sps:$4 sm:$0xff]  }
 0x423   : > { %v6670_v5 = vadd.f32 %v6330_v4, %v1636_v31  ;;  %v1638_v52 = vpop.f32.mrb[75].mxu0  ;;  %v2854_v25 = vpop.f32.mrb[90].mxu1 }
 0x424   : > { %7674 = vst [vmem:[#allocation31_spill] sm:$0xff] %v6661_v62  ;;  %v6676_v18 = vadd.f32 %v2854_v25, %v6203_v10  ;;  %v2856_v40 = vpop.f32.mrb[91].mxu1  ;;  %v6678_v7 = vpop.permute.xlu1 %3599  ;;  %v5220_v10 = vld [vmem:[%s7640_s1 + $0x140] ss:$12 sps:$4 sm:$0xff]  }
 0x425   : > { %4766 = vmatmul.mubr.bf16.gmra.mrb[180].mxu0 %v5215_v53  ;;  %v6680_v62 = vpop.permute.xlu0 %3589 }
 0x426   : > { %7675 = vst [vmem:[#allocation32_spill] sm:$0xff] %v6676_v18  ;;  %3066 = vmatmul.mubr.bf16.gmra.mrb[196].mxu1 %v5216_v63  ;;  %4769 = vmatprep.mubr.bf16.mxu0 %v5217_v38  ;;  %v5221_v38 = vld [vmem:[%s7640_s1 + $0x2d0] ss:$12 sps:$4 sm:$0xff]  }
 0x427   : > { %3073 = vmatprep.mubr.bf16.mxu1 %v5218_v26 }
 0x428   : > { %v1641_v57 = vpop.f32.mrb[76].mxu0 }
 0x429   : > { %v6683_v4 = vadd.f32 %v6303_v29, %v1641_v57  ;;  %v1643_v31 = vpop.f32.mrb[77].mxu0  ;;  %v2859_v52 = vpop.f32.mrb[92].mxu1  ;;  %v5222_v29 = vld [vmem:[%s7640_s1 + $0x158] ss:$12 sps:$4 sm:$0xff]  }
 0x42a   : > { %v6689_v25 = vadd.f32 %v2859_v52, %v6225_v32  ;;  %v1644_v53 = vpop.f32.mrb[78].mxu0  ;;  %v2861_v63 = vpop.f32.mrb[93].mxu1  ;;  %v5223_v32 = vld [vmem:[%s7640_s1 + $0x2ec] ss:$12 sps:$4 sm:$0xff]  }
 0x42b   : > { %v6698_v26 = vadd.f32 %v6319_v46, %v1644_v53  ;;  %v1646_v40 = vpop.f32.mrb[79].mxu0  ;;  %v2862_v57 = vpop.f32.mrb[94].mxu1 }
 0x42c   : > { %7676 = vst [vmem:[#allocation33_spill] sm:$0xff] %v6689_v25  ;;  %v6704_v31 = vadd.f32 %v2862_v57, %v6241_v44  ;;  %v2864_v52 = vpop.f32.mrb[95].mxu1  ;;  %v6706_v63 = vpop.permute.xlu1 %3604  ;;  %v5225_v44 = vld [vmem:[%s7640_s1 + $0x170] ss:$12 sps:$4 sm:$0xff]  }
 0x42d   : > { %4770 = vmatmul.mubr.bf16.gmra.mrb[184].mxu0 %v5220_v10  ;;  %v6708_v25 = vpop.permute.xlu0 %3609 }
 0x42e   : > { %3074 = vmatmul.mubr.bf16.gmra.mrb[200].mxu1 %v5221_v38  ;;  %4773 = vmatprep.mubr.bf16.mxu0 %v5222_v29  ;;  %7677 = vst [vmem:[#allocation34_spill] sm:$0xff] %v6708_v25  ;;  %v5226_v29 = vld [vmem:[%s7640_s1 + $0x2e8] ss:$12 sps:$4 sm:$0xff]  }
 0x42f   : > { %3081 = vmatprep.mubr.bf16.mxu1 %v5223_v32 }
 0x430   : > { %v1649_v18 = vpop.f32.mrb[80].mxu0 }
 0x431   : > { %v6711_v46 = vadd.f32 %v6346_v19, %v1649_v18  ;;  %v1651_v53 = vpop.f32.mrb[81].mxu0  ;;  %v2867_v40 = vpop.f32.mrb[96].mxu1  ;;  %v5227_v19 = vld [vmem:[%s7640_s1 + $0x188] ss:$12 sps:$4 sm:$0xff]  }
 0x432   : > { %v6717_v57 = vadd.f32 %v2867_v40, %v6263_v48  ;;  %v1652_v10 = vpop.f32.mrb[82].mxu0  ;;  %v2869_v38 = vpop.f32.mrb[97].mxu1  ;;  %v5228_v48 = vld [vmem:[%s7640_s1 + $0x304] ss:$12 sps:$4 sm:$0xff]  }
 0x433   : > { %v6726_v18 = vadd.f32 %v6365_v9, %v1652_v10  ;;  %v1654_v32 = vpop.f32.mrb[83].mxu0  ;;  %v2870_v52 = vpop.f32.mrb[98].mxu1 }
 0x434   : > { %7678 = vst [vmem:[#allocation35_spill] sm:$0xff] %v6717_v57  ;;  %v6732_v53 = vadd.f32 %v2870_v52, %v6279_v13  ;;  %v2872_v40 = vpop.f32.mrb[99].mxu1  ;;  %v6734_v38 = vpop.permute.xlu1 %3614  ;;  %v5230_v13 = vld [vmem:[%s7640_s1 + $0x1a0] ss:$12 sps:$4 sm:$0xff]  }
 0x435   : > { %4774 = vmatmul.mubr.bf16.gmra.mrb[188].mxu0 %v5225_v44  ;;  %v6736_v57 = vpop.permute.xlu0 %3619 }
 0x436   : > { %7679 = vst [vmem:[#allocation36_spill] sm:$0xff] %v6732_v53  ;;  %3082 = vmatmul.mubr.bf16.gmra.mrb[204].mxu1 %v5226_v29  ;;  %4777 = vmatprep.mubr.bf16.mxu0 %v5227_v19  ;;  %v5231_v19 = vld [vmem:[%s7640_s1 + $0x300] ss:$12 sps:$4 sm:$0xff]  }
 0x437   : > { %3089 = vmatprep.mubr.bf16.mxu1 %v5228_v48 }
 0x438   : > { %v1657_v9 = vpop.f32.mrb[84].mxu0 }
 0x439   : > { %v6739_v10 = vadd.f32 %v6341_v6, %v1657_v9  ;;  %v1659_v32 = vpop.f32.mrb[85].mxu0  ;;  %v2875_v25 = vpop.f32.mrb[100].mxu1  ;;  %v5232_v6 = vld [vmem:[%s7640_s1 + $0x1b8] ss:$12 sps:$4 sm:$0xff]  }
 0x43a   : > { %v6745_v52 = vadd.f32 %v2875_v25, %v6301_v27  ;;  %v1660_v44 = vpop.f32.mrb[86].mxu0  ;;  %v2877_v29 = vpop.f32.mrb[101].mxu1  ;;  %v5233_v27 = vld [vmem:[%s7640_s1 + $0x31c] ss:$12 sps:$4 sm:$0xff]  }
 0x43b   : > { %v6754_v48 = vadd.f32 %v6357_v24, %v1660_v44  ;;  %v1662_v40 = vpop.f32.mrb[87].mxu0  ;;  %v2878_v9 = vpop.f32.mrb[102].mxu1 }
 0x43c   : > { %7680 = vst [vmem:[#allocation37_spill] sm:$0xff] %v6745_v52  ;;  %v6760_v25 = vadd.f32 %v2878_v9, %v6317_v43  ;;  %v2880_v32 = vpop.f32.mrb[103].mxu1  ;;  %v6762_v29 = vpop.permute.xlu1 %3624  ;;  %v5235_v43 = vld [vmem:[%s7640_s1 + $0x1d0] ss:$12 sps:$4 sm:$0xff]  }
 0x43d   : > { %4778 = vmatmul.mubr.bf16.gmra.mrb[192].mxu0 %v5230_v13  ;;  %v6764_v53 = vpop.permute.xlu0 %3629 }
 0x43e   : > { %3090 = vmatmul.mubr.bf16.gmra.mrb[208].mxu1 %v5231_v19  ;;  %4781 = vmatprep.mubr.bf16.mxu0 %v5232_v6  ;;  %7681 = vst [vmem:[#allocation38_spill] sm:$0xff] %v6764_v53  ;;  %v5236_v6 = vld [vmem:[%s7640_s1 + $0x318] ss:$12 sps:$4 sm:$0xff]  }
 0x43f   : > { %3097 = vmatprep.mubr.bf16.mxu1 %v5233_v27 }
 0x440   : > { %v1665_v24 = vpop.f32.mrb[88].mxu0 }
 0x441   : > { %v6767_v44 = vadd.f32 %v6378_v51, %v1665_v24  ;;  %v1667_v40 = vpop.f32.mrb[89].mxu0  ;;  %v2883_v52 = vpop.f32.mrb[104].mxu1  ;;  %v5237_v51 = vld [vmem:[%s7640_s1 + $0x1e8] ss:$12 sps:$4 sm:$0xff]  }
 0x442   : > { %v6773_v9 = vadd.f32 %v2883_v52, %v6339_v2  ;;  %v1668_v13 = vpop.f32.mrb[90].mxu0  ;;  %v2885_v19 = vpop.f32.mrb[105].mxu1  ;;  %v5238_v2 = vld [vmem:[%s7640_s1 + $0x334] ss:$12 sps:$4 sm:$0xff]  }
 0x443   : > { %v6782_v27 = vadd.f32 %v6394_v11, %v1668_v13  ;;  %v1670_v32 = vpop.f32.mrb[91].mxu0  ;;  %v2886_v24 = vpop.f32.mrb[106].mxu1 }
 0x444   : > { %7682 = vst [vmem:[#allocation39_spill] sm:$0xff] %v6773_v9  ;;  %v6788_v52 = vadd.f32 %v2886_v24, %v6355_v45  ;;  %v2888_v40 = vpop.f32.mrb[107].mxu1  ;;  %v6790_v19 = vpop.permute.xlu1 %3634  ;;  %v5240_v45 = vld [vmem:[%s7640_s1 + $0x200] ss:$12 sps:$4 sm:$0xff]  }
 0x445   : > { %4782 = vmatmul.mubr.bf16.gmra.mrb[196].mxu0 %v5235_v43  ;;  %v6792_v9 = vpop.permute.xlu0 %3639 }
 0x446   : > { %7683 = vst [vmem:[#allocation40_spill] sm:$0xff] %v6788_v52  ;;  %3098 = vmatmul.mubr.bf16.gmra.mrb[212].mxu1 %v5236_v6  ;;  %4785 = vmatprep.mubr.bf16.mxu0 %v5237_v51  ;;  %v5241_v51 = vld [vmem:[%s7640_s1 + $0x330] ss:$12 sps:$4 sm:$0xff]  }
 0x447   : > { %3105 = vmatprep.mubr.bf16.mxu1 %v5238_v2 }
 0x448   : > { %v1673_v11 = vpop.f32.mrb[92].mxu0 }
 0x449   : > { %v6795_v13 = vadd.f32 %v6373_v12, %v1673_v11  ;;  %v1675_v32 = vpop.f32.mrb[93].mxu0  ;;  %v2891_v53 = vpop.f32.mrb[108].mxu1  ;;  %v5242_v12 = vld [vmem:[%s7640_s1 + $0x218] ss:$12 sps:$4 sm:$0xff]  }
 0x44a   : > { %v6801_v24 = vadd.f32 %v2891_v53, %v6371_v34  ;;  %v1676_v43 = vpop.f32.mrb[94].mxu0  ;;  %v2893_v6 = vpop.f32.mrb[109].mxu1  ;;  %v5243_v34 = vld [vmem:[%s7640_s1 + $0x34c] ss:$12 sps:$4 sm:$0xff]  }
 0x44b   : > { %v6810_v2 = vadd.f32 %v6389_v59, %v1676_v43  ;;  %v1678_v40 = vpop.f32.mrb[95].mxu0  ;;  %v2894_v11 = vpop.f32.mrb[110].mxu1 }
 0x44c   : > { %7684 = vst [vmem:[#allocation41_spill] sm:$0xff] %v6801_v24  ;;  %v6816_v53 = vadd.f32 %v2894_v11, %v6387_v20  ;;  %v2896_v32 = vpop.f32.mrb[111].mxu1  ;;  %v6818_v6 = vpop.permute.xlu1 %3644  ;;  %v5245_v20 = vld [vmem:[%s7640_s1 + $0x230] ss:$12 sps:$4 sm:$0xff]  }
 0x44d   : > { %4786 = vmatmul.mubr.bf16.gmra.mrb[200].mxu0 %v5240_v45  ;;  %v6820_v52 = vpop.permute.xlu0 %3649 }
 0x44e   : > { %3106 = vmatmul.mubr.bf16.gmra.mrb[216].mxu1 %v5241_v51  ;;  %4789 = vmatprep.mubr.bf16.mxu0 %v5242_v12  ;;  %7685 = vst [vmem:[#allocation42_spill] sm:$0xff] %v6820_v52  ;;  %v5246_v12 = vld [vmem:[%s7640_s1 + $0x348] ss:$12 sps:$4 sm:$0xff]  }
 0x44f   : > { %3113 = vmatprep.mubr.bf16.mxu1 %v5243_v34 }
 0x450   : > { %v1681_v59 = vpop.f32.mrb[96].mxu0 }
 0x451   : > { %v6823_v43 = vadd.f32 %v6404_v0, %v1681_v59  ;;  %v1683_v40 = vpop.f32.mrb[97].mxu0  ;;  %v2899_v24 = vpop.f32.mrb[112].mxu1  ;;  %v5247_v0 = vld [vmem:[%s7640_s1 + $0x248] ss:$12 sps:$4 sm:$0xff]  }
 0x452   : > { %v6829_v11 = vadd.f32 %v2899_v24, %v6397_v22  ;;  %v1684_v45 = vpop.f32.mrb[98].mxu0  ;;  %v2901_v51 = vpop.f32.mrb[113].mxu1  ;;  %v5248_v22 = vld [vmem:[%s7640_s1 + $0x364] ss:$12 sps:$4 sm:$0xff]  }
 0x453   : > { %v6838_v34 = vadd.f32 %v6420_v55, %v1684_v45  ;;  %v1686_v32 = vpop.f32.mrb[99].mxu0  ;;  %v2902_v59 = vpop.f32.mrb[114].mxu1 }
 0x454   : > { %7686 = vst [vmem:[#allocation43_spill] sm:$0xff] %v6829_v11  ;;  %v6844_v24 = vadd.f32 %v2902_v59, %v6413_v37  ;;  %v2904_v40 = vpop.f32.mrb[115].mxu1  ;;  %v6846_v51 = vpop.permute.xlu1 %3654  ;;  %v5250_v37 = vld [vmem:[%s7640_s1 + $0x260] ss:$12 sps:$4 sm:$0xff]  }
 0x455   : > { %4790 = vmatmul.mubr.bf16.gmra.mrb[204].mxu0 %v5245_v20  ;;  %7688 = vst [vmem:[#allocation45_spill] sm:$0xff] %v6846_v51  ;;  %v6848_v11 = vpop.permute.xlu0 %3659 }
 0x456   : > { %7687 = vst [vmem:[#allocation44_spill] sm:$0xff] %v6844_v24  ;;  %3114 = vmatmul.mubr.bf16.gmra.mrb[220].mxu1 %v5246_v12  ;;  %4793 = vmatprep.mubr.bf16.mxu0 %v5247_v0  ;;  %v5251_v0 = vld [vmem:[%s7640_s1 + $0x360] ss:$12 sps:$4 sm:$0xff]  }
 0x457   : > { %3121 = vmatprep.mubr.bf16.mxu1 %v5248_v22 }
 0x458   : > { %v1689_v55 = vpop.f32.mrb[100].mxu0 }
 0x459   : > { %v6851_v45 = vadd.f32 %v6399_v23, %v1689_v55  ;;  %v1691_v32 = vpop.f32.mrb[101].mxu0  ;;  %v2907_v52 = vpop.f32.mrb[116].mxu1  ;;  %v5252_v23 = vld [vmem:[%s7640_s1 + $0x278] ss:$12 sps:$4 sm:$0xff]  }
 0x45a   : > { %v6857_v59 = vadd.f32 %v2907_v52, %v6423_v61  ;;  %v1692_v20 = vpop.f32.mrb[102].mxu0  ;;  %v2909_v12 = vpop.f32.mrb[117].mxu1  ;;  %v5253_v61 = vld [vmem:[%s7640_s1 + $0x37c] ss:$12 sps:$4 sm:$0xff]  }
 0x45b   : > { %v6866_v22 = vadd.f32 %v6415_v60, %v1692_v20  ;;  %v1694_v40 = vpop.f32.mrb[103].mxu0  ;;  %v2910_v55 = vpop.f32.mrb[118].mxu1  ;;  %v7693_v20 = vld [vmem:[#allocation3_spill] sm:$0xff] }
 0x45c   : > { %7689 = vst [vmem:[#allocation46_spill] sm:$0xff] %v6857_v59  ;;  %v6872_v52 = vadd.f32 %v2910_v55, %v6439_v33  ;;  %v2912_v32 = vpop.f32.mrb[119].mxu1  ;;  %v6874_v12 = vpop.permute.xlu1 %3664  ;;  %v5255_v33 = vld [vmem:[%s7640_s1 + $0x290] ss:$12 sps:$4 sm:$0xff]  }
 0x45d   : > { %4794 = vmatmul.mubr.bf16.gmra.mrb[208].mxu0 %v5250_v37  ;;  %7691 = vst [vmem:[#allocation48_spill] sm:$0xff] %v6874_v12  ;;  %v6876_v24 = vpop.permute.xlu0 %3669  ;;  %v7695_v32 = vld [vmem:[#allocation5_spill] sm:$0xff] }
 0x45e   : > { %7690 = vst [vmem:[#allocation47_spill] sm:$0xff] %v6872_v52  ;;  %3122 = vmatmul.mubr.bf16.gmra.mrb[224].mxu1 %v5251_v0  ;;  %4797 = vmatprep.mubr.bf16.mxu0 %v5252_v23  ;;  %7692 = vst [vmem:[#allocation49_spill] sm:$0xff] %v6876_v24  ;;  %v5256_v23 = vld [vmem:[%s7640_s1 + $0x378] ss:$12 sps:$4 sm:$0xff]  }
 0x45f   : > { %3129 = vmatprep.mubr.bf16.mxu1 %v5253_v61  ;;  %v5257_v61 = vld [vmem:[%s7640_s1 + $0x2a8] ss:$12 sps:$4 sm:$0xff]  }
 0x460   : > { %v1697_v60 = vpop.f32.mrb[104].mxu0 }
 0x461   : > { %v6879_v40 = vadd.f32 %v7693_v20, %v1697_v60  ;;  %v1699_v59 = vpop.f32.mrb[105].mxu0  ;;  %v2915_v51 = vpop.f32.mrb[120].mxu1 }
 0x462   : > { %v6885_v55 = vadd.f32 %v2915_v51, %v6449_v47  ;;  %v1700_v37 = vpop.f32.mrb[106].mxu0  ;;  %v2917_v0 = vpop.f32.mrb[121].mxu1  ;;  %v5258_v47 = vld [vmem:[%s7640_s1 + $0x394] ss:$12 sps:$4 sm:$0xff]  }
 0x463   : > { %v6894_v59 = vadd.f32 %v7695_v32, %v1700_v37  ;;  %v1702_v60 = vpop.f32.mrb[107].mxu0  ;;  %v2918_v20 = vpop.f32.mrb[122].mxu1  ;;  %v7699_v32 = vld [vmem:[#allocation2_spill] sm:$0xff] }
 0x464   : > { %7694 = vst [vmem:[#allocation3_spill] sm:$0xff] %v6885_v55  ;;  %v6900_v51 = vadd.f32 %v2918_v20, %v6465_v58  ;;  %v2920_v0 = vpop.f32.mrb[123].mxu1  ;;  %v6902_v55 = vpop.permute.xlu1 %3674  ;;  %v5260_v58 = vld [vmem:[%s7640_s1 + $0x2c0] ss:$12 sps:$4 sm:$0xff]  }
 0x465   : > { %4798 = vmatmul.mubr.bf16.gmra.mrb[212].mxu0 %v5255_v33  ;;  %7697 = vst [vmem:[#allocation50_spill] sm:$0xff] %v6902_v55  ;;  %v6904_v24 = vpop.permute.xlu0 %3679  ;;  %v7701_v0 = vld [vmem:[#allocation4_spill] sm:$0xff] }
 0x466   : > { %7696 = vst [vmem:[#allocation5_spill] sm:$0xff] %v6900_v51  ;;  %3130 = vmatmul.mubr.bf16.gmra.mrb[228].mxu1 %v5256_v23  ;;  %4801 = vmatprep.mubr.bf16.mxu0 %v5257_v61  ;;  %7698 = vst [vmem:[#allocation51_spill] sm:$0xff] %v6904_v24  ;;  %v5261_v61 = vld [vmem:[%s7640_s1 + $0x390] ss:$12 sps:$4 sm:$0xff]  }
 0x467   : > { %3137 = vmatprep.mubr.bf16.mxu1 %v5258_v47  ;;  %v5262_v47 = vld [vmem:[%s7640_s1 + $0x2d8] ss:$12 sps:$4 sm:$0xff]  }
 0x468   : > { %v1705_v37 = vpop.f32.mrb[108].mxu0  ;;  %v6930_v51 = vpop.permute.xlu1 %3684 }
 0x469   : > { %v6907_v60 = vadd.f32 %v7699_v32, %v1705_v37  ;;  %v1707_v52 = vpop.f32.mrb[109].mxu0  ;;  %v2923_v12 = vpop.f32.mrb[124].mxu1  ;;  %7703 = vst [vmem:[#allocation52_spill] sm:$0xff] %v6930_v51 }
 0x46a   : > { %v6913_v20 = vadd.f32 %v2923_v12, %v6475_v39  ;;  %v1708_v33 = vpop.f32.mrb[110].mxu0  ;;  %v2925_v23 = vpop.f32.mrb[125].mxu1  ;;  %v5263_v39 = vld [vmem:[%s7640_s1 + $0x3ac] ss:$12 sps:$4 sm:$0xff]  }
 0x46b   : > { %v6922_v52 = vadd.f32 %v7701_v0, %v1708_v33  ;;  %v1710_v37 = vpop.f32.mrb[111].mxu0  ;;  %v2926_v32 = vpop.f32.mrb[126].mxu1  ;;  %v7705_v0 = vld [vmem:[#allocation7_spill] sm:$0xff] }
 0x46c   : > { %7700 = vst [vmem:[#allocation2_spill] sm:$0xff] %v6913_v20  ;;  %v6928_v12 = vadd.f32 %v2926_v32, %v6491_v56  ;;  %v2928_v23 = vpop.f32.mrb[127].mxu1  ;;  %v6932_v20 = vpop.permute.xlu0 %3689  ;;  %v5265_v56 = vld [vmem:[%s7640_s1 + $0x2f0] ss:$12 sps:$4 sm:$0xff]  }
 0x46d   : > { %4802 = vmatmul.mubr.bf16.gmra.mrb[216].mxu0 %v5260_v58  ;;  %7704 = vst [vmem:[#allocation53_spill] sm:$0xff] %v6932_v20  ;;  %v7707_v23 = vld [vmem:[#allocation9_spill] sm:$0xff] }
 0x46e   : > { %7702 = vst [vmem:[#allocation4_spill] sm:$0xff] %v6928_v12  ;;  %3138 = vmatmul.mubr.bf16.gmra.mrb[232].mxu1 %v5261_v61  ;;  %4805 = vmatprep.mubr.bf16.mxu0 %v5262_v47  ;;  %v5266_v47 = vld [vmem:[%s7640_s1 + $0x3a8] ss:$12 sps:$4 sm:$0xff]  }
 0x46f   : > { %3145 = vmatprep.mubr.bf16.mxu1 %v5263_v39  ;;  %v5267_v39 = vld [vmem:[%s7640_s1 + $0x308] ss:$12 sps:$4 sm:$0xff]  }
 0x470   : > { %v1713_v33 = vpop.f32.mrb[112].mxu0  ;;  %v6960_v20 = vpop.permute.xlu0 %3699 }
 0x471   : > { %v6935_v37 = vadd.f32 %v7705_v0, %v1713_v33  ;;  %v1715_v55 = vpop.f32.mrb[113].mxu0  ;;  %v2931_v24 = vpop.f32.mrb[128].mxu1 }
 0x472   : > { %v6941_v32 = vadd.f32 %v2931_v24, %v6501_v28  ;;  %v1716_v58 = vpop.f32.mrb[114].mxu0  ;;  %v2933_v61 = vpop.f32.mrb[129].mxu1  ;;  %v5269_v28 = vld [vmem:[%s7640_s1 + $0x368] ss:$12 sps:$4 sm:$0xff]  }
 0x473   : > { %v6950_v55 = vadd.f32 %v7707_v23, %v1716_v58  ;;  %v1718_v33 = vpop.f32.mrb[115].mxu0  ;;  %v2934_v0 = vpop.f32.mrb[130].mxu1  ;;  %v7710_v23 = vld [vmem:[#allocation6_spill] sm:$0xff] }
 0x474   : > { %7706 = vst [vmem:[#allocation7_spill] sm:$0xff] %v6941_v32  ;;  %v6956_v24 = vadd.f32 %v2934_v0, %v6517_v1  ;;  %v2936_v61 = vpop.f32.mrb[131].mxu1  ;;  %v6958_v32 = vpop.permute.xlu1 %3694  ;;  %v5268_v1 = vld [vmem:[%s7640_s1 + $0x320] ss:$12 sps:$4 sm:$0xff]  }
 0x475   : > { %4806 = vmatmul.mubr.bf16.gmra.mrb[220].mxu0 %v5265_v56  ;;  %7709 = vst [vmem:[#allocation54_spill] sm:$0xff] %v6958_v32  ;;  %v7712_v61 = vld [vmem:[#allocation8_spill] sm:$0xff] }
 0x476   : > { %7708 = vst [vmem:[#allocation9_spill] sm:$0xff] %v6956_v24  ;;  %3146 = vmatmul.mubr.bf16.gmra.mrb[236].mxu1 %v5266_v47  ;;  %4809 = vmatprep.mubr.bf16.mxu0 %v5267_v39  ;;  %v5270_v39 = vld [vmem:[%s7640_s1 + $0x380] ss:$12 sps:$4 sm:$0xff]  }
 0x477   : > { %4817 = vmatprep.mubr.bf16.mxu1 %v5269_v28  ;;  %v5271_v28 = vld [vmem:[%s7640_s1 + $0x338] ss:$12 sps:$4 sm:$0xff]  }
 0x478   : > { %v1721_v58 = vpop.f32.mrb[116].mxu0  ;;  %v6986_v24 = vpop.permute.xlu1 %3704 }
 0x479   : > { %v6963_v33 = vadd.f32 %v7710_v23, %v1721_v58  ;;  %v1723_v12 = vpop.f32.mrb[117].mxu0  ;;  %v2939_v51 = vpop.f32.mrb[132].mxu1  ;;  %7715 = vst [vmem:[#allocation56_spill] sm:$0xff] %v6986_v24 }
 0x47a   : > { %v6969_v0 = vadd.f32 %v2939_v51, %v6527_v42  ;;  %v1724_v56 = vpop.f32.mrb[118].mxu0  ;;  %v2941_v47 = vpop.f32.mrb[133].mxu1  ;;  %v5273_v42 = vld [vmem:[%s7640_s1 + $0x398] ss:$12 sps:$4 sm:$0xff]  }
 0x47b   : > { %v6978_v12 = vadd.f32 %v7712_v61, %v1724_v56  ;;  %v1726_v58 = vpop.f32.mrb[119].mxu0  ;;  %v2942_v23 = vpop.f32.mrb[134].mxu1  ;;  %v7717_v61 = vld [vmem:[#allocation11_spill] sm:$0xff] }
 0x47c   : > { %7711 = vst [vmem:[#allocation6_spill] sm:$0xff] %v6969_v0  ;;  %v6984_v51 = vadd.f32 %v2942_v23, %v6543_v35  ;;  %v2944_v47 = vpop.f32.mrb[135].mxu1  ;;  %v6988_v0 = vpop.permute.xlu0 %3709  ;;  %v5272_v35 = vld [vmem:[%s7640_s1 + $0x350] ss:$12 sps:$4 sm:$0xff]  }
 0x47d   : > { %7713 = vst [vmem:[#allocation8_spill] sm:$0xff] %v6978_v12  ;;  %4810 = vmatmul.mubr.bf16.gmra.mrb[224].mxu0 %v5268_v1  ;;  %7716 = vst [vmem:[#allocation57_spill] sm:$0xff] %v6988_v0 }
 0x47e   : > { %7714 = vst [vmem:[#allocation55_spill] sm:$0xff] %v6984_v51  ;;  %4818 = vmatmul.mubr.bf16.vlgmr.msra.gmra.mrb[240].mxu1 %v5270_v39  ;;  %4813 = vmatprep.mubr.bf16.mxu0 %v5271_v28  ;;  %v5274_v28 = vld [vmem:[%s7640_s1 + $0x3b0] ss:$12 sps:$4 sm:$0xff]   ;;  %v7008_v51 = vpop.permute.xlu1 %3714 }
 0x47f   : > { %4821 = vmatprep.mubr.bf16.mxu1 %v5273_v42  ;;  %v7720_v42 = vld [vmem:[#allocation13_spill] sm:$0xff]  ;;  %7723 = vst [vmem:[#allocation60_spill] sm:$0xff] %v7008_v51 }
 0x480   : > { %v1729_v56 = vpop.f32.mrb[120].mxu0 }
 0x481   : > { %v6991_v58 = vadd.f32 %v7717_v61, %v1729_v56  ;;  %v1731_v32 = vpop.f32.mrb[121].mxu0  ;;  %v2947_v12 = vpop.f32.mrb[136].mxu1 }
 0x482   : > { %v6997_v23 = vadd.f32 %v2947_v12, %v6553_v17  ;;  %v1732_v1 = vpop.f32.mrb[122].mxu0  ;;  %v2949_v39 = vpop.f32.mrb[137].mxu1 }
 0x483   : > { %7718 = vst [vmem:[#allocation11_spill] sm:$0xff] %v6991_v58  ;;  %v7003_v47 = vadd.f32 %v7720_v42, %v1732_v1  ;;  %v1734_v56 = vpop.f32.mrb[123].mxu0  ;;  %v2950_v61 = vpop.f32.mrb[138].mxu1  ;;  %v7724_v39 = vld [vmem:[#allocation10_spill] sm:$0xff] }
 0x484   : > { %7719 = vst [vmem:[#allocation58_spill] sm:$0xff] %v6997_v23  ;;  %v7006_v32 = vadd.f32 %v2950_v61, %v6569_v41  ;;  %v2952_v0 = vpop.f32.mrb[139].mxu1  ;;  %v7010_v17 = vpop.permute.xlu0 %3719  ;;  %v7726_v41 = vld [vmem:[#allocation12_spill] sm:$0xff] }
 0x485   : > { %7721 = vst [vmem:[#allocation13_spill] sm:$0xff] %v7003_v47  ;;  %4814 = vmatmul.mubr.bf16.gmra.mrb[228].mxu0 %v5272_v35  ;;  %v7024_v47 = vpop.permute.xlu1 %3724 }
 0x486   : > { %7722 = vst [vmem:[#allocation59_spill] sm:$0xff] %v7006_v32  ;;  %4822 = vmatmul.mubr.bf16.gmra.mrb[244].mxu1 %v5274_v28  ;;  %v7728_v28 = vld [vmem:[#allocation28_spill] sm:$0xff] }
 0x488   : > { %v1737_v12 = vpop.f32.mrb[124].mxu0 }
 0x489   : > { %v7013_v23 = vadd.f32 %v7724_v39, %v1737_v12  ;;  %v1739_v58 = vpop.f32.mrb[125].mxu0  ;;  %v2955_v24 = vpop.f32.mrb[140].mxu1  ;;  %v7731_v39 = vld [vmem:[#allocation15_spill] sm:$0xff] }
 0x48a   : > { %v7016_v1 = vadd.f32 %v2955_v24, %v6579_v3  ;;  %v1740_v42 = vpop.f32.mrb[126].mxu0  ;;  %v2957_v56 = vpop.f32.mrb[141].mxu1 }
 0x48b   : > { %7725 = vst [vmem:[#allocation10_spill] sm:$0xff] %v7013_v23  ;;  %v7019_v61 = vadd.f32 %v7726_v41, %v1740_v42  ;;  %v1742_v0 = vpop.f32.mrb[127].mxu0  ;;  %v2958_v35 = vpop.f32.mrb[142].mxu1 }
 0x48c   : > { %v7022_v32 = vadd.f32 %v2958_v35, %v7728_v28  ;;  %v2960_v51 = vpop.f32.mrb[143].mxu1  ;;  %v7026_v12 = vpop.permute.xlu0 %3729  ;;  %v7734_v0 = vld [vmem:[#allocation17_spill] sm:$0xff] }
 0x48d   : > { %7727 = vst [vmem:[#allocation12_spill] sm:$0xff] %v7019_v61  ;;  %7730 = vst [vmem:[#allocation61_spill] sm:$0xff] %v7026_v12 }
 0x48e   : > { %7729 = vst [vmem:[#allocation28_spill] sm:$0xff] %v7022_v32  ;;  %v7040_v32 = vpop.permute.xlu1 %3734 }
 0x490   : > { %v1745_v58 = vpop.f32.mrb[128].mxu0 }
 0x491   : > { %v7029_v23 = vadd.f32 %v7731_v39, %v1745_v58  ;;  %v1747_v3 = vpop.f32.mrb[129].mxu0  ;;  %v2963_v24 = vpop.f32.mrb[144].mxu1 }
 0x492   : > { %v7032_v56 = vadd.f32 %v2963_v24, %v6605_v14  ;;  %v1748_v42 = vpop.f32.mrb[130].mxu0  ;;  %v2965_v41 = vpop.f32.mrb[145].mxu1  ;;  %v7737_v3 = vld [vmem:[#allocation14_spill] sm:$0xff] }
 0x493   : > { %7732 = vst [vmem:[#allocation15_spill] sm:$0xff] %v7029_v23  ;;  %v7035_v61 = vadd.f32 %v7734_v0, %v1748_v42  ;;  %v1750_v35 = vpop.f32.mrb[131].mxu0  ;;  %v2966_v51 = vpop.f32.mrb[146].mxu1 }
 0x494   : > { %7733 = vst [vmem:[#allocation62_spill] sm:$0xff] %v7032_v56  ;;  %v7038_v28 = vadd.f32 %v2966_v51, %v6620_v54  ;;  %v2968_v12 = vpop.f32.mrb[147].mxu1  ;;  %v7042_v58 = vpop.permute.xlu0 %3739  ;;  %v7739_v35 = vld [vmem:[#allocation16_spill] sm:$0xff] }
 0x495   : > { %7735 = vst [vmem:[#allocation17_spill] sm:$0xff] %v7035_v61  ;;  %v7056_v56 = vpop.permute.xlu1 %3744 }
 0x496   : > { %7736 = vst [vmem:[#allocation63_spill] sm:$0xff] %v7038_v28 }
 0x498   : > { %v1753_v39 = vpop.f32.mrb[132].mxu0 }
 0x499   : > { %v7045_v23 = vadd.f32 %v7737_v3, %v1753_v39  ;;  %v1755_v14 = vpop.f32.mrb[133].mxu0  ;;  %v2971_v24 = vpop.f32.mrb[148].mxu1 }
 0x49a   : > { %v7048_v41 = vadd.f32 %v2971_v24, %v6629_v49  ;;  %v1756_v42 = vpop.f32.mrb[134].mxu0  ;;  %v2973_v0 = vpop.f32.mrb[149].mxu1  ;;  %v7743_v14 = vld [vmem:[#allocation19_spill] sm:$0xff] }
 0x49b   : > { %7738 = vst [vmem:[#allocation14_spill] sm:$0xff] %v7045_v23  ;;  %v7051_v61 = vadd.f32 %v7739_v35, %v1756_v42  ;;  %v1758_v54 = vpop.f32.mrb[135].mxu0  ;;  %v2974_v12 = vpop.f32.mrb[150].mxu1 }
 0x49c   : > { %v7054_v51 = vadd.f32 %v2974_v12, %v6644_v50  ;;  %v2976_v28 = vpop.f32.mrb[151].mxu1  ;;  %v7058_v39 = vpop.permute.xlu0 %3749  ;;  %v7746_v54 = vld [vmem:[#allocation21_spill] sm:$0xff] }
 0x49d   : > { %7740 = vst [vmem:[#allocation16_spill] sm:$0xff] %v7051_v61  ;;  %7742 = vst [vmem:[#allocation65_spill] sm:$0xff] %v7058_v39 }
 0x49e   : > { %7741 = vst [vmem:[#allocation64_spill] sm:$0xff] %v7054_v51  ;;  %v7072_v51 = vpop.permute.xlu1 %3754 }
 0x4a0   : > { %v1761_v3 = vpop.f32.mrb[136].mxu0 }
 0x4a1   : > { %v7061_v23 = vadd.f32 %v7743_v14, %v1761_v3  ;;  %v1763_v49 = vpop.f32.mrb[137].mxu0  ;;  %v2979_v24 = vpop.f32.mrb[152].mxu1 }
 0x4a2   : > { %v7064_v0 = vadd.f32 %v2979_v24, %v6655_v21  ;;  %v1764_v42 = vpop.f32.mrb[138].mxu0  ;;  %v2981_v35 = vpop.f32.mrb[153].mxu1  ;;  %v7749_v49 = vld [vmem:[#allocation18_spill] sm:$0xff] }
 0x4a3   : > { %7744 = vst [vmem:[#allocation19_spill] sm:$0xff] %v7061_v23  ;;  %v7067_v61 = vadd.f32 %v7746_v54, %v1764_v42  ;;  %v1766_v50 = vpop.f32.mrb[139].mxu0  ;;  %v2982_v28 = vpop.f32.mrb[154].mxu1 }
 0x4a4   : > { %7745 = vst [vmem:[#allocation66_spill] sm:$0xff] %v7064_v0  ;;  %v7070_v12 = vadd.f32 %v2982_v28, %v6670_v5  ;;  %v2984_v39 = vpop.f32.mrb[155].mxu1  ;;  %v7074_v3 = vpop.permute.xlu0 %3759  ;;  %v7751_v50 = vld [vmem:[#allocation20_spill] sm:$0xff] }
 0x4a5   : > { %7747 = vst [vmem:[#allocation21_spill] sm:$0xff] %v7067_v61  ;;  %v7088_v0 = vpop.permute.xlu1 %3764 }
 0x4a6   : > { %7748 = vst [vmem:[#allocation67_spill] sm:$0xff] %v7070_v12 }
 0x4a8   : > { %v1769_v14 = vpop.f32.mrb[140].mxu0 }
 0x4a9   : > { %v7077_v23 = vadd.f32 %v7749_v49, %v1769_v14  ;;  %v1771_v21 = vpop.f32.mrb[141].mxu0  ;;  %v2987_v24 = vpop.f32.mrb[156].mxu1 }
 0x4aa   : > { %v7080_v35 = vadd.f32 %v2987_v24, %v6683_v4  ;;  %v1772_v42 = vpop.f32.mrb[142].mxu0  ;;  %v2989_v54 = vpop.f32.mrb[157].mxu1  ;;  %v7755_v21 = vld [vmem:[#allocation23_spill] sm:$0xff] }
 0x4ab   : > { %7750 = vst [vmem:[#allocation18_spill] sm:$0xff] %v7077_v23  ;;  %v7083_v61 = vadd.f32 %v7751_v50, %v1772_v42  ;;  %v1774_v5 = vpop.f32.mrb[143].mxu0  ;;  %v2990_v39 = vpop.f32.mrb[158].mxu1 }
 0x4ac   : > { %v7086_v28 = vadd.f32 %v2990_v39, %v6698_v26  ;;  %v2992_v12 = vpop.f32.mrb[159].mxu1  ;;  %v7090_v14 = vpop.permute.xlu0 %3769  ;;  %v7758_v5 = vld [vmem:[#allocation25_spill] sm:$0xff] }
 0x4ad   : > { %7752 = vst [vmem:[#allocation20_spill] sm:$0xff] %v7083_v61  ;;  %7754 = vst [vmem:[#allocation69_spill] sm:$0xff] %v7090_v14 }
 0x4ae   : > { %7753 = vst [vmem:[#allocation68_spill] sm:$0xff] %v7086_v28  ;;  %v7104_v28 = vpop.permute.xlu1 %3774 }
 0x4b0   : > { %v1777_v49 = vpop.f32.mrb[144].mxu0 }
 0x4b1   : > { %v7093_v23 = vadd.f32 %v7755_v21, %v1777_v49  ;;  %v1779_v4 = vpop.f32.mrb[145].mxu0  ;;  %v2995_v24 = vpop.f32.mrb[160].mxu1 }
 0x4b2   : > { %v7096_v54 = vadd.f32 %v2995_v24, %v6711_v46  ;;  %v1780_v42 = vpop.f32.mrb[146].mxu0  ;;  %v2997_v50 = vpop.f32.mrb[161].mxu1  ;;  %v7761_v4 = vld [vmem:[#allocation22_spill] sm:$0xff] }
 0x4b3   : > { %7756 = vst [vmem:[#allocation23_spill] sm:$0xff] %v7093_v23  ;;  %v7099_v61 = vadd.f32 %v7758_v5, %v1780_v42  ;;  %v1782_v26 = vpop.f32.mrb[147].mxu0  ;;  %v2998_v12 = vpop.f32.mrb[162].mxu1 }
 0x4b4   : > { %7757 = vst [vmem:[#allocation70_spill] sm:$0xff] %v7096_v54  ;;  %v7102_v39 = vadd.f32 %v2998_v12, %v6726_v18  ;;  %v3000_v14 = vpop.f32.mrb[163].mxu1  ;;  %v7106_v49 = vpop.permute.xlu0 %3779  ;;  %v7763_v26 = vld [vmem:[#allocation24_spill] sm:$0xff] }
 0x4b5   : > { %7759 = vst [vmem:[#allocation25_spill] sm:$0xff] %v7099_v61  ;;  %v7120_v54 = vpop.permute.xlu1 %3784 }
 0x4b6   : > { %7760 = vst [vmem:[#allocation71_spill] sm:$0xff] %v7102_v39 }
 0x4b8   : > { %v1785_v21 = vpop.f32.mrb[148].mxu0 }
 0x4b9   : > { %v7109_v23 = vadd.f32 %v7761_v4, %v1785_v21  ;;  %v1787_v46 = vpop.f32.mrb[149].mxu0  ;;  %v3003_v24 = vpop.f32.mrb[164].mxu1 }
 0x4ba   : > { %v7112_v50 = vadd.f32 %v3003_v24, %v6739_v10  ;;  %v1788_v42 = vpop.f32.mrb[150].mxu0  ;;  %v3005_v5 = vpop.f32.mrb[165].mxu1  ;;  %v7766_v46 = vld [vmem:[#allocation27_spill] sm:$0xff] }
 0x4bb   : > { %7762 = vst [vmem:[#allocation22_spill] sm:$0xff] %v7109_v23  ;;  %v7115_v61 = vadd.f32 %v7763_v26, %v1788_v42  ;;  %v1790_v18 = vpop.f32.mrb[151].mxu0  ;;  %v3006_v14 = vpop.f32.mrb[166].mxu1 }
 0x4bc   : > { %v7118_v12 = vadd.f32 %v3006_v14, %v6754_v48  ;;  %v3008_v39 = vpop.f32.mrb[167].mxu1  ;;  %v7122_v21 = vpop.permute.xlu0 %3789 }
 0x4bd   : > { %7764 = vst [vmem:[#allocation24_spill] sm:$0xff] %v7115_v61  ;;  %7765 = vst [vmem:[#allocation72_spill] sm:$0xff] %v7122_v21  ;;  %v7136_v21 = vpop.permute.xlu1 %3794 }
 0x4c0   : > { %v1793_v4 = vpop.f32.mrb[152].mxu0 }
 0x4c1   : > { %v7125_v23 = vadd.f32 %v7766_v46, %v1793_v4  ;;  %v1795_v10 = vpop.f32.mrb[153].mxu0  ;;  %v3011_v24 = vpop.f32.mrb[168].mxu1 }
 0x4c2   : > { %v7128_v5 = vadd.f32 %v3011_v24, %v6767_v44  ;;  %v1796_v42 = vpop.f32.mrb[154].mxu0  ;;  %v3013_v26 = vpop.f32.mrb[169].mxu1  ;;  %v7770_v10 = vld [vmem:[#allocation26_spill] sm:$0xff] }
 0x4c3   : > { %7767 = vst [vmem:[#allocation27_spill] sm:$0xff] %v7125_v23  ;;  %v7131_v18 = vadd.f32 %v6602_v30, %v1796_v42  ;;  %v1798_v48 = vpop.f32.mrb[155].mxu0  ;;  %v3014_v39 = vpop.f32.mrb[170].mxu1 }
 0x4c4   : > { %v7134_v14 = vadd.f32 %v3014_v39, %v6782_v27  ;;  %v3016_v61 = vpop.f32.mrb[171].mxu1  ;;  %v7138_v4 = vpop.permute.xlu0 %3799  ;;  %v7772_v27 = vld [vmem:[#allocation29_spill] sm:$0xff] }
 0x4c5   : > { %7768 = vst [vmem:[#allocation73_spill] sm:$0xff] %v7131_v18 }
 0x4c6   : > { %7769 = vst [vmem:[#allocation74_spill] sm:$0xff] %v7134_v14 }
 0x4c8   : > { %v1801_v46 = vpop.f32.mrb[156].mxu0 }
 0x4c9   : > { %v7141_v44 = vadd.f32 %v7770_v10, %v1801_v46  ;;  %v1803_v24 = vpop.f32.mrb[157].mxu0  ;;  %v3019_v26 = vpop.f32.mrb[172].mxu1 }
 0x4ca   : > { %v7144_v30 = vadd.f32 %v3019_v26, %v6795_v13  ;;  %v1804_v42 = vpop.f32.mrb[158].mxu0  ;;  %v3021_v48 = vpop.f32.mrb[173].mxu1 }
 0x4cb   : > { %7771 = vst [vmem:[#allocation26_spill] sm:$0xff] %v7141_v44  ;;  %v7147_v39 = vadd.f32 %v7772_v27, %v1804_v42  ;;  %v1806_v61 = vpop.f32.mrb[159].mxu0  ;;  %v3022_v18 = vpop.f32.mrb[174].mxu1 }
 0x4cc   : > { %v7150_v23 = vadd.f32 %v3022_v18, %v6810_v2  ;;  %v3024_v14 = vpop.f32.mrb[175].mxu1  ;;  %v7153_v46 = vpop.permute.xlu1 %3804  ;;  %v7775_v18 = vld [vmem:[#allocation30_spill] sm:$0xff] }
 0x4cd   : > { %7773 = vst [vmem:[#allocation29_spill] sm:$0xff] %v7147_v39  ;;  %v7155_v10 = vpop.permute.xlu0 %3809 }
 0x4ce   : > { %7774 = vst [vmem:[#allocation75_spill] sm:$0xff] %v7155_v10 }
 0x4d0   : > { %v4747_v24 = vpop.f32.mrb[160].mxu0 }
 0x4d1   : > { %v3197_v13 = vadd.f32 %v4747_v24, %v6635_v15  ;;  %v3027_v26 = vpop.f32.mrb[176].mxu1  ;;  %v3188_v44 = vpop.f32.mrb[161].mxu0 }
 0x4d2   : > { %v7166_v2 = vadd.f32 %v3027_v26, %v6823_v43  ;;  %v3189_v14 = vadd.f32 %v3188_v44, %v7775_v18  ;;  %v3029_v42 = vpop.f32.mrb[177].mxu1  ;;  %v4748_v48 = vpop.f32.mrb[162].mxu0 }
 0x4d3   : > { %v3989_v15 = vadd.f32 %v6678_v7, %v3197_v13  ;;  %v3200_v27 = vadd.f32 %v4748_v48, %v6650_v36  ;;  %v3030_v61 = vpop.f32.mrb[178].mxu1  ;;  %v3191_v24 = vpop.f32.mrb[163].mxu0 }
 0x4d4   : > { %v3987_v39 = vadd.f32 %v6680_v62, %v3189_v14  ;;  %v7173_v10 = vadd.f32 %v3030_v61, %v6838_v34  ;;  %v3192_v43 = vadd.f32 %v3191_v24, %v6626_v8  ;;  %v3032_v26 = vpop.f32.mrb[179].mxu1  ;;  %v7182_v13 = vpop.permute.xlu1 %3814  ;;  %v7776_v34 = vld [vmem:[#allocation33_spill] sm:$0xff] }
 0x4d5   : > { %4070 = vst.msk [vmem:[%s7163_s14 + $0x10] sm:$0xff] %vm4067_vm3, %v3989_v15  ;;  %v3990_v44 = vadd.f32 %v6706_v63, %v3200_v27  ;;  %v7186_v36 = vpop.permute.xlu0 %3819 }
 0x4d6   : > { %4068 = vst.msk [vmem:[%s7163_s14] sm:$0xff] %vm4067_vm3, %v3987_v39  ;;  %v3988_v7 = vadd.f32 %v6652_v16, %v3192_v43  ;;  %v7777_v39 = vld [vmem:[#allocation31_spill] sm:$0xff]  ;;  %v7778_v43 = vld [vmem:[#allocation34_spill] sm:$0xff] }
 0x4d7   : > { %4071 = vst.msk [vmem:[%s7163_s14 + $0x18] sm:$0xff] %vm4067_vm3, %v3990_v44 }
 0x4d8   : > { %4069 = vst.msk [vmem:[%s7163_s14 + $0x8] sm:$0xff] %vm4067_vm3, %v3988_v7  ;;  %v4751_v62 = vpop.f32.mrb[164].mxu0  ;;  %v7779_v7 = vld [vmem:[#allocation32_spill] sm:$0xff] }
 0x4d9   : > { %v3213_v8 = vadd.f32 %v4751_v62, %v7776_v34  ;;  %v3035_v18 = vpop.f32.mrb[180].mxu1  ;;  %v3204_v14 = vpop.f32.mrb[165].mxu0 }
 0x4da   : > { %v7192_v63 = vadd.f32 %v3035_v18, %v6851_v45  ;;  %v3205_v16 = vadd.f32 %v3204_v14, %v7777_v39  ;;  %v3037_v42 = vpop.f32.mrb[181].mxu1  ;;  %v4752_v48 = vpop.f32.mrb[166].mxu0  ;;  %v7780_v18 = vld [vmem:[#allocation37_spill] sm:$0xff] }
 0x4db   : > { %v3993_v15 = vadd.f32 %v6736_v57, %v3213_v8  ;;  %v3216_v27 = vadd.f32 %v4752_v48, %v6704_v31  ;;  %v3038_v61 = vpop.f32.mrb[182].mxu1  ;;  %v3207_v24 = vpop.f32.mrb[167].mxu0  ;;  %v7781_v42 = vld [vmem:[#allocation35_spill] sm:$0xff] }
 0x4dc   : > { %v3991_v26 = vadd.f32 %v7778_v43, %v3205_v16  ;;  %v7199_v44 = vadd.f32 %v3038_v61, %v6866_v22  ;;  %v3208_v45 = vadd.f32 %v3207_v24, %v7779_v7  ;;  %v3040_v62 = vpop.f32.mrb[183].mxu1  ;;  %v7208_v8 = vpop.permute.xlu1 %3824 }
 0x4dd   : > { %4074 = vst.msk [vmem:[%s7163_s14 + $0x30] sm:$0xff] %vm4067_vm3, %v3993_v15  ;;  %v3994_v34 = vadd.f32 %v6762_v29, %v3216_v27  ;;  %v7212_v31 = vpop.permute.xlu0 %3829  ;;  %v7783_v62 = vld [vmem:[#allocation36_spill] sm:$0xff] }
 0x4de   : > { %4072 = vst.msk [vmem:[%s7163_s14 + $0x20] sm:$0xff] %vm4067_vm3, %v3991_v26  ;;  %v3992_v57 = vadd.f32 %v6734_v38, %v3208_v45  ;;  %v7782_v26 = vld [vmem:[#allocation38_spill] sm:$0xff] }
 0x4df   : > { %4075 = vst.msk [vmem:[%s7163_s14 + $0x38] sm:$0xff] %vm4067_vm3, %v3994_v34 }
 0x4e0   : > { %4073 = vst.msk [vmem:[%s7163_s14 + $0x28] sm:$0xff] %vm4067_vm3, %v3992_v57  ;;  %v4755_v22 = vpop.f32.mrb[168].mxu0 }
 0x4e1   : > { %v3229_v14 = vadd.f32 %v4755_v22, %v7780_v18  ;;  %v3043_v39 = vpop.f32.mrb[184].mxu1  ;;  %v3220_v16 = vpop.f32.mrb[169].mxu0  ;;  %v7784_v18 = vld [vmem:[#allocation41_spill] sm:$0xff] }
 0x4e2   : > { %v7218_v29 = vadd.f32 %v3043_v39, %v6879_v40  ;;  %v3221_v38 = vadd.f32 %v3220_v16, %v7781_v42  ;;  %v3045_v48 = vpop.f32.mrb[185].mxu1  ;;  %v4756_v15 = vpop.f32.mrb[170].mxu0  ;;  %v7785_v42 = vld [vmem:[#allocation39_spill] sm:$0xff] }
 0x4e3   : > { %v3997_v27 = vadd.f32 %v6792_v9, %v3229_v14  ;;  %v3232_v61 = vadd.f32 %v4756_v15, %v6760_v25  ;;  %v3046_v24 = vpop.f32.mrb[186].mxu1  ;;  %v3223_v43 = vpop.f32.mrb[171].mxu0 }
 0x4e4   : > { %v3995_v7 = vadd.f32 %v7782_v26, %v3221_v38  ;;  %v7225_v45 = vadd.f32 %v3046_v24, %v6894_v59  ;;  %v3224_v40 = vadd.f32 %v3223_v43, %v7783_v62  ;;  %v3048_v34 = vpop.f32.mrb[187].mxu1  ;;  %v7234_v22 = vpop.permute.xlu1 %3834  ;;  %v7786_v43 = vld [vmem:[#allocation42_spill] sm:$0xff]  ;;  %v7787_v62 = vld [vmem:[#allocation40_spill] sm:$0xff] }
 0x4e5   : > { %4078 = vst.msk [vmem:[%s7163_s14 + $0x50] sm:$0xff] %vm4067_vm3, %v3997_v27  ;;  %v3998_v57 = vadd.f32 %v6818_v6, %v3232_v61  ;;  %v7238_v25 = vpop.permute.xlu0 %3839  ;;  %v7788_v34 = vld [vmem:[#allocation48_spill] sm:$0xff] }
 0x4e6   : > { %4076 = vst.msk [vmem:[%s7163_s14 + $0x40] sm:$0xff] %vm4067_vm3, %v3995_v7  ;;  %v3996_v9 = vadd.f32 %v6790_v19, %v3224_v40 }
 0x4e7   : > { %4079 = vst.msk [vmem:[%s7163_s14 + $0x58] sm:$0xff] %vm4067_vm3, %v3998_v57 }
 0x4e8   : > { %4077 = vst.msk [vmem:[%s7163_s14 + $0x48] sm:$0xff] %vm4067_vm3, %v3996_v9  ;;  %v4759_v59 = vpop.f32.mrb[172].mxu0  ;;  %v7789_v9 = vld [vmem:[#allocation45_spill] sm:$0xff] }
 0x4e9   : > { %v3245_v14 = vadd.f32 %v4759_v59, %v7784_v18  ;;  %v3051_v39 = vpop.f32.mrb[188].mxu1  ;;  %v3236_v16 = vpop.f32.mrb[173].mxu0  ;;  %v7790_v18 = vld [vmem:[#allocation46_spill] sm:$0xff] }
 0x4ea   : > { %v7244_v6 = vadd.f32 %v3051_v39, %v6907_v60  ;;  %v3237_v19 = vadd.f32 %v3236_v16, %v7785_v42  ;;  %v3053_v38 = vpop.f32.mrb[189].mxu1  ;;  %v4760_v48 = vpop.f32.mrb[174].mxu0 }
 0x4eb   : > { %v4001_v15 = vadd.f32 %v6848_v11, %v3245_v14  ;;  %v3248_v27 = vadd.f32 %v4760_v48, %v6816_v53  ;;  %v3054_v61 = vpop.f32.mrb[190].mxu1  ;;  %v3239_v24 = vpop.f32.mrb[175].mxu0 }
 0x4ec   : > { %v3999_v26 = vadd.f32 %v7786_v43, %v3237_v19  ;;  %v7251_v7 = vadd.f32 %v3054_v61, %v6922_v52  ;;  %v3240_v60 = vadd.f32 %v3239_v24, %v7787_v62  ;;  %v3056_v40 = vpop.f32.mrb[191].mxu1  ;;  %v7260_v59 = vpop.permute.xlu1 %3844  ;;  %v7791_v19 = vld [vmem:[#allocation43_spill] sm:$0xff] }
 0x4ed   : > { %4082 = vst.msk [vmem:[%s7163_s14 + $0x70] sm:$0xff] %vm4067_vm3, %v4001_v15  ;;  %v4002_v57 = vadd.f32 %v7788_v34, %v3248_v27  ;;  %v7264_v53 = vpop.permute.xlu0 %3849  ;;  %v7792_v27 = vld [vmem:[#allocation51_spill] sm:$0xff] }
 0x4ee   : > { %4080 = vst.msk [vmem:[%s7163_s14 + $0x60] sm:$0xff] %vm4067_vm3, %v3999_v26  ;;  %v4000_v11 = vadd.f32 %v7789_v9, %v3240_v60  ;;  %v7793_v24 = vld [vmem:[#allocation47_spill] sm:$0xff]  ;;  %v7794_v60 = vld [vmem:[#allocation49_spill] sm:$0xff] }
 0x4ef   : > { %4083 = vst.msk [vmem:[%s7163_s14 + $0x78] sm:$0xff] %vm4067_vm3, %v4002_v57  ;;  %v7796_v57 = vld [vmem:[#allocation44_spill] sm:$0xff] }
 0x4f0   : > { %4081 = vst.msk [vmem:[%s7163_s14 + $0x68] sm:$0xff] %vm4067_vm3, %v4000_v11  ;;  %v4763_v52 = vpop.f32.mrb[176].mxu0  ;;  %v7797_v11 = vld [vmem:[#allocation52_spill] sm:$0xff] }
 0x4f1   : > { %v3261_v14 = vadd.f32 %v4763_v52, %v7790_v18  ;;  %v3059_v39 = vpop.f32.mrb[192].mxu1  ;;  %v3252_v16 = vpop.f32.mrb[177].mxu0  ;;  %v7798_v18 = vld [vmem:[#allocation50_spill] sm:$0xff] }
 0x4f2   : > { %v7270_v42 = vadd.f32 %v3059_v39, %v6935_v37  ;;  %v3253_v38 = vadd.f32 %v3252_v16, %v7791_v19  ;;  %v3061_v48 = vpop.f32.mrb[193].mxu1  ;;  %v4764_v15 = vpop.f32.mrb[178].mxu0  ;;  %v7799_v19 = vld [vmem:[#allocation2_spill] sm:$0xff] }
 0x4f3   : > { %v4005_v61 = vadd.f32 %v7792_v27, %v3261_v14  ;;  %v3264_v43 = vadd.f32 %v4764_v15, %v7793_v24  ;;  %v3062_v26 = vpop.f32.mrb[194].mxu1  ;;  %v3255_v62 = vpop.f32.mrb[179].mxu0 }
 0x4f4   : > { %v4003_v40 = vadd.f32 %v7794_v60, %v3253_v38  ;;  %v7277_v34 = vadd.f32 %v3062_v26, %v6950_v55  ;;  %v3256_v37 = vadd.f32 %v3255_v62, %v7796_v57  ;;  %v3064_v9 = vpop.f32.mrb[195].mxu1  ;;  %v7286_v39 = vpop.permute.xlu1 %3854  ;;  %v7801_v60 = vld [vmem:[#allocation4_spill] sm:$0xff] }
 0x4f5   : > { %4086 = vst.msk [vmem:[%s7163_s14 + $0x90] sm:$0xff] %vm4067_vm3, %v4005_v61  ;;  %v4006_v52 = vadd.f32 %v7797_v11, %v3264_v43  ;;  %v7290_v16 = vpop.permute.xlu0 %3859  ;;  %v7800_v61 = vld [vmem:[#allocation3_spill] sm:$0xff]  ;;  %v7802_v9 = vld [vmem:[#allocation53_spill] sm:$0xff] }
 0x4f6   : > { %7795 = vst [vmem:[#allocation30_spill] sm:$0xff] %v7277_v34  ;;  %4084 = vst.msk [vmem:[%s7163_s14 + $0x80] sm:$0xff] %vm4067_vm3, %v4003_v40  ;;  %v4004_v14 = vadd.f32 %v7798_v18, %v3256_v37  ;;  %v7814_v34 = vld [vmem:[#allocation9_spill] sm:$0xff] }
 0x4f7   : > { %4087 = vst.msk [vmem:[%s7163_s14 + $0x98] sm:$0xff] %vm4067_vm3, %v4006_v52  ;;  %v7803_v52 = vld [vmem:[#allocation8_spill] sm:$0xff] }
 0x4f8   : > { %4085 = vst.msk [vmem:[%s7163_s14 + $0x88] sm:$0xff] %vm4067_vm3, %v4004_v14  ;;  %v4767_v55 = vpop.f32.mrb[180].mxu0  ;;  %v7804_v14 = vld [vmem:[#allocation5_spill] sm:$0xff] }
 0x4f9   : > { %v3277_v38 = vadd.f32 %v4767_v55, %v7799_v19  ;;  %v3067_v48 = vpop.f32.mrb[196].mxu1  ;;  %v3268_v15 = vpop.f32.mrb[181].mxu0  ;;  %v7805_v19 = vld [vmem:[#allocation56_spill] sm:$0xff] }
 0x4fa   : > { %v7296_v27 = vadd.f32 %v3067_v48, %v6963_v33  ;;  %v3269_v24 = vadd.f32 %v3268_v15, %v7800_v61  ;;  %v3069_v43 = vpop.f32.mrb[197].mxu1  ;;  %v4768_v26 = vpop.f32.mrb[182].mxu0  ;;  %v7806_v15 = vld [vmem:[#allocation54_spill] sm:$0xff] }
 0x4fb   : > { %v4009_v62 = vadd.f32 %v6960_v20, %v3277_v38  ;;  %v3280_v40 = vadd.f32 %v4768_v26, %v7801_v60  ;;  %v3070_v57 = vpop.f32.mrb[198].mxu1  ;;  %v3271_v37 = vpop.f32.mrb[183].mxu0  ;;  %v7807_v43 = vld [vmem:[#allocation6_spill] sm:$0xff] }
 0x4fc   : > { %v4007_v11 = vadd.f32 %v7802_v9, %v3269_v24  ;;  %v7303_v18 = vadd.f32 %v3070_v57, %v7803_v52  ;;  %v3272_v33 = vadd.f32 %v3271_v37, %v7804_v14  ;;  %v3072_v55 = vpop.f32.mrb[199].mxu1  ;;  %v7312_v38 = vpop.permute.xlu1 %3864  ;;  %v7809_v37 = vld [vmem:[#allocation7_spill] sm:$0xff] }
 0x4fd   : > { %4090 = vst.msk [vmem:[%s7163_s14 + $0xb0] sm:$0xff] %vm4067_vm3, %v4009_v62  ;;  %v4010_v48 = vadd.f32 %v7805_v19, %v3280_v40  ;;  %v7316_v61 = vpop.permute.xlu0 %3869  ;;  %v7808_v40 = vld [vmem:[#allocation11_spill] sm:$0xff] }
 0x4fe   : > { %4088 = vst.msk [vmem:[%s7163_s14 + $0xa0] sm:$0xff] %vm4067_vm3, %v4007_v11  ;;  %v4008_v20 = vadd.f32 %v7806_v15, %v3272_v33  ;;  %v7810_v33 = vld [vmem:[#allocation55_spill] sm:$0xff]  ;;  %v7811_v15 = vld [vmem:[#allocation57_spill] sm:$0xff] }
 0x4ff   : > { %4091 = vst.msk [vmem:[%s7163_s14 + $0xb8] sm:$0xff] %vm4067_vm3, %v4010_v48 }
 0x500   : > { %4089 = vst.msk [vmem:[%s7163_s14 + $0xa8] sm:$0xff] %vm4067_vm3, %v4008_v20  ;;  %v4771_v24 = vpop.f32.mrb[184].mxu0 }
 0x501   : > { %v3293_v26 = vadd.f32 %v4771_v24, %v7807_v43  ;;  %v3075_v60 = vpop.f32.mrb[200].mxu1  ;;  %v3284_v62 = vpop.f32.mrb[185].mxu0  ;;  %v7812_v24 = vld [vmem:[#allocation13_spill] sm:$0xff] }
 0x502   : > { %v7322_v57 = vadd.f32 %v3075_v60, %v7808_v40  ;;  %v3285_v9 = vadd.f32 %v3284_v62, %v7809_v37  ;;  %v3077_v11 = vpop.f32.mrb[201].mxu1  ;;  %v4772_v52 = vpop.f32.mrb[186].mxu0  ;;  %v7815_v37 = vld [vmem:[#allocation60_spill] sm:$0xff] }
 0x503   : > { %v4013_v14 = vadd.f32 %v7010_v17, %v3293_v26  ;;  %v3296_v55 = vadd.f32 %v4772_v52, %v7810_v33  ;;  %v3078_v19 = vpop.f32.mrb[202].mxu1  ;;  %v3287_v48 = vpop.f32.mrb[187].mxu0 }
 0x504   : > { %v4011_v20 = vadd.f32 %v7811_v15, %v3285_v9  ;;  %v7329_v43 = vadd.f32 %v3078_v19, %v7812_v24  ;;  %v3288_v60 = vadd.f32 %v3287_v48, %v7814_v34  ;;  %v3080_v40 = vpop.f32.mrb[203].mxu1  ;;  %v7338_v26 = vpop.permute.xlu1 %3874  ;;  %v7818_v24 = vld [vmem:[#allocation28_spill] sm:$0xff] }
 0x505   : > { %4094 = vst.msk [vmem:[%s7163_s14 + $0xd0] sm:$0xff] %vm4067_vm3, %v4013_v14  ;;  %v4014_v62 = vadd.f32 %v7024_v47, %v3296_v55  ;;  %v7342_v11 = vpop.permute.xlu0 %3879  ;;  %v7816_v47 = vld [vmem:[#allocation10_spill] sm:$0xff] }
 0x506   : > { %7813 = vst [vmem:[#allocation33_spill] sm:$0xff] %v7329_v43  ;;  %4092 = vst.msk [vmem:[%s7163_s14 + $0xc0] sm:$0xff] %vm4067_vm3, %v4011_v20  ;;  %v4012_v17 = vadd.f32 %v7815_v37, %v3288_v60  ;;  %v7817_v55 = vld [vmem:[#allocation58_spill] sm:$0xff]  ;;  %v7819_v37 = vld [vmem:[#allocation61_spill] sm:$0xff] }
 0x507   : > { %4095 = vst.msk [vmem:[%s7163_s14 + $0xd8] sm:$0xff] %vm4067_vm3, %v4014_v62  ;;  %v7821_v43 = vld [vmem:[#allocation59_spill] sm:$0xff] }
 0x508   : > { %4093 = vst.msk [vmem:[%s7163_s14 + $0xc8] sm:$0xff] %vm4067_vm3, %v4012_v17  ;;  %v4775_v9 = vpop.f32.mrb[188].mxu0  ;;  %v7820_v17 = vld [vmem:[#allocation12_spill] sm:$0xff] }
 0x509   : > { %v3309_v34 = vadd.f32 %v4775_v9, %v7016_v1  ;;  %v3083_v52 = vpop.f32.mrb[204].mxu1  ;;  %v3300_v14 = vpop.f32.mrb[189].mxu0 }
 0x50a   : > { %v7348_v33 = vadd.f32 %v3083_v52, %v7816_v47  ;;  %v3301_v19 = vadd.f32 %v3300_v14, %v7817_v55  ;;  %v3085_v48 = vpop.f32.mrb[205].mxu1  ;;  %v4776_v15 = vpop.f32.mrb[190].mxu0 }
 0x50b   : > { %v4017_v20 = vadd.f32 %v7042_v58, %v3309_v34  ;;  %v3312_v60 = vadd.f32 %v4776_v15, %v7818_v24  ;;  %v3086_v40 = vpop.f32.mrb[206].mxu1  ;;  %v3303_v62 = vpop.f32.mrb[191].mxu0  ;;  %v7823_v24 = vld [vmem:[#allocation62_spill] sm:$0xff] }
 0x50c   : > { %v4015_v1 = vadd.f32 %v7819_v37, %v3301_v19  ;;  %v7355_v9 = vadd.f32 %v3086_v40, %v7820_v17  ;;  %v3304_v52 = vadd.f32 %v3303_v62, %v7821_v43  ;;  %v3088_v47 = vpop.f32.mrb[207].mxu1  ;;  %v7364_v34 = vpop.permute.xlu1 %3884  ;;  %v7824_v37 = vld [vmem:[#allocation64_spill] sm:$0xff] }
 0x50d   : > { %4098 = vst.msk [vmem:[%s7163_s14 + $0xf0] sm:$0xff] %vm4067_vm3, %v4017_v20  ;;  %v4018_v14 = vadd.f32 %v7056_v56, %v3312_v60  ;;  %v7368_v55 = vpop.permute.xlu0 %3889  ;;  %v7822_v56 = vld [vmem:[#allocation15_spill] sm:$0xff]  ;;  %v7825_v47 = vld [vmem:[#allocation65_spill] sm:$0xff] }
 0x50e   : > { %4096 = vst.msk [vmem:[%s7163_s14 + $0xe0] sm:$0xff] %vm4067_vm3, %v4015_v1  ;;  %v4016_v58 = vadd.f32 %v7040_v32, %v3304_v52 }
 0x50f   : > { %4099 = vst.msk [vmem:[%s7163_s14 + $0xf8] sm:$0xff] %vm4067_vm3, %v4018_v14  ;;  %v7826_v14 = vld [vmem:[#allocation17_spill] sm:$0xff] }
 0x510   : > { %4097 = vst.msk [vmem:[%s7163_s14 + $0xe8] sm:$0xff] %vm4067_vm3, %v4016_v58  ;;  %v4779_v19 = vpop.f32.mrb[192].mxu0 }
 0x511   : > { %v3325_v43 = vadd.f32 %v4779_v19, %v7048_v41  ;;  %v3091_v48 = vpop.f32.mrb[208].mxu1  ;;  %v3316_v15 = vpop.f32.mrb[193].mxu0  ;;  %v7827_v19 = vld [vmem:[#allocation63_spill] sm:$0xff] }
 0x512   : > { %v7374_v20 = vadd.f32 %v3091_v48, %v7822_v56  ;;  %v3317_v32 = vadd.f32 %v3316_v15, %v7823_v24  ;;  %v3093_v60 = vpop.f32.mrb[209].mxu1  ;;  %v4780_v40 = vpop.f32.mrb[194].mxu0 }
 0x513   : > { %v4021_v62 = vadd.f32 %v7074_v3, %v3325_v43  ;;  %v3328_v1 = vadd.f32 %v4780_v40, %v7824_v37  ;;  %v3094_v17 = vpop.f32.mrb[210].mxu1  ;;  %v3319_v52 = vpop.f32.mrb[195].mxu0 }
 0x514   : > { %v4019_v41 = vadd.f32 %v7825_v47, %v3317_v32  ;;  %v7381_v58 = vadd.f32 %v3094_v17, %v7826_v14  ;;  %v3320_v48 = vadd.f32 %v3319_v52, %v7827_v19  ;;  %v3096_v56 = vpop.f32.mrb[211].mxu1  ;;  %v7390_v43 = vpop.permute.xlu1 %3894 }
 0x515   : > { %4102 = vst.msk [vmem:[%s7163_s14 + $0x110] sm:$0xff] %vm4067_vm3, %v4021_v62  ;;  %v4022_v15 = vadd.f32 %v7088_v0, %v3328_v1  ;;  %v7394_v24 = vpop.permute.xlu0 %3899  ;;  %v7828_v0 = vld [vmem:[#allocation14_spill] sm:$0xff]  ;;  %v7831_v56 = vld [vmem:[#allocation69_spill] sm:$0xff] }
 0x516   : > { %4100 = vst.msk [vmem:[%s7163_s14 + $0x100] sm:$0xff] %vm4067_vm3, %v4019_v41  ;;  %v4020_v3 = vadd.f32 %v7072_v51, %v3320_v48  ;;  %v7829_v1 = vld [vmem:[#allocation66_spill] sm:$0xff]  ;;  %v7830_v41 = vld [vmem:[#allocation68_spill] sm:$0xff] }
 0x517   : > { %4103 = vst.msk [vmem:[%s7163_s14 + $0x118] sm:$0xff] %vm4067_vm3, %v4022_v15  ;;  %v7832_v15 = vld [vmem:[#allocation16_spill] sm:$0xff] }
 0x518   : > { %4101 = vst.msk [vmem:[%s7163_s14 + $0x108] sm:$0xff] %vm4067_vm3, %v4020_v3  ;;  %v4783_v32 = vpop.f32.mrb[196].mxu0 }
 0x519   : > { %v3341_v60 = vadd.f32 %v4783_v32, %v7080_v35  ;;  %v3099_v40 = vpop.f32.mrb[212].mxu1  ;;  %v3332_v62 = vpop.f32.mrb[197].mxu0  ;;  %v7833_v32 = vld [vmem:[#allocation67_spill] sm:$0xff] }
 0x51a   : > { %v7400_v37 = vadd.f32 %v3099_v40, %v7828_v0  ;;  %v3333_v51 = vadd.f32 %v3332_v62, %v7829_v1  ;;  %v3101_v17 = vpop.f32.mrb[213].mxu1  ;;  %v4784_v52 = vpop.f32.mrb[198].mxu0 }
 0x51b   : > { %v4025_v47 = vadd.f32 %v7106_v49, %v3341_v60  ;;  %v3344_v14 = vadd.f32 %v4784_v52, %v7830_v41  ;;  %v3102_v19 = vpop.f32.mrb[214].mxu1  ;;  %v3335_v48 = vpop.f32.mrb[199].mxu0 }
 0x51c   : > { %v4023_v35 = vadd.f32 %v7831_v56, %v3333_v51  ;;  %v7407_v3 = vadd.f32 %v3102_v19, %v7832_v15  ;;  %v3336_v40 = vadd.f32 %v3335_v48, %v7833_v32  ;;  %v3104_v0 = vpop.f32.mrb[215].mxu1  ;;  %v7416_v60 = vpop.permute.xlu1 %3904  ;;  %v7836_v32 = vld [vmem:[#allocation72_spill] sm:$0xff] }
 0x51d   : > { %4106 = vst.msk [vmem:[%s7163_s14 + $0x130] sm:$0xff] %vm4067_vm3, %v4025_v47  ;;  %v4026_v62 = vadd.f32 %v7120_v54, %v3344_v14  ;;  %v7420_v1 = vpop.permute.xlu0 %3909  ;;  %v7835_v47 = vld [vmem:[#allocation70_spill] sm:$0xff]  ;;  %v7837_v0 = vld [vmem:[#allocation21_spill] sm:$0xff] }
 0x51e   : > { %4104 = vst.msk [vmem:[%s7163_s14 + $0x120] sm:$0xff] %vm4067_vm3, %v4023_v35  ;;  %v4024_v49 = vadd.f32 %v7104_v28, %v3336_v40  ;;  %v7834_v28 = vld [vmem:[#allocation19_spill] sm:$0xff] }
 0x51f   : > { %4107 = vst.msk [vmem:[%s7163_s14 + $0x138] sm:$0xff] %vm4067_vm3, %v4026_v62 }
 0x520   : > { %4105 = vst.msk [vmem:[%s7163_s14 + $0x128] sm:$0xff] %vm4067_vm3, %v4024_v49  ;;  %v4787_v51 = vpop.f32.mrb[200].mxu0  ;;  %v7838_v49 = vld [vmem:[#allocation71_spill] sm:$0xff] }
 0x521   : > { %v3357_v17 = vadd.f32 %v4787_v51, %v7112_v50  ;;  %v3107_v52 = vpop.f32.mrb[216].mxu1  ;;  %v3348_v41 = vpop.f32.mrb[201].mxu0 }
 0x522   : > { %v7433_v54 = vadd.f32 %v3107_v52, %v7834_v28  ;;  %v3349_v14 = vadd.f32 %v3348_v41, %v7835_v47  ;;  %v3109_v19 = vpop.f32.mrb[217].mxu1  ;;  %v4788_v48 = vpop.f32.mrb[202].mxu0 }
 0x523   : > { %v4029_v50 = vadd.f32 %v7138_v4, %v3357_v17  ;;  %v3360_v56 = vadd.f32 %v4788_v48, %v7118_v12  ;;  %v3110_v35 = vpop.f32.mrb[218].mxu1  ;;  %v3351_v15 = vpop.f32.mrb[203].mxu0 }
 0x524   : > { %v4027_v40 = vadd.f32 %v7836_v32, %v3349_v14  ;;  %v7440_v62 = vadd.f32 %v3110_v35, %v7837_v0  ;;  %v3352_v51 = vadd.f32 %v3351_v15, %v7838_v49  ;;  %v3112_v52 = vpop.f32.mrb[219].mxu1  ;;  %v7449_v17 = vpop.permute.xlu1 %3914  ;;  %v7840_v0 = vld [vmem:[#allocation75_spill] sm:$0xff]  ;;  %v7841_v49 = vld [vmem:[#allocation20_spill] sm:$0xff] }
 0x525   : > { %4110 = vst.msk [vmem:[%s7430_s17 + $0x10] sm:$0xff] %vm4067_vm3, %v4029_v50  ;;  %v4030_v41 = vadd.f32 %v7153_v46, %v3360_v56  ;;  %v7453_v12 = vpop.permute.xlu0 %3919  ;;  %v7839_v46 = vld [vmem:[#allocation18_spill] sm:$0xff] }
 0x526   : > { %4108 = vst.msk [vmem:[%s7430_s17] sm:$0xff] %vm4067_vm3, %v4027_v40  ;;  %v4028_v4 = vadd.f32 %v7136_v21, %v3352_v51  ;;  %v7842_v52 = vld [vmem:[#allocation74_spill] sm:$0xff] }
 0x527   : > { %4111 = vst.msk [vmem:[%s7430_s17 + $0x18] sm:$0xff] %vm4067_vm3, %v4030_v41 }
 0x528   : > { %4109 = vst.msk [vmem:[%s7430_s17 + $0x8] sm:$0xff] %vm4067_vm3, %v4028_v4  ;;  %v4791_v28 = vpop.f32.mrb[204].mxu0 }
 0x529   : > { %v3373_v47 = vadd.f32 %v4791_v28, %v7144_v30  ;;  %v3115_v14 = vpop.f32.mrb[220].mxu1  ;;  %v3364_v19 = vpop.f32.mrb[205].mxu0 }
 0x52a   : > { %v7459_v48 = vadd.f32 %v3115_v14, %v7839_v46  ;;  %v3365_v21 = vadd.f32 %v3364_v19, %v7128_v5  ;;  %v3117_v50 = vpop.f32.mrb[221].mxu1  ;;  %v4792_v56 = vpop.f32.mrb[206].mxu0 }
 0x52b   : > { %v4033_v35 = vadd.f32 %v7186_v36, %v3373_v47  ;;  %v3376_v15 = vadd.f32 %v4792_v56, %v7150_v23  ;;  %v3118_v32 = vpop.f32.mrb[222].mxu1  ;;  %v3367_v40 = vpop.f32.mrb[207].mxu0 }
 0x52c   : > { %v4031_v30 = vadd.f32 %v7840_v0, %v3365_v21  ;;  %v7466_v51 = vadd.f32 %v3118_v32, %v7841_v49  ;;  %v3368_v41 = vadd.f32 %v3367_v40, %v7842_v52  ;;  %v3120_v4 = vpop.f32.mrb[223].mxu1  ;;  %v7475_v28 = vpop.permute.xlu1 %3924  ;;  %v7844_v0 = vld [vmem:[#allocation25_spill] sm:$0xff] }
 0x52d   : > { %4114 = vst.msk [vmem:[%s7430_s17 + $0x30] sm:$0xff] %vm4067_vm3, %v4033_v35  ;;  %v4034_v5 = vadd.f32 %v7208_v8, %v3376_v15  ;;  %v7479_v23 = vpop.permute.xlu0 %3929  ;;  %v7843_v8 = vld [vmem:[#allocation23_spill] sm:$0xff] }
 0x52e   : > { %4112 = vst.msk [vmem:[%s7430_s17 + $0x20] sm:$0xff] %vm4067_vm3, %v4031_v30  ;;  %v4032_v36 = vadd.f32 %v7182_v13, %v3368_v41 }
 0x52f   : > { %4115 = vst.msk [vmem:[%s7430_s17 + $0x38] sm:$0xff] %vm4067_vm3, %v4034_v5 }
 0x530   : > { %4113 = vst.msk [vmem:[%s7430_s17 + $0x28] sm:$0xff] %vm4067_vm3, %v4032_v36  ;;  %v4795_v47 = vpop.f32.mrb[208].mxu0  ;;  %v7501_v41 = vpop.permute.xlu1 %3934 }
 0x531   : > { %v3389_v14 = vadd.f32 %v4795_v47, %v7192_v63  ;;  %v3123_v19 = vpop.f32.mrb[224].mxu1  ;;  %v3380_v46 = vpop.f32.mrb[209].mxu0 }
 0x532   : > { %v7485_v21 = vadd.f32 %v3123_v19, %v7843_v8  ;;  %v3381_v13 = vadd.f32 %v3380_v46, %v7166_v2  ;;  %v3125_v50 = vpop.f32.mrb[225].mxu1  ;;  %v4796_v56 = vpop.f32.mrb[210].mxu0 }
 0x533   : > { %v4037_v35 = vadd.f32 %v7238_v25, %v3389_v14  ;;  %v3392_v15 = vadd.f32 %v4796_v56, %v7199_v44  ;;  %v3126_v32 = vpop.f32.mrb[226].mxu1  ;;  %v3383_v40 = vpop.f32.mrb[211].mxu0  ;;  %v7846_v50 = vld [vmem:[#allocation24_spill] sm:$0xff] }
 0x534   : > { %v4035_v63 = vadd.f32 %v7212_v31, %v3381_v13  ;;  %v7492_v30 = vadd.f32 %v3126_v32, %v7844_v0  ;;  %v3384_v49 = vadd.f32 %v3383_v40, %v7173_v10  ;;  %v3128_v52 = vpop.f32.mrb[227].mxu1  ;;  %v7505_v44 = vpop.permute.xlu0 %3939 }
 0x535   : > { %4118 = vst.msk [vmem:[%s7430_s17 + $0x50] sm:$0xff] %vm4067_vm3, %v4037_v35  ;;  %v4038_v2 = vadd.f32 %v7260_v59, %v3392_v15  ;;  %v7845_v59 = vld [vmem:[#allocation22_spill] sm:$0xff]  ;;  %v7527_v32 = vpop.permute.xlu1 %3944 }
 0x536   : > { %4116 = vst.msk [vmem:[%s7430_s17 + $0x40] sm:$0xff] %vm4067_vm3, %v4035_v63  ;;  %v4036_v25 = vadd.f32 %v7234_v22, %v3384_v49 }
 0x537   : > { %4119 = vst.msk [vmem:[%s7430_s17 + $0x58] sm:$0xff] %vm4067_vm3, %v4038_v2 }
 0x538   : > { %4117 = vst.msk [vmem:[%s7430_s17 + $0x48] sm:$0xff] %vm4067_vm3, %v4036_v25  ;;  %v4799_v31 = vpop.f32.mrb[212].mxu0 }
 0x539   : > { %v3405_v10 = vadd.f32 %v4799_v31, %v7244_v6  ;;  %v3131_v4 = vpop.f32.mrb[228].mxu1  ;;  %v3396_v5 = vpop.f32.mrb[213].mxu0 }
 0x53a   : > { %v7511_v36 = vadd.f32 %v3131_v4, %v7845_v59  ;;  %v3397_v22 = vadd.f32 %v3396_v5, %v7218_v29  ;;  %v3133_v47 = vpop.f32.mrb[229].mxu1  ;;  %v4800_v14 = vpop.f32.mrb[214].mxu0  ;;  %v7848_v4 = vld [vmem:[#allocation73_spill] sm:$0xff]  ;;  %v7849_v59 = vld [vmem:[#allocation30_spill] sm:$0xff] }
 0x53b   : > { %v4041_v19 = vadd.f32 %v7290_v16, %v3405_v10  ;;  %v3408_v46 = vadd.f32 %v4800_v14, %v7251_v7  ;;  %v3134_v8 = vpop.f32.mrb[230].mxu1  ;;  %v3399_v13 = vpop.f32.mrb[215].mxu0 }
 0x53c   : > { %v4039_v6 = vadd.f32 %v7264_v53, %v3397_v22  ;;  %v7518_v56 = vadd.f32 %v3134_v8, %v7846_v50  ;;  %v3400_v35 = vadd.f32 %v3399_v13, %v7225_v45  ;;  %v3136_v15 = vpop.f32.mrb[231].mxu1  ;;  %v7531_v7 = vpop.permute.xlu0 %3949  ;;  %v7850_v13 = vld [vmem:[#allocation26_spill] sm:$0xff] }
 0x53d   : > { %4122 = vst.msk [vmem:[%s7430_s17 + $0x70] sm:$0xff] %vm4067_vm3, %v4041_v19  ;;  %v4042_v29 = vadd.f32 %v7312_v38, %v3408_v46  ;;  %v7847_v38 = vld [vmem:[#allocation27_spill] sm:$0xff]  ;;  %v3955_v14 = vpop.permute.xlu1 %3954 }
 0x53e   : > { %4120 = vst.msk [vmem:[%s7430_s17 + $0x60] sm:$0xff] %vm4067_vm3, %v4039_v6  ;;  %v4040_v16 = vadd.f32 %v7286_v39, %v3400_v35 }
 0x53f   : > { %4123 = vst.msk [vmem:[%s7430_s17 + $0x78] sm:$0xff] %vm4067_vm3, %v4042_v29 }
 0x540   : > { %4121 = vst.msk [vmem:[%s7430_s17 + $0x68] sm:$0xff] %vm4067_vm3, %v4040_v16  ;;  %v4803_v53 = vpop.f32.mrb[216].mxu0 }
 0x541   : > { %v3421_v45 = vadd.f32 %v4803_v53, %v7296_v27  ;;  %v3139_v40 = vpop.f32.mrb[232].mxu1  ;;  %v3412_v63 = vpop.f32.mrb[217].mxu0 }
 0x542   : > { %v7537_v0 = vadd.f32 %v3139_v40, %v7847_v38  ;;  %v3413_v39 = vadd.f32 %v3412_v63, %v7270_v42  ;;  %v3141_v49 = vpop.f32.mrb[233].mxu1  ;;  %v4804_v52 = vpop.f32.mrb[218].mxu0  ;;  %v7852_v40 = vld [vmem:[#allocation33_spill] sm:$0xff] }
 0x543   : > { %v4045_v2 = vadd.f32 %v7342_v11, %v3421_v45  ;;  %v3424_v25 = vadd.f32 %v4804_v52, %v7303_v18  ;;  %v3142_v31 = vpop.f32.mrb[234].mxu1  ;;  %v3415_v10 = vpop.f32.mrb[219].mxu0 }
 0x544   : > { %v4043_v27 = vadd.f32 %v7316_v61, %v3413_v39  ;;  %v7544_v5 = vadd.f32 %v3142_v31, %v7848_v4  ;;  %v3416_v22 = vadd.f32 %v3415_v10, %v7849_v59  ;;  %v3144_v47 = vpop.f32.mrb[235].mxu1  ;;  %v3960_v18 = vpop.permute.xlu0 %3959 }
 0x545   : > { %4126 = vst.msk [vmem:[%s7430_s17 + $0x90] sm:$0xff] %vm4067_vm3, %v4045_v2  ;;  %v4046_v42 = vadd.f32 %v7364_v34, %v3424_v25 }
 0x546   : > { %4124 = vst.msk [vmem:[%s7430_s17 + $0x80] sm:$0xff] %vm4067_vm3, %v4043_v27  ;;  %v4044_v11 = vadd.f32 %v7338_v26, %v3416_v22 }
 0x547   : > { %4127 = vst.msk [vmem:[%s7430_s17 + $0x98] sm:$0xff] %vm4067_vm3, %v4046_v42 }
 0x548   : > { %4125 = vst.msk [vmem:[%s7430_s17 + $0x88] sm:$0xff] %vm4067_vm3, %v4044_v11  ;;  %v4807_v61 = vpop.f32.mrb[220].mxu0 }
 0x549   : > { %v3437_v19 = vadd.f32 %v4807_v61, %v7348_v33  ;;  %v3147_v46 = vpop.f32.mrb[236].mxu1  ;;  %v3428_v8 = vpop.f32.mrb[221].mxu0  ;;  %v7851_v33 = vld [vmem:[#allocation29_spill] sm:$0xff] }
 0x54a   : > { %v3148_v6 = vadd.f32 %v3147_v46, %v7850_v13  ;;  %v3429_v34 = vadd.f32 %v3428_v8, %v7322_v57  ;;  %v3149_v50 = vpop.f32.mrb[237].mxu1  ;;  %v4808_v26 = vpop.f32.mrb[222].mxu0 }
 0x54b   : > { %v4049_v35 = vadd.f32 %v7394_v24, %v3437_v19  ;;  %v3440_v15 = vadd.f32 %v4808_v26, %v7355_v9  ;;  %v3150_v29 = vpop.f32.mrb[238].mxu1  ;;  %v3431_v16 = vpop.f32.mrb[223].mxu0 }
 0x54c   : > { %v4047_v53 = vadd.f32 %v7368_v55, %v3429_v34  ;;  %v3151_v45 = vadd.f32 %v3150_v29, %v7851_v33  ;;  %v3432_v63 = vadd.f32 %v3431_v16, %v7852_v40  ;;  %v3152_v38 = vpop.f32.mrb[239].mxu1  ;;  %v3965_v24 = vpop.permute.xlu1 %3964 }
 0x54d   : > { %4130 = vst.msk [vmem:[%s7430_s17 + $0xb0] sm:$0xff] %vm4067_vm3, %v4049_v35  ;;  %v4050_v57 = vadd.f32 %v7416_v60, %v3440_v15  ;;  %v3970_v9 = vpop.permute.xlu0 %3969 }
 0x54e   : > { %4128 = vst.msk [vmem:[%s7430_s17 + $0xa0] sm:$0xff] %vm4067_vm3, %v4047_v53  ;;  %v4048_v39 = vadd.f32 %v7390_v43, %v3432_v63 }
 0x54f   : > { %4131 = vst.msk [vmem:[%s7430_s17 + $0xb8] sm:$0xff] %vm4067_vm3, %v4050_v57 }
 0x550   : > { %4129 = vst.msk [vmem:[%s7430_s17 + $0xa8] sm:$0xff] %vm4067_vm3, %v4048_v39  ;;  %v4811_v55 = vpop.f32.mrb[224].mxu0  ;;  %v3975_v11 = vpop.permute.xlu1 %3974 }
 0x551   : > { %v3453_v49 = vadd.f32 %v4811_v55, %v7400_v37  ;;  %v3444_v52 = vpop.f32.mrb[225].mxu0  ;;  %v4819_v2 = vpop.f32.mrb[240].mxu1 }
 0x552   : > { %v3445_v25 = vadd.f32 %v3444_v52, %v7374_v20  ;;  %v3485_v60 = vadd.f32 %v4819_v2, %v7511_v36  ;;  %v4812_v31 = vpop.f32.mrb[226].mxu0  ;;  %v3476_v10 = vpop.f32.mrb[241].mxu1 }
 0x553   : > { %v4053_v43 = vadd.f32 %v7453_v12, %v3453_v49  ;;  %v3456_v27 = vadd.f32 %v4812_v31, %v7407_v3  ;;  %v3477_v4 = vadd.f32 %v3476_v10, %v7485_v21  ;;  %v3447_v59 = vpop.f32.mrb[227].mxu0  ;;  %v4820_v37 = vpop.f32.mrb[242].mxu1 }
 0x554   : > { %v4051_v22 = vadd.f32 %v7420_v1, %v3445_v25  ;;  %v4061_v47 = vadd.f32 %v3960_v18, %v3485_v60  ;;  %v3448_v20 = vadd.f32 %v3447_v59, %v7381_v58  ;;  %v3488_v36 = vadd.f32 %v4820_v37, %v7518_v56  ;;  %v3479_v42 = vpop.f32.mrb[243].mxu1  ;;  %v3980_v18 = vpop.permute.xlu0 %3979 }
 0x555   : > { %4134 = vst.msk [vmem:[%s7430_s17 + $0xd0] sm:$0xff] %vm4067_vm3, %v4053_v43  ;;  %v4054_v3 = vadd.f32 %v7475_v28, %v3456_v27  ;;  %v4059_v12 = vadd.f32 %v7531_v7, %v3477_v4  ;;  %v3480_v21 = vadd.f32 %v3479_v42, %v7492_v30 }
 0x556   : > { %4132 = vst.msk [vmem:[%s7430_s17 + $0xc0] sm:$0xff] %vm4067_vm3, %v4051_v22  ;;  %4142 = vst.msk [vmem:[%s7430_s17 + $0x110] sm:$0xff] %vm4067_vm3, %v4061_v47  ;;  %v4052_v58 = vadd.f32 %v7449_v17, %v3448_v20  ;;  %v4062_v1 = vadd.f32 %v3965_v24, %v3488_v36 }
 0x557   : > { %4135 = vst.msk [vmem:[%s7430_s17 + $0xd8] sm:$0xff] %vm4067_vm3, %v4054_v3  ;;  %4140 = vst.msk [vmem:[%s7430_s17 + $0x100] sm:$0xff] %vm4067_vm3, %v4059_v12  ;;  %v4060_v56 = vadd.f32 %v3955_v14, %v3480_v21 }
 0x558   : > { %4133 = vst.msk [vmem:[%s7430_s17 + $0xc8] sm:$0xff] %vm4067_vm3, %v4052_v58  ;;  %4143 = vst.msk [vmem:[%s7430_s17 + $0x118] sm:$0xff] %vm4067_vm3, %v4062_v1  ;;  %v4815_v28 = vpop.f32.mrb[228].mxu0 }
 0x559   : > { %4141 = vst.msk [vmem:[%s7430_s17 + $0x108] sm:$0xff] %vm4067_vm3, %v4060_v56  ;;  %v3469_v30 = vadd.f32 %v4815_v28, %v7459_v48  ;;  %v3460_v7 = vpop.f32.mrb[229].mxu0  ;;  %v4823_v61 = vpop.f32.mrb[244].mxu1 }
 0x55a   : > { %v3461_v17 = vadd.f32 %v3460_v7, %v7433_v54  ;;  %v3501_v19 = vadd.f32 %v4823_v61, %v3148_v6  ;;  %v4816_v46 = vpop.f32.mrb[230].mxu0  ;;  %v3492_v8 = vpop.f32.mrb[245].mxu1 }
 0x55b   : > { %v4057_v14 = vadd.f32 %v7505_v44, %v3469_v30  ;;  %v3472_v13 = vadd.f32 %v4816_v46, %v7466_v51  ;;  %v3493_v34 = vadd.f32 %v3492_v8, %v7537_v0  ;;  %v3463_v50 = vpop.f32.mrb[231].mxu0  ;;  %v4824_v26 = vpop.f32.mrb[246].mxu1 }
 0x55c   : > { %v4055_v48 = vadd.f32 %v7479_v23, %v3461_v17  ;;  %v4065_v35 = vadd.f32 %v3980_v18, %v3501_v19  ;;  %v3464_v54 = vadd.f32 %v3463_v50, %v7440_v62  ;;  %v3504_v6 = vadd.f32 %v4824_v26, %v3151_v45  ;;  %v3495_v15 = vpop.f32.mrb[247].mxu1  ;;  %v3985_v44 = vpop.permute.xlu1 %3984 }
 0x55d   : > { %4138 = vst.msk [vmem:[%s7430_s17 + $0xf0] sm:$0xff] %vm4067_vm3, %v4057_v14  ;;  %v4058_v51 = vadd.f32 %v7527_v32, %v3472_v13  ;;  %v4063_v0 = vadd.f32 %v3970_v9, %v3493_v34  ;;  %v3496_v29 = vadd.f32 %v3495_v15, %v7544_v5 }
 0x55e   : > { %4136 = vst.msk [vmem:[%s7430_s17 + $0xe0] sm:$0xff] %vm4067_vm3, %v4055_v48  ;;  %4146 = vst.msk [vmem:[%s7430_s17 + $0x130] sm:$0xff] %vm4067_vm3, %v4065_v35  ;;  %v4056_v23 = vadd.f32 %v7501_v41, %v3464_v54  ;;  %v4066_v16 = vadd.f32 %v3985_v44, %v3504_v6 }
 0x55f   : > { %4139 = vst.msk [vmem:[%s7430_s17 + $0xf8] sm:$0xff] %vm4067_vm3, %v4058_v51  ;;  %4144 = vst.msk [vmem:[%s7430_s17 + $0x120] sm:$0xff] %vm4067_vm3, %v4063_v0  ;;  %v4064_v62 = vadd.f32 %v3975_v11, %v3496_v29 }
 0x560   : > { %4137 = vst.msk [vmem:[%s7430_s17 + $0xe8] sm:$0xff] %vm4067_vm3, %v4056_v23  ;;  %4147 = vst.msk [vmem:[%s7430_s17 + $0x138] sm:$0xff] %vm4067_vm3, %v4066_v16 }
 0x561   : > { %4145 = vst.msk [vmem:[%s7430_s17 + $0x128] sm:$0xff] %vm4067_vm3, %v4064_v62 }
 0x562 PF: > { %s16_s20 = sadd.s32 1, %s5297_s20   ;;  %s7853_s18 = smov %s5293_s19 }
 0x563   : > { %p13_p5 = scmp.ge.s32.totalorder %s16_s20, 4   ;;  %s7854_s19 = smov %s7856_s21 }
 0x565   :  { %15 = sbr.rel (!%p13_p5) target bundleno = 2 (0x2), region = 78 }

</bundles_post_ra>
